<compile_context>
chip_gen: v5e
topology: v5e:2x2
jax: 0.10.0
libtpu: 0.0.40
codegen_flags: <defaults>
</compile_context>

<pallas_src>
import functools

import jax
import jax.numpy as jnp
import numpy as np
from jax import lax
from jax.experimental import pallas as pl
from jax.experimental.pallas import tpu as pltpu

LAYER_DIMS = [1, 128, 256, 512, 256, 128, 1]
TILE_B = 128          # batch tile = lane width; keeps the MXU N-dim full

# Odd 32-bit mixing constants, written as signed int32 literals.
_H1 = -1640531535     # 0x9E3779B1
_H2 = 668265263       # 0x27D4EB2F
_H3 = -2049145237     # 0x85EBCA6B
_H4 = -1028477387     # 0xC2B2AE35
_H5 = 374761393       # 0x165667B1


def _round_up(n, m):
    return (n + m - 1) // m * m


def _keep_mask(shape, seed, salt, col0):
    """Bernoulli(1/2) keep mask from a stateless int32 hash.

    Only plain jnp int32 ops (wrap-around mul, add, xor, compare), so it works
    on TPU hardware and in interpret mode alike (no pltpu.prng_*).
    """
    f = lax.broadcasted_iota(jnp.int32, shape, 0)            # feature index
    c = lax.broadcasted_iota(jnp.int32, shape, 1) + col0     # global batch idx
    a = (f * jnp.int32(_H1) + c * jnp.int32(_H2)
         + (seed + jnp.int32(salt)) * jnp.int32(_H5))
    b = (a ^ jnp.int32(_H3)) * jnp.int32(_H4)
    d = (b ^ a) * jnp.int32(_H1)
    return (d ^ b) < 0                                       # sign bit ~ fair coin


def _mlp_kernel(seed_ref, x_ref, p_ref, out_ref, *, training, layout):
    """Whole MLP forward for one lane-dense batch tile.

    Activations are (features, batch_tile): batch lives on the 128 lanes.
    """

    def sec(idx):
        row, rows, cols = layout[idx]
        return p_ref[row:row + rows, 0:cols]

    seed = seed_ref[0]
    tile_b = x_ref.shape[1]
    col0 = pl.program_id(0) * tile_b

    def dropout(h, salt):
        if not training:
            return h
        keep = _keep_mask(h.shape, seed, salt, col0)
        return jnp.where(keep, h * 2.0, 0.0)      # p = 0.5, inverted scaling

    x = x_ref[...]                                 # (1, TILE_B), lane-dense

    # Layer 1 (in=1): K=1 matmul replaced by a VPU broadcast multiply-add.
    h = jnp.tanh(sec(0) * x + sec(1))              # (128, TILE_B)
    h = dropout(h, 1)

    # Layers 2..5: real MXU matmuls; weights stay VMEM-resident across steps.
    for li in range(1, 5):
        w, b = sec(2 * li), sec(2 * li + 1)
        h = jnp.tanh(jnp.dot(w, h, preferred_element_type=jnp.float32) + b)
        h = dropout(h, li + 1)

    # Layer 6 (out=1): N=1 matmul replaced by a sublane reduction so the
    # output block stays lane-dense (1, TILE_B).
    out_ref[...] = jnp.sum(sec(10) * h, axis=0, keepdims=True) + sec(11)


def _pack_params(params):
    """Pack all weights/biases into one (8,128)-aligned f32 VMEM slab.

    Weights keep the PyTorch (out_features, in_features) orientation (layer
    6's (1,128) weight is stored as a (128,1) column for the final reduce);
    biases are stored as (out_features, 1) columns.  Returns (slab, layout)
    with layout[i] = (row_offset, rows, cols), ordered w1,b1,...,w6,b6.
    """
    sections = []
    for li, (w, b) in enumerate(params):
        w = jnp.asarray(w, jnp.float32)
        b = jnp.asarray(b, jnp.float32).reshape(-1, 1)
        if li == len(params) - 1:
            w = w.T
        sections += [w, b]
    width = _round_up(max(int(s.shape[1]) for s in sections), 128)
    blocks, layout, row = [], [], 0
    for s in sections:
        rows, cols = int(s.shape[0]), int(s.shape[1])
        padded_rows = _round_up(rows, 8)
        blk = jnp.zeros((padded_rows, width), jnp.float32).at[:rows, :cols].set(s)
        blocks.append(blk)
        layout.append((row, rows, cols))
        row += padded_rows
    return jnp.concatenate(blocks, axis=0), tuple(layout)


def feedforward_nn(x, params, seed, *, training=True, tile_b=TILE_B):
    """x: (B, 1) float32.  params: 6 (W, b) pairs in PyTorch layout."""
    B = x.shape[0]
    Bp = _round_up(B, tile_b)
    grid_b = Bp // tile_b

    # Lane-dense I/O: batch on the last (lane) axis, zero-padded to the tile.
    x_row = jnp.pad(jnp.asarray(x, jnp.float32).reshape(1, B),
                    ((0, 0), (0, Bp - B)))
    slab, layout = _pack_params(params)

    flops = 2 * Bp * sum(d0 * d1 for d0, d1 in zip(LAYER_DIMS[:-1], LAYER_DIMS[1:]))
    transcendentals = Bp * sum(LAYER_DIMS[1:-1])
    bytes_accessed = int(slab.size) * 4 + 2 * Bp * 4

    kernel = functools.partial(_mlp_kernel, training=training, layout=layout)
    out = pl.pallas_call(
        kernel,
        out_shape=jax.ShapeDtypeStruct((1, Bp), jnp.float32),
        grid_spec=pltpu.PrefetchScalarGridSpec(
            num_scalar_prefetch=1,                            # seed -> SMEM
            grid=(grid_b,),
            in_specs=[
                pl.BlockSpec((1, tile_b), lambda i, s: (0, i)),   # x tile
                pl.BlockSpec(slab.shape, lambda i, s: (0, 0)),    # resident params
            ],
            out_specs=pl.BlockSpec((1, tile_b), lambda i, s: (0, i)),
        ),
        compiler_params=pltpu.CompilerParams(
            dimension_semantics=("parallel",)),               # v7x: 2 TCs split batch
        cost_estimate=pl.CostEstimate(
            flops=flops, transcendentals=transcendentals,
            bytes_accessed=bytes_accessed),
    )(jnp.asarray([seed], jnp.int32), x_row, slab)
    return out[0, :B].reshape(B, 1)


def init_params(key):
    """PyTorch-style init: U(-1/sqrt(fan_in), 1/sqrt(fan_in)), torch layout."""
    params = []
    for din, dout in zip(LAYER_DIMS[:-1], LAYER_DIMS[1:]):
        key, kw, kb = jax.random.split(key, 3)
        bound = 1.0 / (din ** 0.5)
        w = jax.random.uniform(kw, (dout, din), jnp.float32, -bound, bound)
        b = jax.random.uniform(kb, (dout,), jnp.float32, -bound, bound)
        params.append((w, b))
    return params


def reference_forward(x, params):
    """float64 NumPy reference (dropout disabled / eval mode)."""
    h = np.asarray(x, np.float64)
    for i, (w, b) in enumerate(params):
        h = h @ np.asarray(w, np.float64).T + np.asarray(b, np.float64)
        if i < len(params) - 1:
            h = np.tanh(h)
    return h


if __name__ == "__main__":
    key = jax.random.PRNGKey(0)
    key, kx = jax.random.split(key)
    B = 200                                   # pads to 2 batch tiles of 128
    x = jax.random.normal(kx, (B, 1), jnp.float32)
    params = init_params(key)

    # 1) Eval mode (dropout off) vs float64 reference.
    out_eval = jax.block_until_ready(
        feedforward_nn(x, params, seed=0, training=False))
    ref = reference_forward(x, params)
    assert out_eval.shape == (B, 1)
    err = float(np.max(np.abs(np.asarray(out_eval, np.float64) - ref)))
    assert err < 1e-3, f"max abs err {err}"

    # 2) Training mode (dropout p=0.5 via the in-kernel hash), matching the
    #    PyTorch forward() which calls F.dropout with training=True.
    # TODO(synk): the dropout random stream differs from torch's RNG (only the
    # Bernoulli(0.5) + 2x-rescale distribution is matched).
    out_train = jax.block_until_ready(
        feedforward_nn(x, params, seed=1234, training=True))
    assert out_train.shape == (B, 1)
    assert bool(jnp.all(jnp.isfinite(out_train)))

    print("KERNEL_OK")
</pallas_src>

<mosaic_0001>
module attributes {stable_mosaic.version = 11 : i64} {
  func.func @_mlp_kernel(%arg0: i32, %arg1: memref<1xi32, #tpu.memory_space<smem>>, %arg2: memref<1x128xf32, #tpu.memory_space<vmem>>, %arg3: memref<2696x512xf32, #tpu.memory_space<vmem>>, %arg4: memref<1x128xf32, #tpu.memory_space<vmem>>) attributes {dimension_semantics = [#tpu.dimension_semantics<parallel>], iteration_bounds = array<i64: 2>, scalar_prefetch = 1 : i64, scratch_operands = 0 : i64, tpu.core_type = #tpu.core_type<tc>, window_params = [{transform_indices = @transform_0, window_bounds = array<i64: 1, 128>}, {pipeline_mode = #tpu.pipeline_mode<synchronous>, transform_indices = @transform_1, window_bounds = array<i64: 2696, 512>}, {transform_indices = @transform_2, window_bounds = array<i64: 1, 128>}]} {
    %c0 = arith.constant 0 : index
    %c0_0 = arith.constant 0 : index
    %0 = vector.load %arg2[%c0, %c0_0] : memref<1x128xf32, #tpu.memory_space<vmem>>, vector<1x128xf32>
    %c0_1 = arith.constant 0 : index
    %c0_2 = arith.constant 0 : index
    %1 = vector.load %arg3[%c0_1, %c0_2] : memref<2696x512xf32, #tpu.memory_space<vmem>>, vector<128x1xf32>
    %2 = vector.broadcast %1 : vector<128x1xf32> to vector<128x128xf32>
    %3 = vector.broadcast %0 : vector<1x128xf32> to vector<128x128xf32>
    %4 = arith.mulf %2, %3 : vector<128x128xf32>
    %c128 = arith.constant 128 : index
    %c0_3 = arith.constant 0 : index
    %5 = vector.load %arg3[%c128, %c0_3] : memref<2696x512xf32, #tpu.memory_space<vmem>>, vector<128x1xf32>
    %6 = vector.broadcast %5 : vector<128x1xf32> to vector<128x128xf32>
    %7 = arith.addf %4, %6 : vector<128x128xf32>
    %8 = math.tanh %7 : vector<128x128xf32>
    %c256 = arith.constant 256 : index
    %c0_4 = arith.constant 0 : index
    %9 = vector.load %arg3[%c256, %c0_4] : memref<2696x512xf32, #tpu.memory_space<vmem>>, vector<256x128xf32>
    %c512 = arith.constant 512 : index
    %c0_5 = arith.constant 0 : index
    %10 = vector.load %arg3[%c512, %c0_5] : memref<2696x512xf32, #tpu.memory_space<vmem>>, vector<256x1xf32>
    %cst = arith.constant dense<0.000000e+00> : vector<256x128xf32>
    %11 = tpu.matmul %9, %8, %cst {dimension_numbers = #tpu.dot_dimension_numbers<[1], [0], [0], [1], [0, 0, 1, 1], [], []>} : vector<256x128xf32>, vector<128x128xf32>, vector<256x128xf32> -> vector<256x128xf32>
    %12 = vector.broadcast %10 : vector<256x1xf32> to vector<256x128xf32>
    %13 = arith.addf %11, %12 : vector<256x128xf32>
    %14 = math.tanh %13 : vector<256x128xf32>
    %c768 = arith.constant 768 : index
    %c0_6 = arith.constant 0 : index
    %15 = vector.load %arg3[%c768, %c0_6] : memref<2696x512xf32, #tpu.memory_space<vmem>>, vector<512x256xf32>
    %c1280 = arith.constant 1280 : index
    %c0_7 = arith.constant 0 : index
    %16 = vector.load %arg3[%c1280, %c0_7] : memref<2696x512xf32, #tpu.memory_space<vmem>>, vector<512x1xf32>
    %cst_8 = arith.constant dense<0.000000e+00> : vector<512x128xf32>
    %17 = tpu.matmul %15, %14, %cst_8 {dimension_numbers = #tpu.dot_dimension_numbers<[1], [0], [0], [1], [0, 0, 1, 1], [], []>} : vector<512x256xf32>, vector<256x128xf32>, vector<512x128xf32> -> vector<512x128xf32>
    %18 = vector.broadcast %16 : vector<512x1xf32> to vector<512x128xf32>
    %19 = arith.addf %17, %18 : vector<512x128xf32>
    %20 = math.tanh %19 : vector<512x128xf32>
    %c1792 = arith.constant 1792 : index
    %c0_9 = arith.constant 0 : index
    %21 = vector.load %arg3[%c1792, %c0_9] : memref<2696x512xf32, #tpu.memory_space<vmem>>, vector<256x512xf32>
    %c2048 = arith.constant 2048 : index
    %c0_10 = arith.constant 0 : index
    %22 = vector.load %arg3[%c2048, %c0_10] : memref<2696x512xf32, #tpu.memory_space<vmem>>, vector<256x1xf32>
    %cst_11 = arith.constant dense<0.000000e+00> : vector<256x128xf32>
    %23 = tpu.matmul %21, %20, %cst_11 {dimension_numbers = #tpu.dot_dimension_numbers<[1], [0], [0], [1], [0, 0, 1, 1], [], []>} : vector<256x512xf32>, vector<512x128xf32>, vector<256x128xf32> -> vector<256x128xf32>
    %24 = vector.broadcast %22 : vector<256x1xf32> to vector<256x128xf32>
    %25 = arith.addf %23, %24 : vector<256x128xf32>
    %26 = math.tanh %25 : vector<256x128xf32>
    %c2304 = arith.constant 2304 : index
    %c0_12 = arith.constant 0 : index
    %27 = vector.load %arg3[%c2304, %c0_12] : memref<2696x512xf32, #tpu.memory_space<vmem>>, vector<128x256xf32>
    %c2432 = arith.constant 2432 : index
    %c0_13 = arith.constant 0 : index
    %28 = vector.load %arg3[%c2432, %c0_13] : memref<2696x512xf32, #tpu.memory_space<vmem>>, vector<128x1xf32>
    %cst_14 = arith.constant dense<0.000000e+00> : vector<128x128xf32>
    %29 = tpu.matmul %27, %26, %cst_14 {dimension_numbers = #tpu.dot_dimension_numbers<[1], [0], [0], [1], [0, 0, 1, 1], [], []>} : vector<128x256xf32>, vector<256x128xf32>, vector<128x128xf32> -> vector<128x128xf32>
    %30 = vector.broadcast %28 : vector<128x1xf32> to vector<128x128xf32>
    %31 = arith.addf %29, %30 : vector<128x128xf32>
    %32 = math.tanh %31 : vector<128x128xf32>
    %c2560 = arith.constant 2560 : index
    %c0_15 = arith.constant 0 : index
    %33 = vector.load %arg3[%c2560, %c0_15] : memref<2696x512xf32, #tpu.memory_space<vmem>>, vector<128x1xf32>
    %34 = vector.broadcast %33 : vector<128x1xf32> to vector<128x128xf32>
    %35 = arith.mulf %34, %32 : vector<128x128xf32>
    %cst_16 = arith.constant dense<0.000000e+00> : vector<128xf32>
    %36 = vector.multi_reduction <add>, %35, %cst_16 [0] : vector<128x128xf32> to vector<128xf32>
    %37 = vector.shape_cast %36 : vector<128xf32> to vector<1x128xf32>
    %c2688 = arith.constant 2688 : index
    %c0_17 = arith.constant 0 : index
    %38 = vector.load %arg3[%c2688, %c0_17] : memref<2696x512xf32, #tpu.memory_space<vmem>>, vector<1x1xf32>
    %39 = vector.broadcast %38 : vector<1x1xf32> to vector<1x128xf32>
    %40 = arith.addf %37, %39 : vector<1x128xf32>
    %c0_18 = arith.constant 0 : index
    %c0_19 = arith.constant 0 : index
    %41 = vector.load %arg4[%c0_18, %c0_19] : memref<1x128xf32, #tpu.memory_space<vmem>>, vector<1x128xf32>
    tpu.vector_store %arg4[%c0_18, %c0_19], %40 {strides = array<i32>} : memref<1x128xf32, #tpu.memory_space<vmem>>, vector<1x128xf32>,
    return
  }
  func.func @transform_0(%arg0: i32, %arg1: memref<1xi32, #tpu.memory_space<smem>>) -> (i32, i32) {
    %c0_i32 = arith.constant 0 : i32
    %c0_i32_0 = arith.constant 0 : i32
    return %c0_i32, %arg0 : i32, i32
  }
  func.func @transform_1(%arg0: i32, %arg1: memref<1xi32, #tpu.memory_space<smem>>) -> (i32, i32) {
    %c0_i32 = arith.constant 0 : i32
    %c0_i32_0 = arith.constant 0 : i32
    %c0_i32_1 = arith.constant 0 : i32
    return %c0_i32, %c0_i32_0 : i32, i32
  }
  func.func @transform_2(%arg0: i32, %arg1: memref<1xi32, #tpu.memory_space<smem>>) -> (i32, i32) {
    %c0_i32 = arith.constant 0 : i32
    %c0_i32_0 = arith.constant 0 : i32
    return %c0_i32, %arg0 : i32, i32
  }
}

</mosaic_0001>

<bundles_post_ra>
// kernel: tpu_custom_call.1
= control target key start
LH: loop header
LB: loop body
LE: loop exit
PB: predicated region body
PF: predicated region fallthrough
CT: control target
= control target key end

     0   :  { %9 = vsyncpa [#allocation5], 0  ;;  %s4767_s0 = inlined_call_operand.<no memory space> [shape: s32[1], index: 0, kind: input, shape index: {}]   ;;  %s4768_s1 = inlined_call_operand.hbm [shape: f32[1,256], index: 1, kind: input, shape index: {}]   ;;  %s4769_s2 = inlined_call_operand.hbm [shape: f32[2696,512], index: 2, kind: input, shape index: {}]   ;;  %s4770_s3 = inlined_call_operand.hbm [shape: f32[1,256], index: 3, kind: output, shape index: {}]  }
   0x1   :  { %11 = vsyncpa [#allocation5 + $0x1], 0 }
   0x2   :  { %12 = vsyncpa [#allocation8], 0 }
   0x3   :  { %13 = vsyncpa [#allocation6], 0 }
   0x4   :  { %15 = vsyncpa [#allocation6 + $0x1], 0  ;;  %s3650_s12 = smov 0   ;;  %s3652_s13 = smov 0  }
   0x5   :  { %s3654_s14 = smov 0   ;;  %s3656_s0 = smov 0  }
   0x6 LB: > { %s110_s17 = sshll.u32 %s4769_s2, 4  ;;  %s3674_s18 = sadd.s32 4294967295, %s3624_s0   ;;  %s3624_s0 = sphi %s3656_s0, %s4894_s0   ;;  %s3620_s14 = sphi %s3654_s14, %s4893_s14   ;;  %s3616_s13 = sphi %s3652_s13, %s4892_s13   ;;  %s3612_s12 = sphi %s3650_s12, %s4891_s12   ;;  %s111_s17 = int_to_ptr.hbm [resolvable:$true] %s110_s17 }
   0x7   : > { %p3087_p0 = scmp.ge.s32.totalorder %s3624_s0, 1  ;;  %p42_p1 = scmp.eq.s32.totalorder %s3674_s18, 0 }
   0x8   : > { %p99_p2 = scmp.lt.s32.totalorder %s3624_s0, 3  ;;  %s3626_s20 = smov [#allocation7]  }
   0x9   : > { %s112_s21 = sshll.u32 %s3626_s20, 4  ;;  %s3627_s22 = smov 512   ;;  %s113_s21 = int_to_ptr.vmem [resolvable:$true] %s112_s21 }
   0xa   : > { %p3679_p3 = pnand %p3087_p0, %p99_p2  ;;  %s3628_s23 = smov 32  }
   0xb   : > { %s3086_s24 = sadd.s32 4294967294, %s3624_s0   ;;  %s3690_s25 = sadd.s32 1, %s3624_s0  }
   0xc   : > { %p3118_p4 = pneg %p3679_p3  ;;  %s28_s26 = sadd.s32 1, %s3620_s14 }
   0xd   : > { %s25_s27 = ssub.s32 %s3624_s0, %s3690_s25  ;;  %p35_p7 = scmp.ne.s32.totalorder %s3620_s14, %s3616_s13 }
   0xe   : > { %p3119_p6 = pnand %p3118_p4, %p42_p1  ;;  %p26_p8 = scmp.eq.s32.totalorder %s25_s27, 0 }
   0xf   : > { %p36_p9 = scmp.eq.s32.totalorder %s3624_s0, 0  ;;  %p41_p10 = scmp.ne.s32.totalorder %s3616_s13, %s3612_s12 }
  0x10   : > { %3121 = dma.hbm_to_vmem [thread:$0]  (!%p3119_p6), %s111_s17, 172544, %s113_s21, [#allocation8], %s3627_s22, %s3627_s22, %s3628_s23  }
  0x11   : > { %p86_p11 = scmp.eq.s32.totalorder %s3674_s18, 1  ;;  %p3706_p12 = por %p42_p1, %p41_p10 }
  0x12   : > { %s3702_s28 = scalar_select %p26_p8, %s3620_s14, %s28_s26  }
  0x13   : > { %p3710_p13 = por %p86_p11, %p35_p7  ;;  %p92_p0 = scmp.eq.s32.totalorder %s3086_s24, 1 }
  0x14   : > { %p37_p2 = por %p36_p9, %p35_p7  ;;  %s126_s4 = sand.u32 1, %s3620_s14  }
  0x15   : > { %p3715_p4 = por %p92_p0, %p41_p10  ;;  %p3131_p6 = scmp.lt.s32.totalorder %s3624_s0, 2 }
  0x16   : > { %s132_s8 = scalar_lea.hbm %s4768_s1, %s3624_s0  ;;  %s129_s10 = scalar_lea.vmem [#allocation4], %s126_s4 }
  0x17   : > { %s134_s9 = sshll.u32 %s132_s8, 4  ;;  %s136_s11 = sshll.u32 %s129_s10, 4  ;;  %s135_s9 = int_to_ptr.hbm [resolvable:$true] %s134_s9  ;;  %s137_s11 = int_to_ptr.vmem [resolvable:$true] %s136_s11 }
  0x18   : > { %p3724_p8 = pnand %p3131_p6, %p37_p2  ;;  %s127_s16 = scalar_lea.sflag [#allocation5], %s126_s4 }
  0x19   : > { %s3524_s17 = sshra.s32 %s135_s9, 4  ;;  %s3531_s23 = scalar_lea.hbm %s4768_s1, 2  ;;  %s3525_s17 = int_to_ptr.hbm [resolvable:$true] %s3524_s17 }
  0x1a   : > { %s3526_s20 = scalar_lea.hbm %s3525_s17, 1  ;;  %p3528_p9 = pneg %p3724_p8 }
  0x1b   : > { %p3527_p7 = scmp.ne.s32.totalorder %s3525_s17, %s3526_s20  ;;  %p3532_p0 = scmp.lt.s32.totalorder %s3525_s17, %s4768_s1 }
  0x1c   : > { %p3533_p2 = scmp.lt.s32.totalorder %s3531_s23, %s3526_s20 }
  0x1d   : > { %p3529_p10 = pnand %p3528_p9, %p3527_p7 }
  0x1e   : > { %p3534_p6 = por %p3533_p2, %p3532_p0 }
  0x1f   : > { %p3530_p11 = pneg %p3529_p10 }
  0x21   : > { %p3535_p5 = pnand %p3534_p6, %p3530_p11 }
  0x23   : > { %3538 = shalt.err (!%p3535_p5)
}
  0x24   : > { %3125 = dma.hbm_to_vmem [thread:$0]  (!%p3724_p8), %s135_s9, 16, %s137_s11, %s127_s16  }
  0x25   : > { %145 = sbr.rel (%p3679_p3) target bundleno = 1924 (0x784), region = 28 }
  0x2a   : > { %s3741_s27 = sand.u32 1, %s3616_s13  }
  0x2b   : > { %s148_s4 = scalar_lea.sflag [#allocation5], %s3741_s27  ;;  %s150_s6 = scalar_lea.vmem [#allocation4], %s3741_s27 }
  0x2c   : > { %3599 = dma.done.wait (%p3706_p12), %s148_s4, 16  }
  0x2d   : > { %3601 = vsyncadd (%p3706_p12), %s148_s4, 4294967280 }
  0x2e   : > { %3603 = dma.done.wait (%p42_p1), [#allocation8], 172544  }
  0x2f   : > { %3605 = vsyncadd (%p42_p1), [#allocation8], 4294794752  ;;  %v3629_v0 = vmov 0   ;;  %v306_v1 = vld [vmem:[#allocation7 + $0x3e0] sm:$0xff]  ;;  %v3755_v48 = vld [vmem:[%s150_s6] ss:$0 sm:$0xff]  ;;  %s3010_s7 = scalar_lea.hbm %s4770_s3, %s3674_s18 }
  0x30   : > { %3172 = vset.pattern.permute.xlu2 %v3629_v0  ;;  %3171 = vset.pattern.permute.xlu1 %v3629_v0  ;;  %v305_v2 = vld [vmem:[#allocation7 + $0x3c0] sm:$0xff]  ;;  %s174_s8 = scalar_lea.vmem [#allocation9], %s3741_s27  ;;  %s3014_s10 = sshll.u32 %s3010_s7, 4  ;;  %s3015_s10 = int_to_ptr.hbm [resolvable:$true] %s3014_s10 }
  0x31   : > { %3170 = vset.pattern.permute.xlu0 %v3629_v0  ;;  %v191_v3 = vld [vmem:[#allocation7 + $0x1e0] sm:$0xff]  ;;  %384 = vperm.xlu1 %3171, %v306_v1   ;;  %s3012_s9 = sshll.u32 %s174_s8, 4  ;;  %s3002_s11 = scalar_lea.sflag [#allocation6], %s3741_s27  ;;  %s3013_s9 = int_to_ptr.vmem [resolvable:$true] %s3012_s9 }
  0x32   : > { %379 = vperm.xlu2 %3172, %v305_v2   ;;  %269 = vperm.xlu0 %3170, %v191_v3   ;;  %v189_v4 = vld [vmem:[#allocation7 + $0x1a0] sm:$0xff]  ;;  %s3568_s15 = sshra.s32 %s3015_s10, 4  ;;  %s3574_s20 = scalar_lea.hbm %s4770_s3, 2  ;;  %s3569_s15 = int_to_ptr.hbm [resolvable:$true] %s3568_s15 }
  0x33   : > { %v188_v5 = vld [vmem:[#allocation7 + $0x180] sm:$0xff]  ;;  %s3570_s16 = scalar_lea.hbm %s3569_s15, 1  ;;  %p3575_p12 = scmp.lt.s32.totalorder %s3569_s15, %s4770_s3 }
  0x34   : > { %v190_v6 = vld [vmem:[#allocation7 + $0x1c0] sm:$0xff]  ;;  %p3571_p1 = scmp.ne.s32.totalorder %s3569_s15, %s3570_s16  ;;  %p3576_p8 = scmp.lt.s32.totalorder %s3574_s20, %s3570_s16 }
  0x35   : > { %v303_v7 = vld [vmem:[#allocation7 + $0x380] sm:$0xff] }
  0x36   : > { %v187_v8 = vld [vmem:[#allocation7 + $0x160] sm:$0xff]  ;;  %p3572_p3 = pnand %p3571_p1, %p3710_p13  ;;  %p3577_p7 = por %p3576_p8, %p3575_p12 }
  0x37   : > { %v304_v9 = vld [vmem:[#allocation7 + $0x3a0] sm:$0xff] }
  0x38   : > { %v302_v10 = vld [vmem:[#allocation7 + $0x360] sm:$0xff]  ;;  %p3573_p5 = pneg %p3572_p3 }
  0x39   : > { %259 = vperm.xlu1 %3171, %v189_v4   ;;  %v185_v11 = vld [vmem:[#allocation7 + $0x120] sm:$0xff] }
  0x3a   : > { %254 = vperm.xlu2 %3172, %v188_v5   ;;  %264 = vperm.xlu0 %3170, %v190_v6   ;;  %v186_v12 = vld [vmem:[#allocation7 + $0x140] sm:$0xff]  ;;  %p3578_p9 = pnand %p3577_p7, %p3573_p5 }
  0x3b   : > { %v300_v13 = vld [vmem:[#allocation7 + $0x320] sm:$0xff] }
  0x3c   : > { %v184_v14 = vld [vmem:[#allocation7 + $0x100] sm:$0xff] }
  0x3d   : > { %v301_v15 = vld [vmem:[#allocation7 + $0x340] sm:$0xff] }
  0x3e   : > { %v299_v16 = vld [vmem:[#allocation7 + $0x300] sm:$0xff] }
  0x3f   : > { %v182_v17 = vld [vmem:[#allocation7 + $0xc0] sm:$0xff] }
  0x40   : > { %v183_v18 = vld [vmem:[#allocation7 + $0xe0] sm:$0xff] }
  0x41   : > { %249 = vperm.xlu1 %3171, %v187_v8   ;;  %v297_v19 = vld [vmem:[#allocation7 + $0x2c0] sm:$0xff] }
  0x42   : > { %369 = vperm.xlu2 %3172, %v303_v7   ;;  %374 = vperm.xlu0 %3170, %v304_v9   ;;  %v181_v20 = vld [vmem:[#allocation7 + $0xa0] sm:$0xff] }
  0x43   : > { %v298_v21 = vld [vmem:[#allocation7 + $0x2e0] sm:$0xff] }
  0x44   : > { %v296_v22 = vld [vmem:[#allocation7 + $0x2a0] sm:$0xff] }
  0x45   : > { %v179_v23 = vld [vmem:[#allocation7 + $0x60] sm:$0xff] }
  0x46   : > { %v180_v24 = vld [vmem:[#allocation7 + $0x80] sm:$0xff] }
  0x47   : > { %v294_v25 = vld [vmem:[#allocation7 + $0x260] sm:$0xff] }
  0x48   : > { %v178_v26 = vld [vmem:[#allocation7 + $0x40] sm:$0xff] }
  0x49   : > { %364 = vperm.xlu1 %3171, %v302_v10   ;;  %v295_v27 = vld [vmem:[#allocation7 + $0x280] sm:$0xff] }
  0x4a   : > { %239 = vperm.xlu2 %3172, %v185_v11   ;;  %244 = vperm.xlu0 %3170, %v186_v12   ;;  %v293_v28 = vld [vmem:[#allocation7 + $0x240] sm:$0xff] }
  0x4b   : > { %v176_v29 = vld [vmem:[#allocation7] sm:$0xff] }
  0x4c   : > { %v177_v30 = vld [vmem:[#allocation7 + $0x20] sm:$0xff] }
  0x4d   : > { %v291_v31 = vld [vmem:[#allocation7 + $0x200] sm:$0xff] }
  0x4e   : > { %v482_v32 = vld [vmem:[#allocation7 + $0xbe0] sm:$0xff] }
  0x4f   : > { %v292_v33 = vld [vmem:[#allocation7 + $0x220] sm:$0xff] }
  0x50   : > { %v466_v34 = vld [vmem:[#allocation7 + $0x9e0] sm:$0xff] }
  0x51   : > { %234 = vperm.xlu1 %3171, %v184_v14   ;;  %v480_v35 = vld [vmem:[#allocation7 + $0xba0] sm:$0xff] }
  0x52   : > { %354 = vperm.xlu2 %3172, %v300_v13   ;;  %359 = vperm.xlu0 %3170, %v301_v15   ;;  %v481_v36 = vld [vmem:[#allocation7 + $0xbc0] sm:$0xff] }
  0x53   : > { %v479_v37 = vld [vmem:[#allocation7 + $0xb80] sm:$0xff] }
  0x54   : > { %v464_v38 = vld [vmem:[#allocation7 + $0x9a0] sm:$0xff] }
  0x55   : > { %v465_v39 = vld [vmem:[#allocation7 + $0x9c0] sm:$0xff] }
  0x56   : > { %v463_v41 = vld [vmem:[#allocation7 + $0x980] sm:$0xff] }
  0x57   : > { %v477_v42 = vld [vmem:[#allocation7 + $0xb40] sm:$0xff] }
  0x58   : > { %v478_v43 = vld [vmem:[#allocation7 + $0xb60] sm:$0xff] }
  0x59   : > { %349 = vperm.xlu1 %3171, %v299_v16   ;;  %v476_v45 = vld [vmem:[#allocation7 + $0xb20] sm:$0xff] }
  0x5a   : > { %224 = vperm.xlu2 %3172, %v182_v17   ;;  %229 = vperm.xlu0 %3170, %v183_v18   ;;  %v461_v46 = vld [vmem:[#allocation7 + $0x940] sm:$0xff] }
  0x5b   : > { %v462_v47 = vld [vmem:[#allocation7 + $0x960] sm:$0xff] }
  0x5c   : > { %v460_v53 = vld [vmem:[#allocation7 + $0x920] sm:$0xff] }
  0x5d   : > { %v474_v54 = vld [vmem:[#allocation7 + $0xae0] sm:$0xff] }
  0x5e   : > { %v475_v56 = vld [vmem:[#allocation7 + $0xb00] sm:$0xff] }
  0x5f   : > { %v473_v60 = vld [vmem:[#allocation7 + $0xac0] sm:$0xff] }
  0x60   : > { %v458_v61 = vld [vmem:[#allocation7 + $0x8e0] sm:$0xff] }
  0x61   : > { %219 = vperm.xlu1 %3171, %v181_v20   ;;  %v459_v0 = vld [vmem:[#allocation7 + $0x900] sm:$0xff] }
  0x62   : > { %339 = vperm.xlu2 %3172, %v297_v19   ;;  %344 = vperm.xlu0 %3170, %v298_v21   ;;  %v457_v8 = vld [vmem:[#allocation7 + $0x8c0] sm:$0xff] }
  0x63   : > { %v471_v9 = vld [vmem:[#allocation7 + $0xa80] sm:$0xff] }
  0x64   : > { %v472_v11 = vld [vmem:[#allocation7 + $0xaa0] sm:$0xff] }
  0x65   : > { %v470_v18 = vld [vmem:[#allocation7 + $0xa60] sm:$0xff] }
  0x66   : > { %v455_v19 = vld [vmem:[#allocation7 + $0x880] sm:$0xff] }
  0x67   : > { %v456_v21 = vld [vmem:[#allocation7 + $0x8a0] sm:$0xff] }
  0x69   : > { %334 = vperm.xlu1 %3171, %v296_v22  }
  0x6a   : > { %209 = vperm.xlu2 %3172, %v179_v23   ;;  %214 = vperm.xlu0 %3170, %v180_v24  }
  0x71   : > { %204 = vperm.xlu1 %3171, %v178_v26  }
  0x72   : > { %324 = vperm.xlu2 %3172, %v294_v25   ;;  %329 = vperm.xlu0 %3170, %v295_v27  }
  0x79   : > { %319 = vperm.xlu1 %3171, %v293_v28  }
  0x7a   : > { %194 = vperm.xlu2 %3172, %v176_v29   ;;  %199 = vperm.xlu0 %3170, %v177_v30   ;;  %v454_v30 = vld [vmem:[#allocation7 + $0x860] sm:$0xff] }
  0x81   : > { %309 = vperm.xlu1 %3171, %v291_v31   ;;  %v468_v31 = vld [vmem:[#allocation7 + $0xa20] sm:$0xff] }
  0x82   : > { %640 = vperm.xlu2 %3172, %v482_v32   ;;  %314 = vperm.xlu0 %3170, %v292_v33   ;;  %v469_v32 = vld [vmem:[#allocation7 + $0xa40] sm:$0xff] }
  0x89   : > { %560 = vperm.xlu1 %3171, %v466_v34  }
  0x8a   : > { %630 = vperm.xlu2 %3172, %v480_v35   ;;  %635 = vperm.xlu0 %3170, %v481_v36  }
  0x8c   : > { %v380_v40 = vpop.permute.xlu2 %379 }
  0x91   : > { %625 = vperm.xlu1 %3171, %v479_v37  }
  0x92   : > { %550 = vperm.xlu2 %3172, %v464_v38   ;;  %555 = vperm.xlu0 %3170, %v465_v39   ;;  %v467_v39 = vld [vmem:[#allocation7 + $0xa00] sm:$0xff] }
  0x94   : > { %v255_v44 = vpop.permute.xlu2 %254 }
  0x95   : > { %v287_v2 = vmul.f32 %v3755_v48, %v255_v44 }
  0x99   : > { %545 = vperm.xlu1 %3171, %v463_v41  }
  0x9a   : > { %615 = vperm.xlu2 %3172, %v477_v42   ;;  %620 = vperm.xlu0 %3170, %v478_v43   ;;  %v453_v42 = vld [vmem:[#allocation7 + $0x840] sm:$0xff] }
  0x9c   : > { %v370_v52 = vpop.permute.xlu2 %369 }
  0x9d   : > { %v399_v6 = vadd.f32 %v370_v52, %v287_v2  ;;  %v930_v52 = vld [vmem:[#allocation7 + $0x15c0] sm:$0xff] }
  0xa1   : > { %610 = vperm.xlu1 %3171, %v476_v45  }
  0xa2   : > { %535 = vperm.xlu2 %3172, %v461_v46   ;;  %540 = vperm.xlu0 %3170, %v462_v47  }
  0xa3   : > { %v385_v49 = vpop.permute.xlu1 %384 }
  0xa4   : > { %v270_v50 = vpop.permute.xlu0 %269  ;;  %v240_v1 = vpop.permute.xlu2 %239 }
  0xa5   : > { %v290_v51 = vmul.f32 %v3755_v48, %v270_v50  ;;  %v284_v22 = vmul.f32 %v3755_v48, %v240_v1 }
  0xa7   : > { %v402_v55 = vadd.f32 %v385_v49, %v290_v51  ;;  %v931_v51 = vld [vmem:[#allocation7 + $0x15e0] sm:$0xff] }
  0xa9   : > { %3174 = vtanh.f32 %v402_v55  ;;  %530 = vperm.xlu1 %3171, %v460_v53   ;;  %v451_v53 = vld [vmem:[#allocation7 + $0x800] sm:$0xff] }
  0xaa   : > { %600 = vperm.xlu2 %3172, %v474_v54   ;;  %605 = vperm.xlu0 %3170, %v475_v56  }
  0xab   : > { %v260_v57 = vpop.permute.xlu1 %259 }
  0xac   : > { %v265_v58 = vpop.permute.xlu0 %264  ;;  %v288_v3 = vmul.f32 %v3755_v48, %v260_v57  ;;  %v355_v12 = vpop.permute.xlu2 %354 }
  0xad   : > { %v289_v59 = vmul.f32 %v3755_v48, %v265_v58  ;;  %v396_v28 = vadd.f32 %v355_v12, %v284_v22 }
  0xaf   : > { %v3175_v62 = vpop.eup %3174  ;;  %v401_v63 = vadd.f32 %v380_v40, %v289_v59  ;;  %v452_v40 = vld [vmem:[#allocation7 + $0x820] sm:$0xff] }
  0xb0   : > { %643 = vmatpush.msra.mxu0 %v3175_v62  ;;  %3094 = vmatpush.msra.mxu3 %v3175_v62 }
  0xb1   : > { %3176 = vtanh.f32 %v401_v63  ;;  %595 = vperm.xlu1 %3171, %v473_v60   ;;  %v928_v60 = vld [vmem:[#allocation7 + $0x1580] sm:$0xff] }
  0xb2   : > { %520 = vperm.xlu2 %3172, %v458_v61   ;;  %525 = vperm.xlu0 %3170, %v459_v0   ;;  %v927_v61 = vld [vmem:[#allocation7 + $0x1560] sm:$0xff] }
  0xb3   : > { %v250_v4 = vpop.permute.xlu1 %249  ;;  %v929_v63 = vld [vmem:[#allocation7 + $0x15a0] sm:$0xff] }
  0xb4   : > { %v375_v5 = vpop.permute.xlu0 %374  ;;  %v286_v13 = vmul.f32 %v3755_v48, %v250_v4  ;;  %v225_v26 = vpop.permute.xlu2 %224 }
  0xb5   : > { %v400_v7 = vadd.f32 %v375_v5, %v288_v3  ;;  %v281_v43 = vmul.f32 %v3755_v48, %v225_v26 }
  0xb7   : > { %v3177_v10 = vpop.eup %3176  ;;  %3178 = vtanh.f32 %v400_v7 }
  0xb8   : > { %644 = vmatpush.msra.mxu0 %v3177_v10  ;;  %3095 = vmatpush.msra.mxu3 %v3177_v10  ;;  %3180 = vtanh.f32 %v399_v6  ;;  %v947_v10 = vld [vmem:[#allocation7 + $0x17e0] sm:$0xff] }
  0xb9   : > { %515 = vperm.xlu1 %3171, %v457_v8   ;;  %v926_v8 = vld [vmem:[#allocation7 + $0x1540] sm:$0xff] }
  0xba   : > { %585 = vperm.xlu2 %3172, %v471_v9   ;;  %590 = vperm.xlu0 %3170, %v472_v11   ;;  %v946_v9 = vld [vmem:[#allocation7 + $0x17c0] sm:$0xff] }
  0xbb   : > { %v365_v14 = vpop.permute.xlu1 %364 }
  0xbc   : > { %v398_v15 = vadd.f32 %v365_v14, %v286_v13  ;;  %v245_v16 = vpop.permute.xlu0 %244  ;;  %v340_v38 = vpop.permute.xlu2 %339 }
  0xbd   : > { %v3179_v17 = vpop.eup %3178  ;;  %v285_v23 = vmul.f32 %v3755_v48, %v245_v16  ;;  %v393_v49 = vadd.f32 %v340_v38, %v281_v43  ;;  %v945_v16 = vld [vmem:[#allocation7 + $0x17a0] sm:$0xff] }
  0xbe   : > { %3182 = vtanh.f32 %v398_v15  ;;  %645 = vmatpush.msra.mxu0 %v3179_v17  ;;  %3096 = vmatpush.msra.mxu3 %v3179_v17  ;;  %v3181_v20 = vpop.eup %3180  ;;  %v924_v17 = vld [vmem:[#allocation7 + $0x1500] sm:$0xff] }
  0xbf   : > { %v436_v38 = vld [vmem:[#allocation7 + $0x620] sm:$0xff] }
  0xc0   : > { %646 = vmatpush.msra.mxu0 %v3181_v20  ;;  %3097 = vmatpush.msra.mxu3 %v3181_v20  ;;  %v437_v43 = vld [vmem:[#allocation7 + $0x640] sm:$0xff] }
  0xc1   : > { %580 = vperm.xlu1 %3171, %v470_v18  }
  0xc2   : > { %505 = vperm.xlu2 %3172, %v455_v19   ;;  %510 = vperm.xlu0 %3170, %v456_v21   ;;  %v925_v19 = vld [vmem:[#allocation7 + $0x1520] sm:$0xff] }
  0xc3   : > { %v235_v24 = vpop.permute.xlu1 %234 }
  0xc4   : > { %v3183_v25 = vpop.eup %3182  ;;  %v360_v27 = vpop.permute.xlu0 %359  ;;  %v283_v33 = vmul.f32 %v3755_v48, %v235_v24 }
  0xc5   : > { %v397_v29 = vadd.f32 %v360_v27, %v285_v23  ;;  %647 = vmatpush.msra.mxu0 %v3183_v25  ;;  %3098 = vmatpush.msra.mxu3 %v3183_v25  ;;  %v210_v54 = vpop.permute.xlu2 %209 }
  0xc6   : > { %v278_v1 = vmul.f32 %v3755_v48, %v210_v54  ;;  %v439_v54 = vld [vmem:[#allocation7 + $0x680] sm:$0xff] }
  0xc7   : > { %3184 = vtanh.f32 %v397_v29  ;;  %v943_v29 = vld [vmem:[#allocation7 + $0x1760] sm:$0xff] }
  0xc8   : > { %3186 = vtanh.f32 %v396_v28  ;;  %v923_v28 = vld [vmem:[#allocation7 + $0x14e0] sm:$0xff] }
  0xc9   : > { %500 = vperm.xlu1 %3171, %v454_v30   ;;  %v944_v30 = vld [vmem:[#allocation7 + $0x1780] sm:$0xff] }
  0xca   : > { %570 = vperm.xlu2 %3172, %v468_v31   ;;  %575 = vperm.xlu0 %3170, %v469_v32   ;;  %v419_v32 = vld [vmem:[#allocation7 + $0x400] sm:$0xff] }
  0xcb   : > { %v350_v34 = vpop.permute.xlu1 %349 }
  0xcc   : > { %v395_v35 = vadd.f32 %v350_v34, %v283_v33  ;;  %v230_v36 = vpop.permute.xlu0 %229  ;;  %v942_v34 = vld [vmem:[#allocation7 + $0x1740] sm:$0xff] }
  0xcd   : > { %v3185_v37 = vpop.eup %3184  ;;  %v282_v44 = vmul.f32 %v3755_v48, %v230_v36  ;;  %v325_v0 = vpop.permute.xlu2 %324  ;;  %v921_v36 = vld [vmem:[#allocation7 + $0x14a0] sm:$0xff] }
  0xce   : > { %3188 = vtanh.f32 %v395_v35  ;;  %648 = vmatpush.msra.mxu0 %v3185_v37  ;;  %3099 = vmatpush.msra.mxu3 %v3185_v37  ;;  %v3187_v41 = vpop.eup %3186  ;;  %v390_v6 = vadd.f32 %v325_v0, %v278_v1  ;;  %v922_v35 = vld [vmem:[#allocation7 + $0x14c0] sm:$0xff] }
  0xcf   : > { %v420_v37 = vld [vmem:[#allocation7 + $0x420] sm:$0xff] }
  0xd0   : > { %649 = vmatpush.msra.mxu0 %v3187_v41  ;;  %3100 = vmatpush.msra.mxu3 %v3187_v41  ;;  %v940_v41 = vld [vmem:[#allocation7 + $0x1700] sm:$0xff] }
  0xd1   : > { %565 = vperm.xlu1 %3171, %v467_v39   ;;  %v920_v39 = vld [vmem:[#allocation7 + $0x1480] sm:$0xff] }
  0xd2   : > { %490 = vperm.xlu2 %3172, %v452_v40   ;;  %495 = vperm.xlu0 %3170, %v453_v42   ;;  %v941_v40 = vld [vmem:[#allocation7 + $0x1720] sm:$0xff] }
  0xd3   : > { %v220_v45 = vpop.permute.xlu1 %219  ;;  %v421_v42 = vld [vmem:[#allocation7 + $0x440] sm:$0xff] }
  0xd4   : > { %v3189_v46 = vpop.eup %3188  ;;  %v345_v47 = vpop.permute.xlu0 %344  ;;  %v280_v55 = vmul.f32 %v3755_v48, %v220_v45  ;;  %v919_v45 = vld [vmem:[#allocation7 + $0x1460] sm:$0xff] }
  0xd5   : > { %v394_v50 = vadd.f32 %v345_v47, %v282_v44  ;;  %650 = vmatpush.msra.mxu0 %v3189_v46  ;;  %3101 = vmatpush.msra.mxu3 %v3189_v46  ;;  %v195_v20 = vpop.permute.xlu2 %194  ;;  %v939_v44 = vld [vmem:[#allocation7 + $0x16e0] sm:$0xff] }
  0xd6   : > { %v275_v21 = vmul.f32 %v3755_v48, %v195_v20  ;;  %v918_v46 = vld [vmem:[#allocation7 + $0x1440] sm:$0xff] }
  0xd7   : > { %3190 = vtanh.f32 %v394_v50  ;;  %v422_v47 = vld [vmem:[#allocation7 + $0x460] sm:$0xff] }
  0xd8   : > { %3192 = vtanh.f32 %v393_v49  ;;  %v438_v49 = vld [vmem:[#allocation7 + $0x660] sm:$0xff] }
  0xd9   : > { %1057 = vperm.xlu1 %3171, %v931_v51   ;;  %v917_v50 = vld [vmem:[#allocation7 + $0x1420] sm:$0xff] }
  0xda   : > { %1052 = vperm.xlu2 %3172, %v930_v52   ;;  %485 = vperm.xlu0 %3170, %v451_v53   ;;  %v938_v51 = vld [vmem:[#allocation7 + $0x16c0] sm:$0xff] }
  0xdb   : > { %v335_v56 = vpop.permute.xlu1 %334  ;;  %v937_v52 = vld [vmem:[#allocation7 + $0x16a0] sm:$0xff] }
  0xdc   : > { %v392_v57 = vadd.f32 %v335_v56, %v280_v55  ;;  %v215_v58 = vpop.permute.xlu0 %214  ;;  %v423_v53 = vld [vmem:[#allocation7 + $0x480] sm:$0xff] }
  0xdd   : > { %v3191_v59 = vpop.eup %3190  ;;  %v279_v2 = vmul.f32 %v3755_v48, %v215_v58  ;;  %v936_v55 = vld [vmem:[#allocation7 + $0x1680] sm:$0xff] }
  0xde   : > { %3194 = vtanh.f32 %v392_v57  ;;  %651 = vmatpush.msra.mxu0 %v3191_v59  ;;  %3102 = vmatpush.msra.mxu3 %v3191_v59  ;;  %v3193_v62 = vpop.eup %3192  ;;  %v916_v56 = vld [vmem:[#allocation7 + $0x1400] sm:$0xff] }
  0xdf   : > { %v935_v57 = vld [vmem:[#allocation7 + $0x1660] sm:$0xff] }
  0xe0   : > { %652 = vmatpush.msra.mxu0 %v3193_v62  ;;  %3103 = vmatpush.msra.mxu3 %v3193_v62  ;;  %v424_v58 = vld [vmem:[#allocation7 + $0x4a0] sm:$0xff] }
  0xe1   : > { %1042 = vperm.xlu1 %3171, %v928_v60   ;;  %v440_v59 = vld [vmem:[#allocation7 + $0x6a0] sm:$0xff] }
  0xe2   : > { %1037 = vperm.xlu2 %3172, %v927_v61   ;;  %1047 = vperm.xlu0 %3170, %v929_v63   ;;  %v933_v60 = vld [vmem:[#allocation7 + $0x1620] sm:$0xff] }
  0xe3   : > { %v205_v3 = vpop.permute.xlu1 %204  ;;  %v934_v61 = vld [vmem:[#allocation7 + $0x1640] sm:$0xff] }
  0xe4   : > { %v3195_v4 = vpop.eup %3194  ;;  %v330_v5 = vpop.permute.xlu0 %329  ;;  %v277_v11 = vmul.f32 %v3755_v48, %v205_v3  ;;  %v932_v62 = vld [vmem:[#allocation7 + $0x1600] sm:$0xff] }
  0xe5   : > { %v391_v7 = vadd.f32 %v330_v5, %v279_v2  ;;  %653 = vmatpush.msra.mxu0 %v3195_v4  ;;  %3104 = vmatpush.msra.mxu3 %v3195_v4  ;;  %v425_v63 = vld [vmem:[#allocation7 + $0x4c0] sm:$0xff] }
  0xe6   : > { %v441_v0 = vld [vmem:[#allocation7 + $0x6c0] sm:$0xff] }
  0xe7   : > { %3196 = vtanh.f32 %v391_v7  ;;  %v962_v1 = vld [vmem:[#allocation7 + $0x19c0] sm:$0xff] }
  0xe8   : > { %3198 = vtanh.f32 %v390_v6  ;;  %v963_v2 = vld [vmem:[#allocation7 + $0x19e0] sm:$0xff] }
  0xe9   : > { %1032 = vperm.xlu1 %3171, %v926_v8   ;;  %v961_v3 = vld [vmem:[#allocation7 + $0x19a0] sm:$0xff] }
  0xea   : > { %1132 = vperm.xlu2 %3172, %v946_v9   ;;  %1137 = vperm.xlu0 %3170, %v947_v10   ;;  %v426_v4 = vld [vmem:[#allocation7 + $0x4e0] sm:$0xff] }
  0xeb   : > { %v320_v12 = vpop.permute.xlu1 %319  ;;  %v442_v5 = vld [vmem:[#allocation7 + $0x6e0] sm:$0xff] }
  0xec   : > { %v389_v13 = vadd.f32 %v320_v12, %v277_v11  ;;  %v200_v14 = vpop.permute.xlu0 %199  ;;  %v959_v6 = vld [vmem:[#allocation7 + $0x1960] sm:$0xff] }
  0xed   : > { %v3197_v15 = vpop.eup %3196  ;;  %v276_v22 = vmul.f32 %v3755_v48, %v200_v14  ;;  %v435_v48 = vld [vmem:[#allocation7 + $0x600] sm:$0xff] }
  0xee   : > { %3200 = vtanh.f32 %v389_v13  ;;  %654 = vmatpush.msra.mxu0 %v3197_v15  ;;  %3105 = vmatpush.msra.mxu3 %v3197_v15  ;;  %v3199_v18 = vpop.eup %3198  ;;  %v960_v7 = vld [vmem:[#allocation7 + $0x1980] sm:$0xff] }
  0xef   : > { %v979_v8 = vld [vmem:[#allocation7 + $0x1be0] sm:$0xff] }
  0xf0   : > { %655 = vmatpush.msra.mxu0 %v3199_v18  ;;  %3106 = vmatpush.msra.mxu3 %v3199_v18  ;;  %v427_v9 = vld [vmem:[#allocation7 + $0x500] sm:$0xff] }
  0xf1   : > { %1127 = vperm.xlu1 %3171, %v945_v16   ;;  %v443_v10 = vld [vmem:[#allocation7 + $0x700] sm:$0xff] }
  0xf2   : > { %1022 = vperm.xlu2 %3172, %v924_v17   ;;  %1027 = vperm.xlu0 %3170, %v925_v19   ;;  %v978_v11 = vld [vmem:[#allocation7 + $0x1bc0] sm:$0xff] }
  0xf3   : > { %v310_v23 = vpop.permute.xlu1 %309  ;;  %v958_v12 = vld [vmem:[#allocation7 + $0x1940] sm:$0xff] }
  0xf4   : > { %v3201_v24 = vpop.eup %3200  ;;  %v315_v25 = vpop.permute.xlu0 %314  ;;  %v387_v26 = vadd.f32 %v310_v23, %v275_v21  ;;  %v957_v13 = vld [vmem:[#allocation7 + $0x1920] sm:$0xff] }
  0xf5   : > { %v388_v27 = vadd.f32 %v315_v25, %v276_v22  ;;  %656 = vmatpush.msra.mxu0 %v3201_v24  ;;  %3107 = vmatpush.msra.mxu3 %v3201_v24  ;;  %v428_v14 = vld [vmem:[#allocation7 + $0x520] sm:$0xff] }
  0xf6   : > { %v444_v15 = vld [vmem:[#allocation7 + $0x720] sm:$0xff] }
  0xf7   : > { %3202 = vtanh.f32 %v388_v27  ;;  %v956_v16 = vld [vmem:[#allocation7 + $0x1900] sm:$0xff] }
  0xf8   : > { %3204 = vtanh.f32 %v387_v26  ;;  %v977_v17 = vld [vmem:[#allocation7 + $0x1ba0] sm:$0xff] }
  0xf9   : > { %1017 = vperm.xlu1 %3171, %v923_v28   ;;  %v976_v18 = vld [vmem:[#allocation7 + $0x1b80] sm:$0xff] }
  0xfa   : > { %1117 = vperm.xlu2 %3172, %v943_v29   ;;  %1122 = vperm.xlu0 %3170, %v944_v30   ;;  %v429_v19 = vld [vmem:[#allocation7 + $0x540] sm:$0xff] }
  0xfb   : > { %v445_v20 = vld [vmem:[#allocation7 + $0x740] sm:$0xff] }
  0xfc   : > { %v975_v21 = vld [vmem:[#allocation7 + $0x1b60] sm:$0xff] }
  0xfd   : > { %v3203_v31 = vpop.eup %3202  ;;  %v955_v22 = vld [vmem:[#allocation7 + $0x18e0] sm:$0xff] }
  0xfe   : > { %657 = vmatpush.msra.mxu0 %v3203_v31  ;;  %3108 = vmatpush.msra.mxu3 %v3203_v31  ;;  %v3205_v33 = vpop.eup %3204  ;;  %v954_v23 = vld [vmem:[#allocation7 + $0x18c0] sm:$0xff] }
  0xff   : > { %v430_v24 = vld [vmem:[#allocation7 + $0x560] sm:$0xff] }
 0x100   : > { %658 = vmatpush.msra.mxu0 %v3205_v33  ;;  %3109 = vmatpush.msra.mxu3 %v3205_v33  ;;  %v446_v25 = vld [vmem:[#allocation7 + $0x760] sm:$0xff] }
 0x101   : > { %659 = vmatmul.f32.vlgmr.msra.gmra.mxu0 %v419_v32  ;;  %707 = vmatmul.f32.vlgmr.msra.gmra.mxu3 %v435_v48  ;;  %v953_v26 = vld [vmem:[#allocation7 + $0x18a0] sm:$0xff] }
 0x102   : > { %1112 = vperm.xlu1 %3171, %v942_v34   ;;  %1012 = vperm.xlu0 %3170, %v922_v35   ;;  %v974_v27 = vld [vmem:[#allocation7 + $0x1b40] sm:$0xff] }
 0x103   : > { %1007 = vperm.xlu2 %3172, %v921_v36   ;;  %v973_v28 = vld [vmem:[#allocation7 + $0x1b20] sm:$0xff] }
 0x104   : > { %v431_v29 = vld [vmem:[#allocation7 + $0x580] sm:$0xff] }
 0x105   : > { %v447_v30 = vld [vmem:[#allocation7 + $0x780] sm:$0xff] }
 0x106   : > { %v972_v31 = vld [vmem:[#allocation7 + $0x1b00] sm:$0xff] }
 0x107   : > { %v952_v32 = vld [vmem:[#allocation7 + $0x1880] sm:$0xff] }
 0x108   : > { %v951_v48 = vld [vmem:[#allocation7 + $0x1860] sm:$0xff] }
 0x109   : > { %662 = vmatmul.f32.gmra.mxu0 %v420_v37  ;;  %710 = vmatmul.f32.gmra.mxu3 %v436_v38  ;;  %v432_v33 = vld [vmem:[#allocation7 + $0x5a0] sm:$0xff] }
 0x10a   : > { %1002 = vperm.xlu1 %3171, %v920_v39   ;;  %1107 = vperm.xlu0 %3170, %v941_v40   ;;  %v448_v34 = vld [vmem:[#allocation7 + $0x7a0] sm:$0xff] }
 0x10b   : > { %1102 = vperm.xlu2 %3172, %v940_v41   ;;  %v950_v35 = vld [vmem:[#allocation7 + $0x1840] sm:$0xff] }
 0x10c   : > { %v971_v36 = vld [vmem:[#allocation7 + $0x1ae0] sm:$0xff] }
 0x10d   : > { %v970_v37 = vld [vmem:[#allocation7 + $0x1ac0] sm:$0xff] }
 0x10e   : > { %v433_v38 = vld [vmem:[#allocation7 + $0x5c0] sm:$0xff] }
 0x10f   : > { %v449_v39 = vld [vmem:[#allocation7 + $0x7c0] sm:$0xff] }
 0x110   : > { %v969_v40 = vld [vmem:[#allocation7 + $0x1aa0] sm:$0xff] }
 0x111   : > { %665 = vmatmul.f32.gmra.mxu0 %v421_v42  ;;  %713 = vmatmul.f32.gmra.mxu3 %v437_v43  ;;  %v949_v41 = vld [vmem:[#allocation7 + $0x1820] sm:$0xff] }
 0x112   : > { %1097 = vperm.xlu1 %3171, %v939_v44   ;;  %997 = vperm.xlu0 %3170, %v919_v45   ;;  %v948_v42 = vld [vmem:[#allocation7 + $0x1800] sm:$0xff] }
 0x113   : > { %992 = vperm.xlu2 %3172, %v918_v46   ;;  %v434_v43 = vld [vmem:[#allocation7 + $0x5e0] sm:$0xff] }
 0x114   : > { %v450_v44 = vld [vmem:[#allocation7 + $0x7e0] sm:$0xff] }
 0x115   : > { %v967_v45 = vld [vmem:[#allocation7 + $0x1a60] sm:$0xff] }
 0x116   : > { %v968_v46 = vld [vmem:[#allocation7 + $0x1a80] sm:$0xff] }
 0x119   : > { %668 = vmatmul.f32.gmra.mxu0 %v422_v47  ;;  %716 = vmatmul.f32.gmra.mxu3 %v438_v49  ;;  %v966_v47 = vld [vmem:[#allocation7 + $0x1a40] sm:$0xff] }
 0x11a   : > { %987 = vperm.xlu1 %3171, %v917_v50   ;;  %1092 = vperm.xlu0 %3170, %v938_v51   ;;  %v964_v50 = vld [vmem:[#allocation7 + $0x1a00] sm:$0xff] }
 0x11b   : > { %1087 = vperm.xlu2 %3172, %v937_v52   ;;  %v965_v51 = vld [vmem:[#allocation7 + $0x1a20] sm:$0xff] }
 0x11c   : > { %v1910_v52 = vld [vmem:[#allocation7 + $0x2000] sm:$0xff] }
 0x121   : > { %671 = vmatmul.f32.gmra.mxu0 %v423_v53  ;;  %719 = vmatmul.f32.gmra.mxu3 %v439_v54 }
 0x122   : > { %1082 = vperm.xlu1 %3171, %v936_v55   ;;  %982 = vperm.xlu0 %3170, %v916_v56   ;;  %v1912_v55 = vld [vmem:[#allocation7 + $0x2040] sm:$0xff] }
 0x123   : > { %1077 = vperm.xlu2 %3172, %v935_v57   ;;  %v1911_v56 = vld [vmem:[#allocation7 + $0x2020] sm:$0xff] }
 0x124   : > { %v1913_v57 = vld [vmem:[#allocation7 + $0x2060] sm:$0xff] }
 0x129   : > { %674 = vmatmul.f32.gmra.mxu0 %v424_v58  ;;  %722 = vmatmul.f32.gmra.mxu3 %v440_v59 }
 0x12a   : > { %1067 = vperm.xlu1 %3171, %v933_v60   ;;  %1072 = vperm.xlu0 %3170, %v934_v61   ;;  %v1941_v60 = vld [vmem:[#allocation7 + $0x23e0] sm:$0xff] }
 0x12b   : > { %1062 = vperm.xlu2 %3172, %v932_v62   ;;  %v1914_v61 = vld [vmem:[#allocation7 + $0x2080] sm:$0xff] }
 0x12c   : > { %v1940_v62 = vld [vmem:[#allocation7 + $0x23c0] sm:$0xff] }
 0x131   : > { %677 = vmatmul.f32.gmra.mxu0 %v425_v63  ;;  %725 = vmatmul.f32.gmra.mxu3 %v441_v0 }
 0x132   : > { %1212 = vperm.xlu1 %3171, %v962_v1   ;;  %1217 = vperm.xlu0 %3170, %v963_v2   ;;  %v1939_v1 = vld [vmem:[#allocation7 + $0x23a0] sm:$0xff] }
 0x133   : > { %1207 = vperm.xlu2 %3172, %v961_v3   ;;  %v1925_v2 = vld [vmem:[#allocation7 + $0x21e0] sm:$0xff] }
 0x134   : > { %v1924_v3 = vld [vmem:[#allocation7 + $0x21c0] sm:$0xff] }
 0x139   : > { %680 = vmatmul.f32.gmra.mxu0 %v426_v4  ;;  %728 = vmatmul.f32.gmra.mxu3 %v442_v5 }
 0x13a   : > { %1197 = vperm.xlu1 %3171, %v959_v6   ;;  %1202 = vperm.xlu0 %3170, %v960_v7   ;;  %v1923_v6 = vld [vmem:[#allocation7 + $0x21a0] sm:$0xff] }
 0x13b   : > { %1297 = vperm.xlu2 %3172, %v979_v8   ;;  %v1938_v7 = vld [vmem:[#allocation7 + $0x2380] sm:$0xff] }
 0x13c   : > { %v1937_v8 = vld [vmem:[#allocation7 + $0x2360] sm:$0xff] }
 0x141   : > { %683 = vmatmul.f32.gmra.mxu0 %v427_v9  ;;  %731 = vmatmul.f32.gmra.mxu3 %v443_v10 }
 0x142   : > { %1292 = vperm.xlu1 %3171, %v978_v11   ;;  %1192 = vperm.xlu0 %3170, %v958_v12   ;;  %v1936_v11 = vld [vmem:[#allocation7 + $0x2340] sm:$0xff] }
 0x143   : > { %1187 = vperm.xlu2 %3172, %v957_v13   ;;  %v1922_v12 = vld [vmem:[#allocation7 + $0x2180] sm:$0xff] }
 0x144   : > { %v1921_v13 = vld [vmem:[#allocation7 + $0x2160] sm:$0xff] }
 0x149   : > { %686 = vmatmul.f32.gmra.mxu0 %v428_v14  ;;  %734 = vmatmul.f32.gmra.mxu3 %v444_v15  ;;  %v3797_v15 = vpop.permute.xlu2 %640 }
 0x14a   : > { %1182 = vperm.xlu1 %3171, %v956_v16   ;;  %1287 = vperm.xlu0 %3170, %v977_v17   ;;  %v1920_v17 = vld [vmem:[#allocation7 + $0x2140] sm:$0xff] }
 0x14b   : > { %1282 = vperm.xlu2 %3172, %v976_v18   ;;  %v1935_v18 = vld [vmem:[#allocation7 + $0x2320] sm:$0xff] }
 0x151   : > { %689 = vmatmul.f32.gmra.mxu0 %v429_v19  ;;  %737 = vmatmul.f32.gmra.mxu3 %v445_v20  ;;  %v3801_v19 = vpop.permute.xlu0 %635  ;;  %v1934_v20 = vld [vmem:[#allocation7 + $0x2300] sm:$0xff] }
 0x152   : > { %1277 = vperm.xlu1 %3171, %v975_v21   ;;  %1177 = vperm.xlu0 %3170, %v955_v22  }
 0x153   : > { %1172 = vperm.xlu2 %3172, %v954_v23   ;;  %v1933_v23 = vld [vmem:[#allocation7 + $0x22e0] sm:$0xff] }
 0x159   : > { %692 = vmatmul.f32.gmra.mxu0 %v430_v24  ;;  %740 = vmatmul.f32.gmra.mxu3 %v446_v25  ;;  %v1919_v24 = vld [vmem:[#allocation7 + $0x2120] sm:$0xff]  ;;  %v3807_v25 = vpop.permute.xlu2 %630 }
 0x15a   : > { %1167 = vperm.xlu1 %3171, %v953_v26   ;;  %1272 = vperm.xlu0 %3170, %v974_v27   ;;  %v1918_v26 = vld [vmem:[#allocation7 + $0x2100] sm:$0xff]  ;;  %v3809_v27 = vpop.permute.xlu0 %555 }
 0x15b   : > { %1267 = vperm.xlu2 %3172, %v973_v28   ;;  %v3811_v28 = vpop.permute.xlu1 %560 }
 0x161   : > { %695 = vmatmul.f32.gmra.mxu0 %v431_v29  ;;  %743 = vmatmul.f32.gmra.mxu3 %v447_v30 }
 0x162   : > { %1262 = vperm.xlu1 %3171, %v972_v31   ;;  %1162 = vperm.xlu0 %3170, %v952_v32   ;;  %v1917_v31 = vld [vmem:[#allocation7 + $0x20e0] sm:$0xff] }
 0x163   : > { %1157 = vperm.xlu2 %3172, %v951_v48   ;;  %v1932_v32 = vld [vmem:[#allocation7 + $0x22c0] sm:$0xff] }
 0x164   : > { %v1931_v48 = vld [vmem:[#allocation7 + $0x22a0] sm:$0xff] }
 0x169   : > { %698 = vmatmul.f32.gmra.mxu0 %v432_v33  ;;  %746 = vmatmul.f32.gmra.mxu3 %v448_v34  ;;  %v3817_v33 = vpop.permute.xlu2 %550  ;;  %v3819_v34 = vpop.permute.xlu0 %620 }
 0x16a   : > { %1152 = vperm.xlu1 %3171, %v950_v35   ;;  %1257 = vperm.xlu0 %3170, %v971_v36  }
 0x16b   : > { %1252 = vperm.xlu2 %3172, %v970_v37   ;;  %v3825_v37 = vpop.permute.xlu1 %625 }
 0x171   : > { %701 = vmatmul.f32.gmra.mxu0 %v433_v38  ;;  %749 = vmatmul.f32.gmra.mxu3 %v449_v39  ;;  %v1930_v38 = vld [vmem:[#allocation7 + $0x2280] sm:$0xff] }
 0x172   : > { %1247 = vperm.xlu1 %3171, %v969_v40   ;;  %1147 = vperm.xlu0 %3170, %v949_v41   ;;  %v1916_v39 = vld [vmem:[#allocation7 + $0x20c0] sm:$0xff]  ;;  %v3827_v41 = vpop.permute.xlu2 %615 }
 0x173   : > { %1142 = vperm.xlu2 %3172, %v948_v42   ;;  %v1915_v40 = vld [vmem:[#allocation7 + $0x20a0] sm:$0xff] }
 0x179   : > { %704 = vmatmul.f32.gmra.mxu0 %v434_v43  ;;  %752 = vmatmul.f32.gmra.mxu3 %v450_v44  ;;  %v3831_v43 = vpop.permute.xlu0 %540 }
 0x17a   : > { %1237 = vperm.xlu1 %3171, %v967_v45   ;;  %1242 = vperm.xlu0 %3170, %v968_v46   ;;  %v1928_v45 = vld [vmem:[#allocation7 + $0x2240] sm:$0xff] }
 0x17b   : > { %1232 = vperm.xlu2 %3172, %v966_v47   ;;  %v1929_v46 = vld [vmem:[#allocation7 + $0x2260] sm:$0xff] }
 0x17c   : > { %v1927_v47 = vld [vmem:[#allocation7 + $0x2220] sm:$0xff] }
 0x17e   : > { %v3773_v49 = vpop.f32.mrf.mxu0 }
 0x182   : > { %1222 = vperm.xlu1 %3171, %v964_v50   ;;  %1227 = vperm.xlu0 %3170, %v965_v51   ;;  %v546_v50 = vpop.permute.xlu1 %545 }
 0x183   : > { %1944 = vperm.xlu2 %3172, %v1910_v52   ;;  %v3837_v52 = vpop.permute.xlu2 %535 }
 0x184   : > { %v3775_v53 = vpop.f32.mrf.mxu3 }
 0x185   : > { %4776 = vst [vmem:[#allocation13_spill] sm:$0xff] %v3775_v53 }
 0x186   : > { %v3777_v54 = vpop.f32.mrf.mxu0 }
 0x18a   : > { %1954 = vperm.xlu1 %3171, %v1912_v55   ;;  %1949 = vperm.xlu0 %3170, %v1911_v56   ;;  %v2618_v56 = vld [vmem:[#allocation7 + $0x2600] sm:$0xff] }
 0x18b   : > { %1959 = vperm.xlu2 %3172, %v1913_v57   ;;  %v1926_v57 = vld [vmem:[#allocation7 + $0x2200] sm:$0xff] }
 0x18c   : > { %v3779_v58 = vpop.f32.mrf.mxu3 }
 0x18e   : > { %v3781_v59 = vpop.f32.mrf.mxu0 }
 0x192   : > { %2099 = vperm.xlu1 %3171, %v1941_v60   ;;  %1964 = vperm.xlu0 %3170, %v1914_v61   ;;  %v3839_v60 = vpop.permute.xlu0 %605  ;;  %v2619_v61 = vld [vmem:[#allocation7 + $0x2620] sm:$0xff] }
 0x193   : > { %2094 = vperm.xlu2 %3172, %v1940_v62   ;;  %v3841_v62 = vpop.permute.xlu1 %610 }
 0x194   : > { %v3783_v63 = vpop.f32.mrf.mxu3 }
 0x196   : > { %v3785_v0 = vpop.f32.mrf.mxu0 }
 0x19a   : > { %2089 = vperm.xlu1 %3171, %v1939_v1   ;;  %2019 = vperm.xlu0 %3170, %v1925_v2  }
 0x19b   : > { %2014 = vperm.xlu2 %3172, %v1924_v3   ;;  %v2621_v3 = vld [vmem:[#allocation7 + $0x2660] sm:$0xff] }
 0x19c   : > { %v3787_v4 = vpop.f32.mrf.mxu3 }
 0x19e   : > { %v3789_v5 = vpop.f32.mrf.mxu0 }
 0x1a2   : > { %2009 = vperm.xlu1 %3171, %v1923_v6   ;;  %2084 = vperm.xlu0 %3170, %v1938_v7   ;;  %v2620_v6 = vld [vmem:[#allocation7 + $0x2640] sm:$0xff]  ;;  %v3845_v7 = vpop.permute.xlu2 %600 }
 0x1a3   : > { %2079 = vperm.xlu2 %3172, %v1937_v8   ;;  %v2622_v8 = vld [vmem:[#allocation7 + $0x2680] sm:$0xff] }
 0x1a4   : > { %v3791_v9 = vpop.f32.mrf.mxu3 }
 0x1a6   : > { %v3793_v10 = vpop.f32.mrf.mxu0 }
 0x1aa   : > { %2074 = vperm.xlu1 %3171, %v1936_v11   ;;  %2004 = vperm.xlu0 %3170, %v1922_v12   ;;  %v3847_v11 = vpop.permute.xlu0 %525  ;;  %v531_v12 = vpop.permute.xlu1 %530 }
 0x1ab   : > { %1999 = vperm.xlu2 %3172, %v1921_v13  }
 0x1ac   : > { %v3795_v14 = vpop.f32.mrf.mxu3 }
 0x1ae   : > { %v3799_v16 = vpop.f32.mrf.mxu0 }
 0x1b2   : > { %1994 = vperm.xlu1 %3171, %v1920_v17   ;;  %2069 = vperm.xlu0 %3170, %v1935_v18   ;;  %v2624_v18 = vld [vmem:[#allocation7 + $0x26c0] sm:$0xff] }
 0x1b3   : > { %2064 = vperm.xlu2 %3172, %v1934_v20   ;;  %v2623_v20 = vld [vmem:[#allocation7 + $0x26a0] sm:$0xff] }
 0x1b4   : > { %v3803_v21 = vpop.f32.mrf.mxu3 }
 0x1b6   : > { %v3805_v22 = vpop.f32.mrf.mxu0 }
 0x1ba   : > { %2059 = vperm.xlu1 %3171, %v1933_v23   ;;  %1989 = vperm.xlu0 %3170, %v1919_v24   ;;  %v2625_v23 = vld [vmem:[#allocation7 + $0x26e0] sm:$0xff]  ;;  %v3849_v24 = vpop.permute.xlu2 %520 }
 0x1bb   : > { %1984 = vperm.xlu2 %3172, %v1918_v26   ;;  %v3851_v26 = vpop.permute.xlu0 %590 }
 0x1bc   : > { %v3813_v29 = vpop.f32.mrf.mxu3 }
 0x1be   : > { %v3815_v30 = vpop.f32.mrf.mxu0 }
 0x1c2   : > { %1979 = vperm.xlu1 %3171, %v1917_v31   ;;  %2054 = vperm.xlu0 %3170, %v1932_v32  }
 0x1c3   : > { %2049 = vperm.xlu2 %3172, %v1931_v48   ;;  %v3853_v48 = vpop.permute.xlu1 %595 }
 0x1c4   : > { %v3821_v35 = vpop.f32.mrf.mxu3 }
 0x1c6   : > { %v3823_v36 = vpop.f32.mrf.mxu0 }
 0x1ca   : > { %2044 = vperm.xlu1 %3171, %v1930_v38   ;;  %1974 = vperm.xlu0 %3170, %v1916_v39   ;;  %v2627_v38 = vld [vmem:[#allocation7 + $0x2720] sm:$0xff] }
 0x1cb   : > { %1969 = vperm.xlu2 %3172, %v1915_v40   ;;  %v2626_v39 = vld [vmem:[#allocation7 + $0x2700] sm:$0xff] }
 0x1cc   : > { %v3829_v42 = vpop.f32.mrf.mxu3  ;;  %v2628_v40 = vld [vmem:[#allocation7 + $0x2740] sm:$0xff] }
 0x1ce   : > { %v3833_v44 = vpop.f32.mrf.mxu0 }
 0x1d2   : > { %2034 = vperm.xlu1 %3171, %v1928_v45   ;;  %2039 = vperm.xlu0 %3170, %v1929_v46   ;;  %v3855_v45 = vpop.permute.xlu2 %585 }
 0x1d3   : > { %2029 = vperm.xlu2 %3172, %v1927_v47   ;;  %v3857_v47 = vpop.permute.xlu0 %510 }
 0x1d4   : > { %v3835_v51 = vpop.f32.mrf.mxu3 }
 0x1d6   : > { %v693_v55 = vpop.f32.mrf.mxu0 }
 0x1da   : > { %2636 = vperm.xlu1 %3171, %v2618_v56   ;;  %2024 = vperm.xlu0 %3170, %v1926_v57   ;;  %v2630_v57 = vld [vmem:[#allocation7 + $0x2780] sm:$0xff] }
 0x1db   : > { %2641 = vperm.xlu2 %3172, %v2619_v61   ;;  %v2629_v61 = vld [vmem:[#allocation7 + $0x2760] sm:$0xff] }
 0x1dc   : > { %v3843_v1 = vpop.f32.mrf.mxu3 }
 0x1de   : > { %v696_v2 = vpop.f32.mrf.mxu0 }
 0x1e2   : > { %2651 = vperm.xlu1 %3171, %v2621_v3   ;;  %2646 = vperm.xlu0 %3170, %v2620_v6  }
 0x1e3   : > { %2656 = vperm.xlu2 %3172, %v2622_v8   ;;  %v2631_v8 = vld [vmem:[#allocation7 + $0x27a0] sm:$0xff] }
 0x1e4   : > { %v744_v13 = vpop.f32.mrf.mxu3 }
 0x1e6   : > { %v699_v17 = vpop.f32.mrf.mxu0 }
 0x1ea   : > { %2666 = vperm.xlu1 %3171, %v2624_v18   ;;  %2661 = vperm.xlu0 %3170, %v2623_v20   ;;  %v516_v18 = vpop.permute.xlu1 %515  ;;  %v700_v20 = vadd.f32 %v699_v17, %v3817_v33  ;;  %v691_v33 = vadd.f32 %v3833_v44, %v3837_v52  ;;  %v685_v44 = vadd.f32 %v3815_v30, %v3847_v11  ;;  %v2862_v30 = vld [vmem:[#allocation7 + $0x2840] sm:$0xff] }
 0x1eb   : > { %2671 = vperm.xlu2 %3172, %v2625_v23   ;;  %v697_v23 = vadd.f32 %v696_v2, %v546_v50  ;;  %v2860_v50 = vld [vmem:[#allocation7 + $0x2800] sm:$0xff]  ;;  %v745_v2 = vadd.f32 %v744_v13, %v3825_v37  ;;  %v739_v37 = vadd.f32 %v3835_v51, %v3827_v41  ;;  %v676_v51 = vadd.f32 %v3793_v10, %v3857_v47 }
 0x1ec   : > { %v747_v31 = vpop.f32.mrf.mxu3  ;;  %v2861_v11 = vld [vmem:[#allocation7 + $0x2820] sm:$0xff]  ;;  %v730_v10 = vadd.f32 %v3813_v29, %v3845_v7 }
 0x1ee   : > { %v702_v32 = vpop.f32.mrf.mxu0 }
 0x1ef   : > { %v703_v6 = vadd.f32 %v702_v32, %v3809_v27  ;;  %v2633_v32 = vld [vmem:[#allocation7 + $0x27e0] sm:$0xff] }
 0x1f2   : > { %2681 = vperm.xlu1 %3171, %v2627_v38   ;;  %2676 = vperm.xlu0 %3170, %v2626_v39   ;;  %v694_v38 = vadd.f32 %v693_v55, %v3831_v43  ;;  %v748_v43 = vadd.f32 %v747_v31, %v3807_v25  ;;  %v742_v25 = vadd.f32 %v3843_v1, %v3819_v34  ;;  %v2863_v1 = vld [vmem:[#allocation7 + $0x2860] sm:$0xff] }
 0x1f3   : > { %2686 = vperm.xlu2 %3172, %v2628_v40   ;;  %v506_v40 = vpop.permute.xlu2 %505  ;;  %v679_v34 = vadd.f32 %v3799_v16, %v516_v18  ;;  %v733_v16 = vadd.f32 %v3821_v35, %v3839_v60  ;;  %v727_v60 = vadd.f32 %v3803_v21, %v3853_v48  ;;  %v2864_v18 = vld [vmem:[#allocation7 + $0x2880] sm:$0xff] }
 0x1f4   : > { %v750_v46 = vpop.f32.mrf.mxu3 }
 0x1f5   : > { %v751_v53 = vadd.f32 %v750_v46, %v3801_v19  ;;  %v688_v19 = vadd.f32 %v3823_v36, %v531_v12  ;;  %v682_v36 = vadd.f32 %v3805_v22, %v3849_v24  ;;  %v736_v22 = vadd.f32 %v3829_v42, %v3841_v62 }
 0x1f6   : > { %v705_v56 = vpop.f32.mrf.mxu0  ;;  %v673_v42 = vadd.f32 %v3789_v5, %v506_v40  ;;  %v2865_v5 = vld [vmem:[#allocation7 + $0x28a0] sm:$0xff] }
 0x1f7   : > { %v706_v3 = vadd.f32 %v705_v56, %v3811_v28  ;;  %v2632_v56 = vld [vmem:[#allocation7 + $0x27c0] sm:$0xff] }
 0x1f9   : > { %3206 = vtanh.f32 %v706_v3  ;;  %v3865_v3 = vpop.permute.xlu0 %575 }
 0x1fa   : > { %2696 = vperm.xlu1 %3171, %v2630_v57   ;;  %2691 = vperm.xlu0 %3170, %v2629_v61   ;;  %3208 = vtanh.f32 %v703_v6 }
 0x1fb   : > { %2701 = vperm.xlu2 %3172, %v2631_v8   ;;  %3210 = vtanh.f32 %v700_v20  ;;  %v3882_v31 = vpop.permute.xlu2 %570  ;;  %v2866_v20 = vld [vmem:[#allocation7 + $0x28c0] sm:$0xff] }
 0x1fc   : > { %v753_v39 = vpop.f32.mrf.mxu3  ;;  %3212 = vtanh.f32 %v697_v23 }
 0x1fd   : > { %v754_v28 = vadd.f32 %v753_v39, %v3797_v15  ;;  %v3871_v15 = vpop.permute.xlu1 %580 }
 0x1ff   : > { %v3207_v27 = vpop.eup %3206  ;;  %3214 = vtanh.f32 %v754_v28 }
 0x200   : > { %1300 = vmatpush.msra.mxu1 %v3207_v27  ;;  %3216 = vtanh.f32 %v694_v38  ;;  %v3209_v55 = vpop.eup %3208  ;;  %v724_v38 = vadd.f32 %v3795_v14, %v3851_v26  ;;  %v718_v26 = vadd.f32 %v3787_v4, %v3871_v15  ;;  %v712_v4 = vadd.f32 %v3779_v58, %v3882_v31  ;;  %v2875_v31 = vld [vmem:[#allocation7 + $0x29e0] sm:$0xff] }
 0x201   : > { %3218 = vtanh.f32 %v751_v53  ;;  %v3211_v17 = vpop.eup %3210  ;;  %v496_v41 = vpop.permute.xlu0 %495 }
 0x202   : > { %2711 = vperm.xlu1 %3171, %v2633_v32   ;;  %2706 = vperm.xlu0 %3170, %v2632_v56   ;;  %3220 = vtanh.f32 %v691_v33  ;;  %v3213_v52 = vpop.eup %3212  ;;  %v667_v7 = vadd.f32 %v3781_v59, %v496_v41  ;;  %v721_v59 = vadd.f32 %v3791_v9, %v3855_v45  ;;  %v715_v56 = vadd.f32 %v3783_v63, %v3865_v3  ;;  %v2868_v9 = vld [vmem:[#allocation7 + $0x2900] sm:$0xff] }
 0x203   : > { %2878 = vperm.xlu2 %3172, %v2860_v50   ;;  %1301 = vmatpush.msra.mxu1 %v3209_v55  ;;  %3222 = vtanh.f32 %v748_v43  ;;  %v491_v23 = vpop.permute.xlu2 %490  ;;  %v2867_v45 = vld [vmem:[#allocation7 + $0x28e0] sm:$0xff] }
 0x204   : > { %3224 = vtanh.f32 %v688_v19  ;;  %v664_v48 = vadd.f32 %v3777_v54, %v491_v23  ;;  %v2869_v33 = vld [vmem:[#allocation7 + $0x2920] sm:$0xff] }
 0x205   : > { %1302 = vmatpush.msra.mxu1 %v3211_v17  ;;  %v3215_v53 = vpop.eup %3214  ;;  %3226 = vtanh.f32 %v745_v2  ;;  %v501_v61 = vpop.permute.xlu1 %500  ;;  %v4777_v63 = vld [vmem:[#allocation13_spill] sm:$0xff] }
 0x206   : > { %v3217_v12 = vpop.eup %3216  ;;  %1509 = vmatpush.msra.mxu2 %v3215_v53  ;;  %3228 = vtanh.f32 %v685_v44  ;;  %v670_v6 = vadd.f32 %v3785_v0, %v501_v61  ;;  %v788_v2 = vld [vmem:[#allocation7 + $0xc00] sm:$0xff]  ;;  %v801_v61 = vld [vmem:[#allocation7 + $0xcc8] sm:$0xff] }
 0x207   : > { %1303 = vmatpush.msra.mxu1 %v3213_v52  ;;  %v3219_v13 = vpop.eup %3218  ;;  %3230 = vtanh.f32 %v742_v25  ;;  %v2871_v44 = vld [vmem:[#allocation7 + $0x2960] sm:$0xff] }
 0x208   : > { %1510 = vmatpush.msra.mxu2 %v3219_v13  ;;  %v3221_v24 = vpop.eup %3220  ;;  %3232 = vtanh.f32 %v682_v36  ;;  %v2870_v52 = vld [vmem:[#allocation7 + $0x2940] sm:$0xff] }
 0x209   : > { %1304 = vmatpush.msra.mxu1 %v3217_v12  ;;  %v3223_v46 = vpop.eup %3222  ;;  %3234 = vtanh.f32 %v739_v37  ;;  %v486_v40 = vpop.permute.xlu0 %485  ;;  %v2872_v25 = vld [vmem:[#allocation7 + $0x2980] sm:$0xff]  ;;  %v789_v12 = vld [vmem:[#allocation7 + $0xc08] sm:$0xff] }
 0x20a   : > { %2888 = vperm.xlu1 %3171, %v2862_v30   ;;  %2883 = vperm.xlu0 %3170, %v2861_v11   ;;  %v3225_v57 = vpop.eup %3224  ;;  %3236 = vtanh.f32 %v679_v34  ;;  %v661_v27 = vadd.f32 %v3773_v49, %v486_v40  ;;  %v790_v30 = vld [vmem:[#allocation7 + $0xc20] sm:$0xff]  ;;  %v791_v34 = vld [vmem:[#allocation7 + $0xc28] sm:$0xff] }
 0x20b   : > { %2893 = vperm.xlu2 %3172, %v2863_v1   ;;  %1305 = vmatpush.msra.mxu1 %v3221_v24  ;;  %v3227_v62 = vpop.eup %3226  ;;  %3238 = vtanh.f32 %v736_v22  ;;  %v2874_v11 = vld [vmem:[#allocation7 + $0x29c0] sm:$0xff]  ;;  %v793_v24 = vld [vmem:[#allocation7 + $0xc48] sm:$0xff] }
 0x20c   : > { %1511 = vmatpush.msra.mxu2 %v3223_v46  ;;  %v3229_v47 = vpop.eup %3228  ;;  %3240 = vtanh.f32 %v676_v51  ;;  %v2873_v13 = vld [vmem:[#allocation7 + $0x29a0] sm:$0xff]  ;;  %v795_v51 = vld [vmem:[#allocation7 + $0xc68] sm:$0xff] }
 0x20d   : > { %1306 = vmatpush.msra.mxu1 %v3225_v57  ;;  %v3231_v35 = vpop.eup %3230  ;;  %3242 = vtanh.f32 %v733_v16  ;;  %v566_v43 = vpop.permute.xlu1 %565  ;;  %v792_v1 = vld [vmem:[#allocation7 + $0xc40] sm:$0xff]  ;;  %v797_v16 = vld [vmem:[#allocation7 + $0xc88] sm:$0xff] }
 0x20e   : > { %1512 = vmatpush.msra.mxu2 %v3227_v62  ;;  %v3233_v8 = vpop.eup %3232  ;;  %3244 = vtanh.f32 %v673_v42  ;;  %v709_v3 = vadd.f32 %v4777_v63, %v566_v43  ;;  %v2993_v22 = vld [vmem:[#allocation7 + $0x2a00] ss:$0 sm:$0xff]  ;;  %v799_v42 = vld [vmem:[#allocation7 + $0xca8] sm:$0xff] }
 0x20f   : > { %1307 = vmatpush.msra.mxu1 %v3229_v47  ;;  %v3235_v29 = vpop.eup %3234  ;;  %3246 = vtanh.f32 %v730_v10  ;;  %v794_v41 = vld [vmem:[#allocation7 + $0xc60] sm:$0xff]  ;;  %v803_v47 = vld [vmem:[#allocation7 + $0xce8] sm:$0xff] }
 0x210   : > { %1513 = vmatpush.msra.mxu2 %v3231_v35  ;;  %v3237_v0 = vpop.eup %3236  ;;  %3248 = vtanh.f32 %v670_v6  ;;  %v796_v46 = vld [vmem:[#allocation7 + $0xc80] sm:$0xff]  ;;  %v805_v35 = vld [vmem:[#allocation7 + $0xd08] sm:$0xff] }
 0x211   : > { %1308 = vmatpush.msra.mxu1 %v3233_v8  ;;  %v3239_v21 = vpop.eup %3238  ;;  %3250 = vtanh.f32 %v727_v60  ;;  %v798_v57 = vld [vmem:[#allocation7 + $0xca0] sm:$0xff]  ;;  %v819_v40 = vld [vmem:[#allocation7 + $0xde8] sm:$0xff] }
 0x212   : > { %1514 = vmatpush.msra.mxu2 %v3235_v29  ;;  %2903 = vperm.xlu1 %3171, %v2865_v5   ;;  %v3241_v39 = vpop.eup %3240  ;;  %3252 = vtanh.f32 %v667_v7  ;;  %v800_v62 = vld [vmem:[#allocation7 + $0xcc0] sm:$0xff]  ;;  %v807_v5 = vld [vmem:[#allocation7 + $0xd28] sm:$0xff] }
 0x213   : > { %2898 = vperm.xlu0 %3170, %v2864_v18   ;;  %2908 = vperm.xlu2 %3172, %v2866_v20   ;;  %v3243_v28 = vpop.eup %3242  ;;  %3254 = vtanh.f32 %v724_v38  ;;  %v802_v10 = vld [vmem:[#allocation7 + $0xce0] sm:$0xff]  ;;  %v809_v18 = vld [vmem:[#allocation7 + $0xd48] sm:$0xff] }
 0x214   : > { %1309 = vmatpush.msra.mxu1 %v3237_v0  ;;  %1515 = vmatpush.msra.mxu2 %v3239_v21  ;;  %v3245_v14 = vpop.eup %3244  ;;  %3256 = vtanh.f32 %v664_v48  ;;  %v804_v6 = vld [vmem:[#allocation7 + $0xd00] sm:$0xff]  ;;  %v811_v29 = vld [vmem:[#allocation7 + $0xd68] sm:$0xff] }
 0x215   : > { %v3247_v54 = vpop.eup %3246  ;;  %3258 = vtanh.f32 %v721_v59  ;;  %v806_v60 = vld [vmem:[#allocation7 + $0xd20] sm:$0xff]  ;;  %v813_v0 = vld [vmem:[#allocation7 + $0xd88] sm:$0xff] }
 0x216   : > { %1310 = vmatpush.msra.mxu1 %v3241_v39  ;;  %1516 = vmatpush.msra.mxu2 %v3243_v28  ;;  %v3249_v32 = vpop.eup %3248  ;;  %3260 = vtanh.f32 %v661_v27  ;;  %v808_v8 = vld [vmem:[#allocation7 + $0xd40] sm:$0xff]  ;;  %v815_v38 = vld [vmem:[#allocation7 + $0xda8] sm:$0xff] }
 0x217   : > { %v3251_v49 = vpop.eup %3250  ;;  %3262 = vtanh.f32 %v718_v26  ;;  %v810_v20 = vld [vmem:[#allocation7 + $0xd60] sm:$0xff]  ;;  %v817_v48 = vld [vmem:[#allocation7 + $0xdc8] sm:$0xff] }
 0x218   : > { %1311 = vmatpush.msra.mxu1 %v3245_v14  ;;  %1517 = vmatpush.msra.mxu2 %v3247_v54  ;;  %v3253_v50 = vpop.eup %3252  ;;  %3264 = vtanh.f32 %v715_v56  ;;  %v812_v7 = vld [vmem:[#allocation7 + $0xd80] sm:$0xff]  ;;  %v821_v27 = vld [vmem:[#allocation7 + $0xe08] sm:$0xff] }
 0x219   : > { %v3255_v55 = vpop.eup %3254  ;;  %3266 = vtanh.f32 %v712_v4  ;;  %v814_v23 = vld [vmem:[#allocation7 + $0xda0] sm:$0xff]  ;;  %v827_v43 = vld [vmem:[#allocation7 + $0xe68] sm:$0xff] }
 0x21a   : > { %1312 = vmatpush.msra.mxu1 %v3249_v32  ;;  %1518 = vmatpush.msra.mxu2 %v3251_v49  ;;  %v3257_v19 = vpop.eup %3256  ;;  %3268 = vtanh.f32 %v709_v3  ;;  %v816_v21 = vld [vmem:[#allocation7 + $0xdc0] sm:$0xff]  ;;  %v823_v32 = vld [vmem:[#allocation7 + $0xe28] sm:$0xff] }
 0x21b   : > { %2918 = vperm.xlu1 %3171, %v2868_v9   ;;  %2913 = vperm.xlu0 %3170, %v2867_v45   ;;  %v3259_v15 = vpop.eup %3258  ;;  %v818_v39 = vld [vmem:[#allocation7 + $0xde0] sm:$0xff]  ;;  %v825_v49 = vld [vmem:[#allocation7 + $0xe48] sm:$0xff] }
 0x21c   : > { %2923 = vperm.xlu2 %3172, %v2869_v33   ;;  %1313 = vmatpush.msra.mxu1 %v3253_v50  ;;  %v3261_v58 = vpop.eup %3260  ;;  %v820_v28 = vld [vmem:[#allocation7 + $0xe00] sm:$0xff] }
 0x21d   : > { %1519 = vmatpush.msra.mxu2 %v3255_v55  ;;  %v3263_v17 = vpop.eup %3262  ;;  %v822_v26 = vld [vmem:[#allocation7 + $0xe20] sm:$0xff] }
 0x21e   : > { %1314 = vmatpush.msra.mxu1 %v3257_v19  ;;  %v3265_v53 = vpop.eup %3264  ;;  %v824_v9 = vld [vmem:[#allocation7 + $0xe40] sm:$0xff]  ;;  %v829_v19 = vld [vmem:[#allocation7 + $0xe88] sm:$0xff] }
 0x21f   : > { %1520 = vmatpush.msra.mxu2 %v3259_v15  ;;  %v3267_v36 = vpop.eup %3266  ;;  %v826_v4 = vld [vmem:[#allocation7 + $0xe60] sm:$0xff] }
 0x220   : > { %1315 = vmatpush.msra.mxu1 %v3261_v58  ;;  %v3269_v37 = vpop.eup %3268  ;;  %v828_v63 = vld [vmem:[#allocation7 + $0xe80] sm:$0xff]  ;;  %v3931_v58 = vpop.permute.xlu2 %1052 }
 0x221   : > { %1521 = vmatpush.msra.mxu2 %v3263_v17  ;;  %1316 = vmatmul.f32.vlgmr.msra.gmra.mxu1 %v788_v2  ;;  %v830_v2 = vld [vmem:[#allocation7 + $0xea0] sm:$0xff] }
 0x223   : > { %1522 = vmatpush.msra.mxu2 %v3265_v53  ;;  %2933 = vperm.xlu1 %3171, %v2871_v44   ;;  %v831_v44 = vld [vmem:[#allocation7 + $0xea8] sm:$0xff] }
 0x224   : > { %2928 = vperm.xlu0 %3170, %v2870_v52   ;;  %2938 = vperm.xlu2 %3172, %v2872_v25   ;;  %v832_v25 = vld [vmem:[#allocation7 + $0xec0] sm:$0xff] }
 0x225   : > { %1523 = vmatpush.msra.mxu2 %v3267_v36 }
 0x227   : > { %1524 = vmatpush.msra.mxu2 %v3269_v37 }
 0x228   : > { %1525 = vmatmul.f32.vlgmr.msra.gmra.mxu2 %v789_v12  ;;  %v3939_v36 = vpop.permute.xlu2 %1037  ;;  %v833_v12 = vld [vmem:[#allocation7 + $0xec8] sm:$0xff] }
 0x229   : > { %1319 = vmatmul.f32.gmra.mxu1 %v790_v30  ;;  %v834_v30 = vld [vmem:[#allocation7 + $0xee0] sm:$0xff] }
 0x22b   : > { %2948 = vperm.xlu1 %3171, %v2874_v11  }
 0x22c   : > { %2943 = vperm.xlu0 %3170, %v2873_v13   ;;  %2953 = vperm.xlu2 %3172, %v2875_v31   ;;  %v835_v13 = vld [vmem:[#allocation7 + $0xee8] sm:$0xff] }
 0x230   : > { %1528 = vmatmul.f32.gmra.mxu2 %v791_v34  ;;  %v836_v34 = vld [vmem:[#allocation7 + $0xf00] sm:$0xff] }
 0x231   : > { %1322 = vmatmul.f32.gmra.mxu1 %v792_v1  ;;  %v3945_v1 = vpop.permute.xlu2 %1132 }
 0x234   : > { %2996 = vperm.xlu0 %3170, %v2993_v22  }
 0x238   : > { %1531 = vmatmul.f32.gmra.mxu2 %v793_v24  ;;  %v837_v24 = vld [vmem:[#allocation7 + $0xf08] sm:$0xff] }
 0x239   : > { %1325 = vmatmul.f32.gmra.mxu1 %v794_v41 }
 0x240   : > { %1534 = vmatmul.f32.gmra.mxu2 %v795_v51  ;;  %v838_v51 = vld [vmem:[#allocation7 + $0xf20] sm:$0xff] }
 0x241   : > { %1328 = vmatmul.f32.gmra.mxu1 %v796_v46  ;;  %v1023_v46 = vpop.permute.xlu2 %1022 }
 0x248   : > { %1537 = vmatmul.f32.gmra.mxu2 %v797_v16 }
 0x249   : > { %1331 = vmatmul.f32.gmra.mxu1 %v798_v57  ;;  %v1058_v57 = vpop.permute.xlu1 %1057 }
 0x250   : > { %1540 = vmatmul.f32.gmra.mxu2 %v799_v42 }
 0x251   : > { %1334 = vmatmul.f32.gmra.mxu1 %v800_v62 }
 0x258   : > { %1543 = vmatmul.f32.gmra.mxu2 %v801_v61  ;;  %v1048_v61 = vpop.permute.xlu0 %1047 }
 0x259   : > { %1337 = vmatmul.f32.gmra.mxu1 %v802_v10  ;;  %v839_v10 = vld [vmem:[#allocation7 + $0xf28] sm:$0xff] }
 0x260   : > { %1546 = vmatmul.f32.gmra.mxu2 %v803_v47 }
 0x261   : > { %1340 = vmatmul.f32.gmra.mxu1 %v804_v6  ;;  %v840_v6 = vld [vmem:[#allocation7 + $0xf40] sm:$0xff] }
 0x268   : > { %1549 = vmatmul.f32.gmra.mxu2 %v805_v35 }
 0x269   : > { %1343 = vmatmul.f32.gmra.mxu1 %v806_v60  ;;  %v1043_v60 = vpop.permute.xlu1 %1042 }
 0x270   : > { %1552 = vmatmul.f32.gmra.mxu2 %v807_v5  ;;  %v841_v5 = vld [vmem:[#allocation7 + $0xf48] sm:$0xff] }
 0x271   : > { %1346 = vmatmul.f32.gmra.mxu1 %v808_v8 }
 0x278   : > { %1555 = vmatmul.f32.gmra.mxu2 %v809_v18  ;;  %v842_v18 = vld [vmem:[#allocation7 + $0xf60] sm:$0xff] }
 0x279   : > { %1349 = vmatmul.f32.gmra.mxu1 %v810_v20  ;;  %v3957_v20 = vpop.permute.xlu0 %1137 }
 0x280   : > { %1558 = vmatmul.f32.gmra.mxu2 %v811_v29 }
 0x281   : > { %1352 = vmatmul.f32.gmra.mxu1 %v812_v7  ;;  %v843_v7 = vld [vmem:[#allocation7 + $0xf68] sm:$0xff] }
 0x288   : > { %1561 = vmatmul.f32.gmra.mxu2 %v813_v0 }
 0x289   : > { %1355 = vmatmul.f32.gmra.mxu1 %v814_v23  ;;  %v844_v23 = vld [vmem:[#allocation7 + $0xf80] sm:$0xff] }
 0x290   : > { %1564 = vmatmul.f32.gmra.mxu2 %v815_v38  ;;  %v1033_v38 = vpop.permute.xlu1 %1032 }
 0x291   : > { %1358 = vmatmul.f32.gmra.mxu1 %v816_v21  ;;  %v1028_v21 = vpop.permute.xlu0 %1027 }
 0x298   : > { %1567 = vmatmul.f32.gmra.mxu2 %v817_v48 }
 0x299   : > { %1361 = vmatmul.f32.gmra.mxu1 %v818_v39  ;;  %v845_v39 = vld [vmem:[#allocation7 + $0xf88] sm:$0xff] }
 0x29e   : > { %v3911_v59 = vpop.f32.mrf.mxu1 }
 0x2a0   : > { %1570 = vmatmul.f32.gmra.mxu2 %v819_v40 }
 0x2a1   : > { %1364 = vmatmul.f32.gmra.mxu1 %v820_v28  ;;  %v846_v28 = vld [vmem:[#allocation7 + $0xfa0] sm:$0xff] }
 0x2a6   : > { %v3913_v14 = vpop.f32.mrf.mxu1 }
 0x2a8   : > { %1573 = vmatmul.f32.gmra.mxu2 %v821_v27  ;;  %v3961_v27 = vpop.permute.xlu1 %1127 }
 0x2a9   : > { %1367 = vmatmul.f32.gmra.mxu1 %v822_v26  ;;  %v3963_v26 = vpop.permute.xlu0 %1122 }
 0x2ab   : > { %v3915_v54 = vpop.f32.mrf.mxu2 }
 0x2ae   : > { %v3917_v56 = vpop.f32.mrf.mxu1 }
 0x2b0   : > { %1576 = vmatmul.f32.gmra.mxu2 %v823_v32 }
 0x2b1   : > { %1370 = vmatmul.f32.gmra.mxu1 %v824_v9  ;;  %v847_v9 = vld [vmem:[#allocation7 + $0xfa8] sm:$0xff] }
 0x2b3   : > { %v3919_v45 = vpop.f32.mrf.mxu2 }
 0x2b6   : > { %v3921_v33 = vpop.f32.mrf.mxu1 }
 0x2b8   : > { %1579 = vmatmul.f32.gmra.mxu2 %v825_v49 }
 0x2b9   : > { %1373 = vmatmul.f32.gmra.mxu1 %v826_v4  ;;  %v848_v4 = vld [vmem:[#allocation7 + $0xfc0] sm:$0xff] }
 0x2bb   : > { %v3923_v50 = vpop.f32.mrf.mxu2 }
 0x2be   : > { %v3925_v55 = vpop.f32.mrf.mxu1 }
 0x2c0   : > { %1582 = vmatmul.f32.gmra.mxu2 %v827_v43  ;;  %v1018_v43 = vpop.permute.xlu1 %1017 }
 0x2c1   : > { %1376 = vmatmul.f32.gmra.mxu1 %v828_v63 }
 0x2c3   : > { %v3927_v3 = vpop.f32.mrf.mxu2 }
 0x2c6   : > { %v3929_v15 = vpop.f32.mrf.mxu1 }
 0x2c8   : > { %1585 = vmatmul.f32.gmra.mxu2 %v829_v19  ;;  %v1013_v19 = vpop.permute.xlu0 %1012 }
 0x2c9   : > { %1379 = vmatmul.f32.gmra.mxu1 %v830_v2  ;;  %v849_v2 = vld [vmem:[#allocation7 + $0xfc8] sm:$0xff] }
 0x2cb   : > { %v3933_v17 = vpop.f32.mrf.mxu2 }
 0x2ce   : > { %v3935_v52 = vpop.f32.mrf.mxu1 }
 0x2d0   : > { %1588 = vmatmul.f32.gmra.mxu2 %v831_v44 }
 0x2d1   : > { %1382 = vmatmul.f32.gmra.mxu1 %v832_v25  ;;  %v850_v25 = vld [vmem:[#allocation7 + $0xfe0] sm:$0xff] }
 0x2d3   : > { %v3937_v53 = vpop.f32.mrf.mxu2 }
 0x2d6   : > { %v3941_v37 = vpop.f32.mrf.mxu1 }
 0x2d8   : > { %1591 = vmatmul.f32.gmra.mxu2 %v833_v12  ;;  %v3965_v12 = vpop.permute.xlu2 %1117 }
 0x2d9   : > { %1385 = vmatmul.f32.gmra.mxu1 %v834_v30 }
 0x2db   : > { %v3943_v11 = vpop.f32.mrf.mxu2 }
 0x2de   : > { %v1341_v31 = vpop.f32.mrf.mxu1 }
 0x2df   : > { %v1342_v16 = vadd.f32 %v1341_v31, %v1023_v46  ;;  %v851_v31 = vld [vmem:[#allocation7 + $0xfe8] sm:$0xff] }
 0x2e0   : > { %1594 = vmatmul.f32.gmra.mxu2 %v835_v13  ;;  %v3967_v13 = vpop.permute.xlu1 %1112 }
 0x2e1   : > { %1388 = vmatmul.f32.gmra.mxu1 %v836_v34 }
 0x2e3   : > { %v3947_v22 = vpop.f32.mrf.mxu2 }
 0x2e6   : > { %v3949_v41 = vpop.f32.mrf.mxu1 }
 0x2e8   : > { %1597 = vmatmul.f32.gmra.mxu2 %v837_v24  ;;  %v852_v24 = vld [vmem:[#allocation7 + $0x1000] sm:$0xff] }
 0x2e9   : > { %1391 = vmatmul.f32.gmra.mxu1 %v838_v51  ;;  %v3971_v51 = vpop.permute.xlu0 %1107 }
 0x2eb   : > { %v1550_v42 = vpop.f32.mrf.mxu2 }
 0x2ec   : > { %v3951_v62 = vadd.f32 %v1550_v42, %v1342_v16 }
 0x2ee   : > { %v3953_v47 = vpop.f32.mrf.mxu1 }
 0x2f0   : > { %1600 = vmatmul.f32.gmra.mxu2 %v839_v10 }
 0x2f1   : > { %1394 = vmatmul.f32.gmra.mxu1 %v840_v6 }
 0x2f3   : > { %v3955_v35 = vpop.f32.mrf.mxu2 }
 0x2f6   : > { %v1350_v8 = vpop.f32.mrf.mxu1 }
 0x2f8   : > { %1603 = vmatmul.f32.gmra.mxu2 %v841_v5 }
 0x2f9   : > { %1397 = vmatmul.f32.gmra.mxu1 %v842_v18  ;;  %v1008_v18 = vpop.permute.xlu2 %1007 }
 0x2fb   : > { %v3959_v29 = vpop.f32.mrf.mxu2 }
 0x2fe   : > { %v1353_v0 = vpop.f32.mrf.mxu1 }
 0x300   : > { %1606 = vmatmul.f32.gmra.mxu2 %v843_v7  ;;  %v853_v7 = vld [vmem:[#allocation7 + $0x1008] sm:$0xff] }
 0x301   : > { %1400 = vmatmul.f32.gmra.mxu1 %v844_v23  ;;  %v1354_v23 = vadd.f32 %v1353_v0, %v1043_v60  ;;  %v1345_v0 = vadd.f32 %v3949_v41, %v1028_v21  ;;  %v1336_v21 = vadd.f32 %v3935_v52, %v1013_v19 }
 0x303   : > { %v1559_v48 = vpop.f32.mrf.mxu2 }
 0x306   : > { %v1356_v40 = vpop.f32.mrf.mxu1 }
 0x307   : > { %v1357_v10 = vadd.f32 %v1356_v40, %v1048_v61 }
 0x308   : > { %1609 = vmatmul.f32.gmra.mxu2 %v845_v39 }
 0x309   : > { %1403 = vmatmul.f32.gmra.mxu1 %v846_v28 }
 0x30b   : > { %v1562_v32 = vpop.f32.mrf.mxu2 }
 0x30e   : > { %v1359_v49 = vpop.f32.mrf.mxu1 }
 0x30f   : > { %v1360_v46 = vadd.f32 %v1359_v49, %v3931_v58  ;;  %v998_v58 = vpop.permute.xlu0 %997 }
 0x310   : > { %1612 = vmatmul.f32.gmra.mxu2 %v847_v9  ;;  %v854_v9 = vld [vmem:[#allocation7 + $0x1020] sm:$0xff] }
 0x311   : > { %1406 = vmatmul.f32.gmra.mxu1 %v848_v4  ;;  %v1003_v4 = vpop.permute.xlu1 %1002 }
 0x312   : > { %v1330_v52 = vadd.f32 %v3925_v55, %v1003_v4 }
 0x313   : > { %v1565_v63 = vpop.f32.mrf.mxu2 }
 0x314   : > { %v1566_v39 = vadd.f32 %v1565_v63, %v1357_v10  ;;  %v855_v63 = vld [vmem:[#allocation7 + $0x1028] sm:$0xff] }
 0x316   : > { %v1362_v44 = vpop.f32.mrf.mxu1 }
 0x317   : > { %v1363_v16 = vadd.f32 %v1362_v44, %v1058_v57  ;;  %v1348_v57 = vadd.f32 %v3953_v47, %v1033_v38  ;;  %v856_v44 = vld [vmem:[#allocation7 + $0x1040] sm:$0xff]  ;;  %v3985_v47 = vpop.permute.xlu2 %1102 }
 0x318   : > { %1615 = vmatmul.f32.gmra.mxu2 %v849_v2  ;;  %v1351_v2 = vadd.f32 %v1350_v8, %v3939_v36  ;;  %v1554_v8 = vadd.f32 %v3955_v35, %v1345_v0 }
 0x319   : > { %1409 = vmatmul.f32.gmra.mxu1 %v850_v25  ;;  %v1563_v25 = vadd.f32 %v1562_v32, %v1354_v23  ;;  %v1557_v49 = vadd.f32 %v3959_v29, %v1348_v57  ;;  %v3988_v41 = vpop.permute.xlu1 %1097 }
 0x31a   : > { %v1560_v61 = vadd.f32 %v1559_v48, %v1351_v2  ;;  %v1339_v48 = vadd.f32 %v3941_v37, %v1018_v43  ;;  %v1333_v37 = vadd.f32 %v3929_v15, %v1008_v18  ;;  %v1545_v43 = vadd.f32 %v3943_v11, %v1336_v21  ;;  %v860_v2 = vld [vmem:[#allocation7 + $0x1080] sm:$0xff] }
 0x31b   : > { %v1568_v30 = vpop.f32.mrf.mxu2  ;;  %v1539_v15 = vadd.f32 %v3933_v17, %v1330_v52 }
 0x31c   : > { %v1569_v6 = vadd.f32 %v1568_v30, %v1360_v46  ;;  %v1548_v35 = vadd.f32 %v3947_v22, %v1339_v48  ;;  %v3992_v30 = vpop.permute.xlu0 %1092  ;;  %v857_v46 = vld [vmem:[#allocation7 + $0x1048] sm:$0xff]  ;;  %v1542_v22 = vadd.f32 %v3937_v53, %v1333_v37 }
 0x31e   : > { %v3969_v34 = vpop.f32.mrf.mxu1 }
 0x31f   : > { %v993_v11 = vpop.permute.xlu2 %992 }
 0x320   : > { %1618 = vmatmul.f32.gmra.mxu2 %v851_v31  ;;  %v1324_v55 = vadd.f32 %v3917_v56, %v993_v11 }
 0x321   : > { %1412 = vmatmul.f32.gmra.mxu1 %v852_v24 }
 0x322   : > { %v1533_v17 = vadd.f32 %v3923_v50, %v1324_v55 }
 0x323   : > { %v1571_v42 = vpop.f32.mrf.mxu2 }
 0x324   : > { %v1572_v5 = vadd.f32 %v1571_v42, %v1363_v16  ;;  %v858_v42 = vld [vmem:[#allocation7 + $0x1060] sm:$0xff]  ;;  %v983_v23 = vpop.permute.xlu0 %982 }
 0x325   : > { %v1318_v4 = vadd.f32 %v3911_v59, %v983_v23 }
 0x326   : > { %3270 = vtanh.f32 %v1572_v5  ;;  %v3974_v28 = vpop.f32.mrf.mxu1  ;;  %v988_v5 = vpop.permute.xlu1 %987 }
 0x327   : > { %3272 = vtanh.f32 %v1569_v6  ;;  %v1327_v6 = vadd.f32 %v3921_v33, %v998_v58  ;;  %v1321_v33 = vadd.f32 %v3913_v14, %v988_v5  ;;  %v1527_v58 = vadd.f32 %v3915_v54, %v1318_v4  ;;  %v1782_v54 = vld [vmem:[#allocation7 + $0x1c00] sm:$0xff]  ;;  %v4028_v37 = vpop.permute.xlu2 %1087 }
 0x328   : > { %1621 = vmatmul.f32.gmra.mxu2 %v853_v7  ;;  %3274 = vtanh.f32 %v1566_v39  ;;  %v859_v39 = vld [vmem:[#allocation7 + $0x1068] sm:$0xff] }
 0x329   : > { %1415 = vmatmul.f32.gmra.mxu1 %v854_v9  ;;  %3276 = vtanh.f32 %v1563_v25  ;;  %v1536_v53 = vadd.f32 %v3927_v3, %v1327_v6  ;;  %v1530_v56 = vadd.f32 %v3919_v45, %v1321_v33  ;;  %v861_v45 = vld [vmem:[#allocation7 + $0x1088] sm:$0xff] }
 0x32a   : > { %3278 = vtanh.f32 %v1560_v61 }
 0x32b   : > { %v3978_v40 = vpop.f32.mrf.mxu2  ;;  %3280 = vtanh.f32 %v1557_v49 }
 0x32c   : > { %v3271_v60 = vpop.eup %3270  ;;  %3282 = vtanh.f32 %v1554_v8 }
 0x32d   : > { %2102 = vmatpush.msrb.mxu3 %v3271_v60  ;;  %v3273_v36 = vpop.eup %3272  ;;  %3284 = vtanh.f32 %v3951_v62  ;;  %v862_v60 = vld [vmem:[#allocation7 + $0x10a0] sm:$0xff] }
 0x32e   : > { %v3983_v32 = vpop.f32.mrf.mxu1  ;;  %v3275_v38 = vpop.eup %3274  ;;  %3286 = vtanh.f32 %v1548_v35  ;;  %v866_v35 = vld [vmem:[#allocation7 + $0x10e0] sm:$0xff] }
 0x32f   : > { %2103 = vmatpush.msrb.mxu3 %v3273_v36  ;;  %v3277_v29 = vpop.eup %3276  ;;  %3288 = vtanh.f32 %v1545_v43  ;;  %v863_v36 = vld [vmem:[#allocation7 + $0x10a8] sm:$0xff]  ;;  %v4036_v6 = vpop.permute.xlu2 %1077 }
 0x330   : > { %1624 = vmatmul.f32.gmra.mxu2 %v855_v63  ;;  %v3279_v24 = vpop.eup %3278  ;;  %3290 = vtanh.f32 %v1542_v22  ;;  %v868_v22 = vld [vmem:[#allocation7 + $0x1100] sm:$0xff] }
 0x331   : > { %2104 = vmatpush.msrb.mxu3 %v3275_v38  ;;  %1418 = vmatmul.f32.gmra.mxu1 %v856_v44  ;;  %v3281_v16 = vpop.eup %3280  ;;  %3292 = vtanh.f32 %v1539_v15  ;;  %v864_v44 = vld [vmem:[#allocation7 + $0x10c0] sm:$0xff]  ;;  %v869_v15 = vld [vmem:[#allocation7 + $0x1108] sm:$0xff] }
 0x332   : > { %v3283_v10 = vpop.eup %3282  ;;  %3294 = vtanh.f32 %v1536_v53  ;;  %v1786_v38 = vld [vmem:[#allocation7 + $0x1c20] sm:$0xff] }
 0x333   : > { %v3994_v31 = vpop.f32.mrf.mxu2  ;;  %2105 = vmatpush.msrb.mxu3 %v3277_v29  ;;  %v3285_v62 = vpop.eup %3284  ;;  %3296 = vtanh.f32 %v1533_v17  ;;  %v865_v29 = vld [vmem:[#allocation7 + $0x10c8] sm:$0xff]  ;;  %v1798_v53 = vld [vmem:[#allocation7 + $0x1c80] sm:$0xff] }
 0x334   : > { %v3287_v7 = vpop.eup %3286  ;;  %3298 = vtanh.f32 %v1530_v56  ;;  %v871_v17 = vld [vmem:[#allocation7 + $0x1128] sm:$0xff]  ;;  %v1802_v56 = vld [vmem:[#allocation7 + $0x1ca0] sm:$0xff] }
 0x335   : > { %2106 = vmatpush.msrb.mxu3 %v3279_v24  ;;  %v3289_v9 = vpop.eup %3288  ;;  %3300 = vtanh.f32 %v1527_v58  ;;  %v1790_v24 = vld [vmem:[#allocation7 + $0x1c40] sm:$0xff] }
 0x336   : > { %v4001_v19 = vpop.f32.mrf.mxu1  ;;  %v3291_v25 = vpop.eup %3290  ;;  %v874_v58 = vld [vmem:[#allocation7 + $0x1160] sm:$0xff] }
 0x337   : > { %2107 = vmatpush.msrb.mxu3 %v3281_v16  ;;  %v3293_v14 = vpop.eup %3292  ;;  %v867_v16 = vld [vmem:[#allocation7 + $0x10e8] sm:$0xff] }
 0x338   : > { %1627 = vmatmul.f32.gmra.mxu2 %v857_v46  ;;  %v3295_v59 = vpop.eup %3294  ;;  %v4032_v46 = vpop.permute.xlu1 %1082 }
 0x339   : > { %2108 = vmatpush.msrb.mxu3 %v3283_v10  ;;  %1421 = vmatmul.f32.gmra.mxu1 %v858_v42  ;;  %v3297_v57 = vpop.eup %3296  ;;  %v1794_v42 = vld [vmem:[#allocation7 + $0x1c60] sm:$0xff] }
 0x33a   : > { %v3299_v0 = vpop.eup %3298 }
 0x33b   : > { %v4007_v18 = vpop.f32.mrf.mxu2  ;;  %2109 = vmatpush.msrb.mxu3 %v3285_v62  ;;  %v3301_v49 = vpop.eup %3300  ;;  %v870_v62 = vld [vmem:[#allocation7 + $0x1120] sm:$0xff] }
 0x33d   : > { %2110 = vmatpush.msrb.mxu3 %v3287_v7 }
 0x33e   : > { %v4013_v3 = vpop.f32.mrf.mxu1 }
 0x33f   : > { %2111 = vmatpush.msrb.mxu3 %v3289_v9  ;;  %v4047_v9 = vpop.permute.xlu2 %1062 }
 0x340   : > { %1630 = vmatmul.f32.gmra.mxu2 %v859_v39  ;;  %v4040_v55 = vpop.permute.xlu1 %1067  ;;  %v872_v39 = vld [vmem:[#allocation7 + $0x1140] sm:$0xff] }
 0x341   : > { %2112 = vmatpush.msrb.mxu3 %v3291_v25  ;;  %1424 = vmatmul.f32.gmra.mxu1 %v860_v2  ;;  %v873_v25 = vld [vmem:[#allocation7 + $0x1148] sm:$0xff] }
 0x343   : > { %v4016_v50 = vpop.f32.mrf.mxu2  ;;  %2113 = vmatpush.msrb.mxu3 %v3293_v14 }
 0x345   : > { %2114 = vmatpush.msrb.mxu3 %v3295_v59  ;;  %v1806_v59 = vld [vmem:[#allocation7 + $0x1cc0] sm:$0xff] }
 0x346   : > { %v4018_v61 = vpop.f32.mrf.mxu1 }
 0x347   : > { %2115 = vmatpush.msrb.mxu3 %v3297_v57  ;;  %v4055_v14 = vpop.permute.xlu2 %1207 }
 0x348   : > { %1633 = vmatmul.f32.gmra.mxu2 %v861_v45  ;;  %v4049_v4 = vpop.permute.xlu1 %1212 }
 0x349   : > { %2116 = vmatpush.msrb.mxu3 %v3299_v0  ;;  %1427 = vmatmul.f32.gmra.mxu1 %v862_v60  ;;  %v875_v60 = vld [vmem:[#allocation7 + $0x1168] sm:$0xff] }
 0x34b   : > { %v4020_v63 = vpop.f32.mrf.mxu2  ;;  %2117 = vmatpush.msrb.mxu3 %v3301_v49  ;;  %v1810_v49 = vld [vmem:[#allocation7 + $0x1ce0] sm:$0xff] }
 0x34c   : > { %2118 = vmatmul.f32.vlgmr.msrb.gmra.mxu3 %v1782_v54  ;;  %v876_v54 = vld [vmem:[#allocation7 + $0x1180] sm:$0xff] }
 0x34e   : > { %v4022_v8 = vpop.f32.mrf.mxu1 }
 0x350   : > { %1636 = vmatmul.f32.gmra.mxu2 %v863_v36  ;;  %v4057_v45 = vpop.permute.xlu1 %1197  ;;  %v4061_v36 = vpop.permute.xlu2 %1297 }
 0x351   : > { %1430 = vmatmul.f32.gmra.mxu1 %v864_v44  ;;  %4778 = vst [vmem:[#allocation13_spill] sm:$0xff] %v4061_v36 }
 0x353   : > { %v4024_v48 = vpop.f32.mrf.mxu2 }
 0x354   : > { %2121 = vmatmul.f32.gmra.mxu3 %v1786_v38 }
 0x356   : > { %v4026_v21 = vpop.f32.mrf.mxu1 }
 0x358   : > { %1639 = vmatmul.f32.gmra.mxu2 %v865_v29  ;;  %v4063_v38 = vpop.permute.xlu1 %1292  ;;  %v877_v29 = vld [vmem:[#allocation7 + $0x1188] sm:$0xff] }
 0x359   : > { %1433 = vmatmul.f32.gmra.mxu1 %v866_v35  ;;  %4779 = vst [vmem:[#allocation14_spill] sm:$0xff] %v4063_v38 }
 0x35b   : > { %v4030_v43 = vpop.f32.mrf.mxu2 }
 0x35c   : > { %2124 = vmatmul.f32.gmra.mxu3 %v1790_v24  ;;  %v878_v24 = vld [vmem:[#allocation7 + $0x11a0] sm:$0xff] }
 0x35e   : > { %v1389_v52 = vpop.f32.mrf.mxu1 }
 0x35f   : > { %v1390_v5 = vadd.f32 %v1389_v52, %v3985_v47 }
 0x360   : > { %1642 = vmatmul.f32.gmra.mxu2 %v867_v16  ;;  %v1814_v16 = vld [vmem:[#allocation7 + $0x1d00] sm:$0xff] }
 0x361   : > { %1436 = vmatmul.f32.gmra.mxu1 %v868_v22  ;;  %v4065_v22 = vpop.permute.xlu2 %1187 }
 0x363   : > { %v4034_v10 = vpop.f32.mrf.mxu2 }
 0x364   : > { %2127 = vmatmul.f32.gmra.mxu3 %v1794_v42  ;;  %v879_v42 = vld [vmem:[#allocation7 + $0x11a8] sm:$0xff] }
 0x366   : > { %v4038_v11 = vpop.f32.mrf.mxu1 }
 0x368   : > { %1645 = vmatmul.f32.gmra.mxu2 %v869_v15 }
 0x369   : > { %1439 = vmatmul.f32.gmra.mxu1 %v870_v62  ;;  %v880_v62 = vld [vmem:[#allocation7 + $0x11c0] sm:$0xff] }
 0x36b   : > { %v1598_v7 = vpop.f32.mrf.mxu2 }
 0x36c   : > { %v4043_v33 = vadd.f32 %v1598_v7, %v1390_v5  ;;  %2130 = vmatmul.f32.gmra.mxu3 %v1798_v53  ;;  %v4067_v53 = vpop.permute.xlu1 %1182  ;;  %v1818_v5 = vld [vmem:[#allocation7 + $0x1d20] sm:$0xff] }
 0x36e   : > { %v4045_v23 = vpop.f32.mrf.mxu1 }
 0x370   : > { %1648 = vmatmul.f32.gmra.mxu2 %v871_v17  ;;  %v881_v17 = vld [vmem:[#allocation7 + $0x11c8] sm:$0xff] }
 0x371   : > { %1442 = vmatmul.f32.gmra.mxu1 %v872_v39 }
 0x373   : > { %v4051_v2 = vpop.f32.mrf.mxu2 }
 0x374   : > { %2133 = vmatmul.f32.gmra.mxu3 %v1802_v56  ;;  %v882_v56 = vld [vmem:[#allocation7 + $0x11e0] sm:$0xff] }
 0x376   : > { %v4053_v47 = vpop.f32.mrf.mxu1 }
 0x378   : > { %1651 = vmatmul.f32.gmra.mxu2 %v873_v25  ;;  %v4069_v25 = vpop.permute.xlu2 %1282 }
 0x379   : > { %1445 = vmatmul.f32.gmra.mxu1 %v874_v58  ;;  %4780 = vst [vmem:[#allocation15_spill] sm:$0xff] %v4069_v25  ;;  %v4071_v58 = vpop.permute.xlu1 %1277  ;;  %v885_v25 = vld [vmem:[#allocation7 + $0x1208] sm:$0xff] }
 0x37a   : > { %4781 = vst [vmem:[#allocation16_spill] sm:$0xff] %v4071_v58 }
 0x37b   : > { %v4059_v57 = vpop.f32.mrf.mxu2 }
 0x37c   : > { %2136 = vmatmul.f32.gmra.mxu3 %v1806_v59  ;;  %v1822_v59 = vld [vmem:[#allocation7 + $0x1d40] sm:$0xff] }
 0x37e   : > { %v1401_v0 = vpop.f32.mrf.mxu1 }
 0x37f   : > { %v1402_v36 = vadd.f32 %v1401_v0, %v3963_v26 }
 0x380   : > { %1654 = vmatmul.f32.gmra.mxu2 %v875_v60 }
 0x381   : > { %1448 = vmatmul.f32.gmra.mxu1 %v876_v54  ;;  %v883_v54 = vld [vmem:[#allocation7 + $0x11e8] sm:$0xff] }
 0x383   : > { %v1607_v44 = vpop.f32.mrf.mxu2 }
 0x384   : > { %2139 = vmatmul.f32.gmra.mxu3 %v1810_v49 }
 0x386   : > { %v1404_v35 = vpop.f32.mrf.mxu1 }
 0x388   : > { %1657 = vmatmul.f32.gmra.mxu2 %v877_v29  ;;  %v884_v29 = vld [vmem:[#allocation7 + $0x1200] sm:$0xff] }
 0x389   : > { %1451 = vmatmul.f32.gmra.mxu1 %v878_v24  ;;  %v4075_v24 = vpop.permute.xlu2 %1172 }
 0x38b   : > { %v1610_v52 = vpop.f32.mrf.mxu2 }
 0x38c   : > { %2142 = vmatmul.f32.gmra.mxu3 %v1814_v16  ;;  %v1826_v16 = vld [vmem:[#allocation7 + $0x1d60] sm:$0xff] }
 0x38e   : > { %v1407_v15 = vpop.f32.mrf.mxu1 }
 0x390   : > { %1660 = vmatmul.f32.gmra.mxu2 %v879_v42  ;;  %v1408_v42 = vadd.f32 %v1407_v15, %v3945_v1  ;;  %v1399_v1 = vadd.f32 %v4053_v47, %v3965_v12  ;;  %v1830_v15 = vld [vmem:[#allocation7 + $0x1d80] sm:$0xff] }
 0x391   : > { %1454 = vmatmul.f32.gmra.mxu1 %v880_v62 }
 0x393   : > { %v1613_v7 = vpop.f32.mrf.mxu2 }
 0x394   : > { %2145 = vmatmul.f32.gmra.mxu3 %v1818_v5  ;;  %v4079_v5 = vpop.permute.xlu1 %1167 }
 0x396   : > { %v1410_v39 = vpop.f32.mrf.mxu1 }
 0x397   : > { %v1411_v62 = vadd.f32 %v1410_v39, %v3957_v20  ;;  %v1611_v20 = vadd.f32 %v1610_v52, %v1402_v36  ;;  %v4089_v39 = vpop.permute.xlu2 %1267  ;;  %v887_v36 = vld [vmem:[#allocation7 + $0x1228] sm:$0xff] }
 0x398   : > { %1663 = vmatmul.f32.gmra.mxu2 %v881_v17 }
 0x399   : > { %1457 = vmatmul.f32.gmra.mxu1 %v882_v56  ;;  %v1405_v56 = vadd.f32 %v1404_v35, %v3961_v27  ;;  %v1396_v27 = vadd.f32 %v4045_v23, %v3967_v13  ;;  %v1608_v35 = vadd.f32 %v1607_v44, %v1399_v1  ;;  %v888_v44 = vld [vmem:[#allocation7 + $0x1240] sm:$0xff] }
 0x39b   : > { %v1616_v60 = vpop.f32.mrf.mxu2  ;;  %v1605_v12 = vadd.f32 %v4059_v57, %v1396_v27  ;;  %v892_v27 = vld [vmem:[#allocation7 + $0x1280] sm:$0xff] }
 0x39c   : > { %2148 = vmatmul.f32.gmra.mxu3 %v1822_v59  ;;  %v1617_v58 = vadd.f32 %v1616_v60, %v1408_v42  ;;  %v4096_v47 = vpop.permute.xlu1 %1262  ;;  %v1381_v42 = vadd.f32 %v4018_v61, %v4028_v37 }
 0x39e   : > { %v4073_v49 = vpop.f32.mrf.mxu1 }
 0x3a0   : > { %1666 = vmatmul.f32.gmra.mxu2 %v883_v54  ;;  %v1614_v54 = vadd.f32 %v1613_v7, %v1405_v56  ;;  %v1393_v7 = vadd.f32 %v4038_v11, %v3971_v51  ;;  %v1387_v51 = vadd.f32 %v4026_v21, %v3988_v41  ;;  %v1834_v11 = vld [vmem:[#allocation7 + $0x1da0] sm:$0xff]  ;;  %v4112_v21 = vpop.permute.xlu2 %1157 }
 0x3a1   : > { %1460 = vmatmul.f32.gmra.mxu1 %v884_v29  ;;  %v886_v29 = vld [vmem:[#allocation7 + $0x1220] sm:$0xff] }
 0x3a2   : > { %v1602_v13 = vadd.f32 %v4051_v2, %v1393_v7  ;;  %v1596_v2 = vadd.f32 %v4034_v10, %v1387_v51  ;;  %v1590_v10 = vadd.f32 %v4024_v48, %v1381_v42  ;;  %v890_v56 = vld [vmem:[#allocation7 + $0x1260] sm:$0xff]  ;;  %v893_v7 = vld [vmem:[#allocation7 + $0x1288] sm:$0xff] }
 0x3a3   : > { %v1619_v17 = vpop.f32.mrf.mxu2 }
 0x3a4   : > { %v1620_v59 = vadd.f32 %v1619_v17, %v1411_v62  ;;  %2151 = vmatmul.f32.gmra.mxu3 %v1826_v16  ;;  %v889_v62 = vld [vmem:[#allocation7 + $0x1248] sm:$0xff]  ;;  %v4119_v61 = vpop.permute.xlu1 %1152 }
 0x3a6   : > { %3302 = vtanh.f32 %v1620_v59  ;;  %v4083_v38 = vpop.f32.mrf.mxu1  ;;  %v1073_v59 = vpop.permute.xlu0 %1072 }
 0x3a7   : > { %3304 = vtanh.f32 %v1617_v58  ;;  %v1384_v58 = vadd.f32 %v4022_v8, %v3992_v30  ;;  %v1378_v8 = vadd.f32 %v4013_v3, %v4032_v46  ;;  %v1838_v3 = vld [vmem:[#allocation7 + $0x1dc0] sm:$0xff]  ;;  %v1372_v46 = vadd.f32 %v3983_v32, %v1073_v59 }
 0x3a8   : > { %1669 = vmatmul.f32.gmra.mxu2 %v885_v25  ;;  %3306 = vtanh.f32 %v1614_v54  ;;  %v1366_v32 = vadd.f32 %v3969_v34, %v4047_v9  ;;  %v1854_v59 = vld [vmem:[#allocation7 + $0x1e40] sm:$0xff] }
 0x3a9   : > { %1463 = vmatmul.f32.gmra.mxu1 %v886_v29  ;;  %3308 = vtanh.f32 %v1611_v20  ;;  %v1593_v41 = vadd.f32 %v4030_v43, %v1384_v58  ;;  %v1375_v43 = vadd.f32 %v4001_v19, %v4036_v6  ;;  %v1369_v19 = vadd.f32 %v3974_v28, %v4040_v55  ;;  %v891_v6 = vld [vmem:[#allocation7 + $0x1268] sm:$0xff] }
 0x3aa   : > { %3310 = vtanh.f32 %v1608_v35  ;;  %v4136_v35 = vpop.permute.xlu2 %1252  ;;  %v895_v58 = vld [vmem:[#allocation7 + $0x12a8] sm:$0xff] }
 0x3ab   : > { %v4091_v26 = vpop.f32.mrf.mxu2  ;;  %3312 = vtanh.f32 %v1605_v12  ;;  %v1584_v54 = vadd.f32 %v4016_v50, %v1375_v43  ;;  %v1578_v50 = vadd.f32 %v3994_v31, %v1369_v19  ;;  %v898_v43 = vld [vmem:[#allocation7 + $0x12e0] sm:$0xff] }
 0x3ac   : > { %v3303_v0 = vpop.eup %3302  ;;  %2154 = vmatmul.f32.gmra.mxu3 %v1830_v15  ;;  %3314 = vtanh.f32 %v1602_v13  ;;  %v4139_v55 = vpop.permute.xlu1 %1247  ;;  %v900_v19 = vld [vmem:[#allocation7 + $0x1300] sm:$0xff] }
 0x3ad   : > { %2215 = vmatpush.msrb.mxu0 %v3303_v0  ;;  %v3305_v52 = vpop.eup %3304  ;;  %3316 = vtanh.f32 %v4043_v33  ;;  %v1587_v33 = vadd.f32 %v4020_v63, %v1378_v8  ;;  %v1581_v63 = vadd.f32 %v4007_v18, %v1372_v46  ;;  %v1575_v18 = vadd.f32 %v3978_v40, %v1366_v32  ;;  %v1842_v0 = vld [vmem:[#allocation7 + $0x1de0] sm:$0xff] }
 0x3ae   : > { %v4099_v23 = vpop.f32.mrf.mxu1  ;;  %v3307_v25 = vpop.eup %3306  ;;  %3318 = vtanh.f32 %v1596_v2  ;;  %v894_v40 = vld [vmem:[#allocation7 + $0x12a0] sm:$0xff] }
 0x3af   : > { %2216 = vmatpush.msrb.mxu0 %v3305_v52  ;;  %v3309_v57 = vpop.eup %3308  ;;  %3320 = vtanh.f32 %v1593_v41  ;;  %v1850_v41 = vld [vmem:[#allocation7 + $0x1e20] sm:$0xff] }
 0x3b0   : > { %1672 = vmatmul.f32.gmra.mxu2 %v887_v36  ;;  %v3311_v16 = vpop.eup %3310  ;;  %3322 = vtanh.f32 %v1590_v10  ;;  %v1858_v32 = vld [vmem:[#allocation7 + $0x1e60] sm:$0xff] }
 0x3b1   : > { %2217 = vmatpush.msrb.mxu0 %v3307_v25  ;;  %1466 = vmatmul.f32.gmra.mxu1 %v888_v44  ;;  %v3313_v30 = vpop.eup %3312  ;;  %3324 = vtanh.f32 %v1587_v33  ;;  %v1846_v44 = vld [vmem:[#allocation7 + $0x1e00] sm:$0xff]  ;;  %v1783_v25 = vld [vmem:[#allocation7 + $0x1c08] sm:$0xff] }
 0x3b2   : > { %v3315_v37 = vpop.eup %3314  ;;  %3326 = vtanh.f32 %v1584_v54  ;;  %v4145_v13 = vpop.permute.xlu2 %1142  ;;  %v899_v54 = vld [vmem:[#allocation7 + $0x12e8] sm:$0xff] }
 0x3b3   : > { %v4106_v60 = vpop.f32.mrf.mxu2  ;;  %2218 = vmatpush.msrb.mxu0 %v3309_v57  ;;  %v3317_v48 = vpop.eup %3316  ;;  %3328 = vtanh.f32 %v1581_v63 }
 0x3b4   : > { %2157 = vmatmul.f32.gmra.mxu3 %v1834_v11  ;;  %v3319_v1 = vpop.eup %3318  ;;  %3330 = vtanh.f32 %v1578_v50  ;;  %v4147_v11 = vpop.permute.xlu1 %1237  ;;  %v1795_v50 = vld [vmem:[#allocation7 + $0x1c68] sm:$0xff] }
 0x3b5   : > { %2219 = vmatpush.msrb.mxu0 %v3311_v16  ;;  %v3321_v20 = vpop.eup %3320  ;;  %3332 = vtanh.f32 %v1575_v18  ;;  %4782 = vst [vmem:[#allocation17_spill] sm:$0xff] %v4147_v11  ;;  %v896_v16 = vld [vmem:[#allocation7 + $0x12c0] sm:$0xff] }
 0x3b6   : > { %v4117_v17 = vpop.f32.mrf.mxu1  ;;  %v3323_v28 = vpop.eup %3322 }
 0x3b7   : > { %2220 = vmatpush.msrb.mxu0 %v3313_v30  ;;  %v3325_v34 = vpop.eup %3324 }
 0x3b8   : > { %1675 = vmatmul.f32.gmra.mxu2 %v889_v62  ;;  %v3327_v9 = vpop.eup %3326  ;;  %v1787_v62 = vld [vmem:[#allocation7 + $0x1c28] sm:$0xff] }
 0x3b9   : > { %2221 = vmatpush.msrb.mxu0 %v3315_v37  ;;  %1469 = vmatmul.f32.gmra.mxu1 %v890_v56  ;;  %v3329_v12 = vpop.eup %3328  ;;  %v897_v56 = vld [vmem:[#allocation7 + $0x12c8] sm:$0xff] }
 0x3ba   : > { %v3331_v52 = vpop.eup %3330  ;;  %v4155_v30 = vpop.permute.xlu2 %1232 }
 0x3bb   : > { %v4126_v29 = vpop.f32.mrf.mxu2  ;;  %2222 = vmatpush.msrb.mxu0 %v3317_v48  ;;  %v3333_v51 = vpop.eup %3332  ;;  %4784 = vst [vmem:[#allocation19_spill] sm:$0xff] %v4155_v30 }
 0x3bc   : > { %2160 = vmatmul.f32.gmra.mxu3 %v1838_v3  ;;  %v4159_v10 = vpop.permute.xlu1 %1222  ;;  %v1791_v3 = vld [vmem:[#allocation7 + $0x1c48] sm:$0xff] }
 0x3bd   : > { %2223 = vmatpush.msrb.mxu0 %v3319_v1  ;;  %4785 = vst [vmem:[#allocation20_spill] sm:$0xff] %v4159_v10 }
 0x3be   : > { %v4134_v15 = vpop.f32.mrf.mxu1 }
 0x3bf   : > { %2224 = vmatpush.msrb.mxu0 %v3321_v20 }
 0x3c0   : > { %1678 = vmatmul.f32.gmra.mxu2 %v891_v6 }
 0x3c1   : > { %2225 = vmatpush.msrb.mxu0 %v3323_v28  ;;  %1472 = vmatmul.f32.gmra.mxu1 %v892_v27  ;;  %v901_v28 = vld [vmem:[#allocation7 + $0x1308] sm:$0xff] }
 0x3c2   : > { %v4167_v46 = vpop.permute.xlu2 %1944 }
 0x3c3   : > { %v4141_v31 = vpop.f32.mrf.mxu2  ;;  %2226 = vmatpush.msrb.mxu0 %v3325_v34  ;;  %4787 = vst [vmem:[#allocation22_spill] sm:$0xff] %v4167_v46 }
 0x3c4   : > { %2163 = vmatmul.f32.gmra.mxu3 %v1842_v0  ;;  %v1955_v63 = vpop.permute.xlu1 %1954  ;;  %v902_v0 = vld [vmem:[#allocation7 + $0x1320] sm:$0xff] }
 0x3c5   : > { %2227 = vmatpush.msrb.mxu0 %v3327_v9 }
 0x3c6   : > { %v4143_v36 = vpop.f32.mrf.mxu1 }
 0x3c7   : > { %2228 = vmatpush.msrb.mxu0 %v3329_v12  ;;  %v1862_v12 = vld [vmem:[#allocation7 + $0x1e80] sm:$0xff] }
 0x3c8   : > { %1681 = vmatmul.f32.gmra.mxu2 %v893_v7 }
 0x3c9   : > { %2229 = vmatpush.msrb.mxu0 %v3331_v52  ;;  %1475 = vmatmul.f32.gmra.mxu1 %v894_v40  ;;  %v1799_v40 = vld [vmem:[#allocation7 + $0x1c88] sm:$0xff]  ;;  %v4179_v52 = vpop.permute.xlu0 %1217 }
 0x3ca   : > { %v1960_v34 = vpop.permute.xlu2 %1959 }
 0x3cb   : > { %v4149_v57 = vpop.f32.mrf.mxu2  ;;  %2230 = vmatpush.msrb.mxu0 %v3333_v51 }
 0x3cc   : > { %2166 = vmatmul.f32.gmra.mxu3 %v1846_v44  ;;  %2231 = vmatmul.f32.vlgmr.msrb.gmra.mxu0 %v1783_v25  ;;  %v903_v25 = vld [vmem:[#allocation7 + $0x1328] sm:$0xff] }
 0x3ce   : > { %v4151_v2 = vpop.f32.mrf.mxu1 }
 0x3cf   : > { %v4153_v42 = vpop.f32.mrf.mxu3 }
 0x3d0   : > { %4783 = vst [vmem:[#allocation18_spill] sm:$0xff] %v4153_v42  ;;  %1684 = vmatmul.f32.gmra.mxu2 %v895_v58  ;;  %v904_v58 = vld [vmem:[#allocation7 + $0x1340] sm:$0xff] }
 0x3d1   : > { %1478 = vmatmul.f32.gmra.mxu1 %v896_v16 }
 0x3d3   : > { %v4157_v8 = vpop.f32.mrf.mxu2 }
 0x3d4   : > { %2169 = vmatmul.f32.gmra.mxu3 %v1850_v41  ;;  %2234 = vmatmul.f32.gmra.mxu0 %v1787_v62  ;;  %v1866_v41 = vld [vmem:[#allocation7 + $0x1ea0] sm:$0xff]  ;;  %v1803_v62 = vld [vmem:[#allocation7 + $0x1ca8] sm:$0xff] }
 0x3d6   : > { %v4161_v37 = vpop.f32.mrf.mxu1 }
 0x3d7   : > { %v4163_v33 = vpop.f32.mrf.mxu3 }
 0x3d8   : > { %4786 = vst [vmem:[#allocation21_spill] sm:$0xff] %v4163_v33  ;;  %1687 = vmatmul.f32.gmra.mxu2 %v897_v56 }
 0x3d9   : > { %1481 = vmatmul.f32.gmra.mxu1 %v898_v43  ;;  %v4189_v43 = vpop.permute.xlu0 %1202 }
 0x3db   : > { %v4165_v48 = vpop.f32.mrf.mxu2 }
 0x3dc   : > { %2172 = vmatmul.f32.gmra.mxu3 %v1854_v59  ;;  %2237 = vmatmul.f32.gmra.mxu0 %v1791_v3  ;;  %v905_v59 = vld [vmem:[#allocation7 + $0x1348] sm:$0xff] }
 0x3de   : > { %v4169_v1 = vpop.f32.mrf.mxu1 }
 0x3df   : > { %v2125_v6 = vpop.f32.mrf.mxu3 }
 0x3e0   : > { %v4171_v20 = vadd.f32 %v2125_v6, %v1955_v63  ;;  %1690 = vmatmul.f32.gmra.mxu2 %v899_v54  ;;  %v906_v54 = vld [vmem:[#allocation7 + $0x1360] sm:$0xff]  ;;  %v1807_v6 = vld [vmem:[#allocation7 + $0x1cc8] sm:$0xff] }
 0x3e1   : > { %1484 = vmatmul.f32.gmra.mxu1 %v900_v19  ;;  %v1870_v63 = vld [vmem:[#allocation7 + $0x1ec0] sm:$0xff] }
 0x3e2   : > { %4788 = vst [vmem:[#allocation23_spill] sm:$0xff] %v4171_v20  ;;  %v914_v20 = vld [vmem:[#allocation7 + $0x13e0] sm:$0xff] }
 0x3e3   : > { %v4173_v27 = vpop.f32.mrf.mxu2 }
 0x3e4   : > { %2175 = vmatmul.f32.gmra.mxu3 %v1858_v32  ;;  %2240 = vmatmul.f32.gmra.mxu0 %v1795_v50  ;;  %v907_v50 = vld [vmem:[#allocation7 + $0x1368] sm:$0xff] }
 0x3e6   : > { %v4175_v18 = vpop.f32.mrf.mxu1 }
 0x3e7   : > { %v2128_v9 = vpop.f32.mrf.mxu3 }
 0x3e8   : > { %v4177_v7 = vadd.f32 %v2128_v9, %v1960_v34  ;;  %1693 = vmatmul.f32.gmra.mxu2 %v901_v28  ;;  %v4197_v34 = vpop.permute.xlu0 %1192 }
 0x3e9   : > { %1487 = vmatmul.f32.gmra.mxu1 %v902_v0  ;;  %v908_v0 = vld [vmem:[#allocation7 + $0x1380] sm:$0xff] }
 0x3ea   : > { %4789 = vst [vmem:[#allocation24_spill] sm:$0xff] %v4177_v7 }
 0x3eb   : > { %v4181_v44 = vpop.f32.mrf.mxu2 }
 0x3ec   : > { %2178 = vmatmul.f32.gmra.mxu3 %v1862_v12  ;;  %2243 = vmatmul.f32.gmra.mxu0 %v1799_v40  ;;  %v1874_v12 = vld [vmem:[#allocation7 + $0x1ee0] sm:$0xff]  ;;  %v1811_v40 = vld [vmem:[#allocation7 + $0x1ce8] sm:$0xff] }
 0x3ee   : > { %v4183_v51 = vpop.f32.mrf.mxu1 }
 0x3ef   : > { %v4185_v16 = vpop.f32.mrf.mxu3 }
 0x3f0   : > { %4790 = vst [vmem:[#allocation25_spill] sm:$0xff] %v4185_v16  ;;  %1696 = vmatmul.f32.gmra.mxu2 %v903_v25 }
 0x3f1   : > { %1490 = vmatmul.f32.gmra.mxu1 %v904_v58  ;;  %v909_v58 = vld [vmem:[#allocation7 + $0x1388] sm:$0xff] }
 0x3f3   : > { %v4187_v56 = vpop.f32.mrf.mxu2 }
 0x3f4   : > { %2181 = vmatmul.f32.gmra.mxu3 %v1866_v41  ;;  %2246 = vmatmul.f32.gmra.mxu0 %v1803_v62  ;;  %v910_v62 = vld [vmem:[#allocation7 + $0x13a0] sm:$0xff] }
 0x3f6   : > { %v4191_v3 = vpop.f32.mrf.mxu1 }
 0x3f7   : > { %v4193_v19 = vpop.f32.mrf.mxu3 }
 0x3f8   : > { %4791 = vst [vmem:[#allocation26_spill] sm:$0xff] %v4193_v19  ;;  %1699 = vmatmul.f32.gmra.mxu2 %v905_v59  ;;  %v912_v19 = vld [vmem:[#allocation7 + $0x13c0] sm:$0xff] }
 0x3f9   : > { %1493 = vmatmul.f32.gmra.mxu1 %v906_v54  ;;  %v4205_v54 = vpop.permute.xlu0 %1287 }
 0x3fb   : > { %v4195_v32 = vpop.f32.mrf.mxu2 }
 0x3fc   : > { %2184 = vmatmul.f32.gmra.mxu3 %v1870_v63  ;;  %2249 = vmatmul.f32.gmra.mxu0 %v1807_v6  ;;  %v1878_v63 = vld [vmem:[#allocation7 + $0x1f00] sm:$0xff]  ;;  %v1815_v6 = vld [vmem:[#allocation7 + $0x1d08] sm:$0xff] }
 0x3fe   : > { %v1449_v28 = vpop.f32.mrf.mxu1 }
 0x3ff   : > { %v4199_v9 = vpop.f32.mrf.mxu3 }
 0x400   : > { %4792 = vst [vmem:[#allocation27_spill] sm:$0xff] %v4199_v9  ;;  %1702 = vmatmul.f32.gmra.mxu2 %v907_v50  ;;  %v911_v50 = vld [vmem:[#allocation7 + $0x13a8] sm:$0xff] }
 0x401   : > { %1496 = vmatmul.f32.gmra.mxu1 %v908_v0  ;;  %v1178_v7 = vpop.permute.xlu0 %1177 }
 0x403   : > { %v4201_v25 = vpop.f32.mrf.mxu2 }
 0x404   : > { %2187 = vmatmul.f32.gmra.mxu3 %v1874_v12  ;;  %2252 = vmatmul.f32.gmra.mxu0 %v1811_v40  ;;  %v1882_v12 = vld [vmem:[#allocation7 + $0x1f20] sm:$0xff]  ;;  %v1819_v40 = vld [vmem:[#allocation7 + $0x1d28] sm:$0xff] }
 0x406   : > { %v1452_v41 = vpop.f32.mrf.mxu1 }
 0x407   : > { %v4203_v59 = vpop.f32.mrf.mxu3 }
 0x408   : > { %4793 = vst [vmem:[#allocation28_spill] sm:$0xff] %v4203_v59  ;;  %1705 = vmatmul.f32.gmra.mxu2 %v909_v58  ;;  %v913_v58 = vld [vmem:[#allocation7 + $0x13c8] sm:$0xff] }
 0x409   : > { %1499 = vmatmul.f32.gmra.mxu1 %v910_v62 }
 0x40b   : > { %v1658_v9 = vpop.f32.mrf.mxu2 }
 0x40c   : > { %2190 = vmatmul.f32.gmra.mxu3 %v1878_v63  ;;  %2255 = vmatmul.f32.gmra.mxu0 %v1815_v6  ;;  %v1886_v63 = vld [vmem:[#allocation7 + $0x1f40] sm:$0xff]  ;;  %v1823_v6 = vld [vmem:[#allocation7 + $0x1d48] sm:$0xff] }
 0x40e   : > { %v1455_v0 = vpop.f32.mrf.mxu1 }
 0x40f   : > { %v4207_v16 = vpop.f32.mrf.mxu3  ;;  %v1456_v10 = vadd.f32 %v1455_v0, %v4049_v4  ;;  %v1447_v4 = vadd.f32 %v4191_v3, %v4057_v45  ;;  %v1894_v0 = vld [vmem:[#allocation7 + $0x1f80] sm:$0xff] }
 0x410   : > { %4794 = vst [vmem:[#allocation29_spill] sm:$0xff] %v4207_v16  ;;  %1708 = vmatmul.f32.gmra.mxu2 %v911_v50  ;;  %v4211_v50 = vpop.permute.xlu0 %1272 }
 0x411   : > { %1502 = vmatmul.f32.gmra.mxu1 %v912_v19  ;;  %v915_v19 = vld [vmem:[#allocation7 + $0x13e8] sm:$0xff] }
 0x413   : > { %v1661_v59 = vpop.f32.mrf.mxu2 }
 0x414   : > { %2193 = vmatmul.f32.gmra.mxu3 %v1882_v12  ;;  %2258 = vmatmul.f32.gmra.mxu0 %v1819_v40  ;;  %v1890_v12 = vld [vmem:[#allocation7 + $0x1f60] sm:$0xff]  ;;  %v1827_v40 = vld [vmem:[#allocation7 + $0x1d68] sm:$0xff] }
 0x416   : > { %v1458_v62 = vpop.f32.mrf.mxu1 }
 0x417   : > { %v4209_v33 = vpop.f32.mrf.mxu3 }
 0x418   : > { %4795 = vst [vmem:[#allocation30_spill] sm:$0xff] %v4209_v33  ;;  %1711 = vmatmul.f32.gmra.mxu2 %v913_v58  ;;  %v1459_v58 = vadd.f32 %v1458_v62, %v4179_v52  ;;  %v1453_v33 = vadd.f32 %v1452_v41, %v4055_v14  ;;  %v1831_v14 = vld [vmem:[#allocation7 + $0x1d88] sm:$0xff] }
 0x419   : > { %1505 = vmatmul.f32.gmra.mxu1 %v914_v20 }
 0x41a   : > { %v1662_v11 = vadd.f32 %v1661_v59, %v1453_v33 }
 0x41b   : > { %v1664_v42 = vpop.f32.mrf.mxu2 }
 0x41c   : > { %2196 = vmatmul.f32.gmra.mxu3 %v1886_v63  ;;  %2261 = vmatmul.f32.gmra.mxu0 %v1823_v6  ;;  %v1665_v30 = vadd.f32 %v1664_v42, %v1456_v10  ;;  %v1450_v6 = vadd.f32 %v1449_v28, %v4189_v43  ;;  %v1444_v42 = vadd.f32 %v4183_v51, %v4197_v34 }
 0x41d   : > { %v1656_v10 = vadd.f32 %v4201_v25, %v1447_v4  ;;  %v1441_v28 = vadd.f32 %v4175_v18, %v4065_v22  ;;  %v1435_v22 = vadd.f32 %v4161_v37, %v1178_v7  ;;  %v1835_v25 = vld [vmem:[#allocation7 + $0x1da8] sm:$0xff]  ;;  %v1429_v37 = vadd.f32 %v4143_v36, %v4079_v5 }
 0x41e   : > { %v4213_v16 = vpop.f32.mrf.mxu1  ;;  %v1659_v52 = vadd.f32 %v1658_v9, %v1450_v6  ;;  %v1653_v41 = vadd.f32 %v4195_v32, %v1444_v42  ;;  %v1898_v9 = vld [vmem:[#allocation7 + $0x1fa0] sm:$0xff]  ;;  %v1423_v5 = vadd.f32 %v4117_v17, %v4112_v21 }
 0x41f   : > { %4796 = vst [vmem:[#allocation31_spill] sm:$0xff] %v4213_v16  ;;  %v4215_v46 = vpop.f32.mrf.mxu3  ;;  %v1650_v51 = vadd.f32 %v4187_v56, %v1441_v28  ;;  %v1644_v56 = vadd.f32 %v4173_v27, %v1435_v22  ;;  %v1847_v28 = vld [vmem:[#allocation7 + $0x1e08] sm:$0xff] }
 0x420   : > { %4797 = vst [vmem:[#allocation32_spill] sm:$0xff] %v4215_v46  ;;  %1714 = vmatmul.f32.gmra.mxu2 %v915_v19  ;;  %v1163_v19 = vpop.permute.xlu0 %1162 }
 0x423   : > { %v1667_v20 = vpop.f32.mrf.mxu2 }
 0x424   : > { %v1668_v63 = vadd.f32 %v1667_v20, %v1459_v58  ;;  %2199 = vmatmul.f32.gmra.mxu3 %v1890_v12  ;;  %2264 = vmatmul.f32.gmra.mxu0 %v1827_v40  ;;  %v1426_v12 = vadd.f32 %v4134_v15, %v1163_v19  ;;  %v1839_v58 = vld [vmem:[#allocation7 + $0x1dc8] sm:$0xff]  ;;  %v1420_v15 = vadd.f32 %v4099_v23, %v4119_v61 }
 0x425   : > { %v1414_v23 = vadd.f32 %v4073_v49, %v4145_v13 }
 0x426   : > { %3334 = vtanh.f32 %v1668_v63  ;;  %v4221_v16 = vpop.f32.mrf.mxu1  ;;  %v1635_v36 = vadd.f32 %v4149_v57, %v1426_v12  ;;  %v1629_v17 = vadd.f32 %v4126_v29, %v1420_v15  ;;  %v1906_v29 = vld [vmem:[#allocation7 + $0x1fe0] sm:$0xff]  ;;  %v1863_v15 = vld [vmem:[#allocation7 + $0x1e88] sm:$0xff] }
 0x427   : > { %v4223_v46 = vpop.f32.mrf.mxu3  ;;  %3336 = vtanh.f32 %v1665_v30  ;;  %v1438_v30 = vadd.f32 %v4169_v1, %v4067_v53  ;;  %v1432_v1 = vadd.f32 %v4151_v2, %v4075_v24  ;;  %v1638_v24 = vadd.f32 %v4157_v8, %v1429_v37  ;;  %v1792_v37 = vld [vmem:[#allocation7 + $0x1c50] sm:$0xff] }
 0x428   : > { %4798 = vst [vmem:[#allocation33_spill] sm:$0xff] %v4223_v46  ;;  %3338 = vtanh.f32 %v1662_v11  ;;  %v4244_v32 = vpop.permute.xlu0 %1257  ;;  %v1632_v8 = vadd.f32 %v4141_v31, %v1423_v5  ;;  %v1796_v5 = vld [vmem:[#allocation7 + $0x1c70] sm:$0xff]  ;;  %v1887_v46 = vld [vmem:[#allocation7 + $0x1f48] sm:$0xff] }
 0x429   : > { %3340 = vtanh.f32 %v1659_v52  ;;  %v1647_v18 = vadd.f32 %v4181_v44, %v1438_v30  ;;  %v1641_v7 = vadd.f32 %v4165_v48, %v1432_v1  ;;  %v1902_v48 = vld [vmem:[#allocation7 + $0x1fc0] sm:$0xff] }
 0x42a   : > { %3342 = vtanh.f32 %v1656_v10 }
 0x42b   : > { %v4230_v33 = vpop.f32.mrf.mxu2  ;;  %3344 = vtanh.f32 %v1653_v41  ;;  %v1784_v41 = vld [vmem:[#allocation7 + $0x1c10] sm:$0xff] }
 0x42c   : > { %v3335_v43 = vpop.eup %3334  ;;  %2202 = vmatmul.f32.gmra.mxu3 %v1894_v0  ;;  %2267 = vmatmul.f32.gmra.mxu0 %v1831_v14  ;;  %3346 = vtanh.f32 %v1650_v51  ;;  %v1843_v0 = vld [vmem:[#allocation7 + $0x1de8] sm:$0xff] }
 0x42d   : > { %2328 = vmatpush.msra.mxu3 %v3335_v43  ;;  %v3337_v45 = vpop.eup %3336  ;;  %3348 = vtanh.f32 %v1647_v18  ;;  %v1851_v18 = vld [vmem:[#allocation7 + $0x1e28] sm:$0xff] }
 0x42e   : > { %v4238_v11 = vpop.f32.mrf.mxu1  ;;  %v3339_v34 = vpop.eup %3338  ;;  %3350 = vtanh.f32 %v1644_v56 }
 0x42f   : > { %v4240_v3 = vpop.f32.mrf.mxu3  ;;  %2329 = vmatpush.msra.mxu3 %v3337_v45  ;;  %v3341_v53 = vpop.eup %3340  ;;  %3352 = vtanh.f32 %v1641_v7 }
 0x430   : > { %4799 = vst [vmem:[#allocation34_spill] sm:$0xff] %v4240_v3  ;;  %v3343_v62 = vpop.eup %3342  ;;  %3354 = vtanh.f32 %v1638_v24  ;;  %v1148_v63 = vpop.permute.xlu0 %1147  ;;  %v1824_v3 = vld [vmem:[#allocation7 + $0x1d50] sm:$0xff] }
 0x431   : > { %2330 = vmatpush.msra.mxu3 %v3339_v34  ;;  %v3345_v44 = vpop.eup %3344  ;;  %v1417_v21 = vadd.f32 %v4083_v38, %v1148_v63  ;;  %3356 = vtanh.f32 %v1635_v36  ;;  %v1623_v38 = vadd.f32 %v4091_v26, %v1414_v23 }
 0x432   : > { %v3347_v40 = vpop.eup %3346  ;;  %3358 = vtanh.f32 %v1632_v8  ;;  %v1800_v8 = vld [vmem:[#allocation7 + $0x1c90] sm:$0xff] }
 0x433   : > { %v4249_v59 = vpop.f32.mrf.mxu2  ;;  %2331 = vmatpush.msra.mxu3 %v3341_v53  ;;  %v3349_v20 = vpop.eup %3348  ;;  %v1626_v61 = vadd.f32 %v4106_v60, %v1417_v21  ;;  %3360 = vtanh.f32 %v1629_v17 }
 0x434   : > { %2205 = vmatmul.f32.gmra.mxu3 %v1898_v9  ;;  %2270 = vmatmul.f32.gmra.mxu0 %v1835_v25  ;;  %v3351_v19 = vpop.eup %3350  ;;  %v1788_v9 = vld [vmem:[#allocation7 + $0x1c30] sm:$0xff] }
 0x435   : > { %2332 = vmatpush.msra.mxu3 %v3343_v62  ;;  %v3353_v57 = vpop.eup %3352  ;;  %3362 = vtanh.f32 %v1626_v61  ;;  %v1855_v62 = vld [vmem:[#allocation7 + $0x1e48] sm:$0xff] }
 0x436   : > { %v4256_v2 = vpop.f32.mrf.mxu1  ;;  %v3355_v52 = vpop.eup %3354  ;;  %3364 = vtanh.f32 %v1623_v38  ;;  %v1867_v61 = vld [vmem:[#allocation7 + $0x1ea8] sm:$0xff] }
 0x437   : > { %v4258_v27 = vpop.f32.mrf.mxu3  ;;  %2333 = vmatpush.msra.mxu3 %v3345_v44  ;;  %v3357_v14 = vpop.eup %3356 }
 0x438   : > { %4800 = vst [vmem:[#allocation35_spill] sm:$0xff] %v4258_v27  ;;  %v3359_v49 = vpop.eup %3358 }
 0x439   : > { %2334 = vmatpush.msra.mxu3 %v3347_v40  ;;  %v3361_v60 = vpop.eup %3360  ;;  %v1859_v40 = vld [vmem:[#allocation7 + $0x1e68] sm:$0xff] }
 0x43b   : > { %v4266_v6 = vpop.f32.mrf.mxu2  ;;  %2335 = vmatpush.msra.mxu3 %v3349_v20  ;;  %v3363_v26 = vpop.eup %3362 }
 0x43c   : > { %2208 = vmatmul.f32.gmra.mxu3 %v1902_v48  ;;  %2273 = vmatmul.f32.gmra.mxu0 %v1839_v58  ;;  %v3365_v45 = vpop.eup %3364 }
 0x43d   : > { %2336 = vmatpush.msra.mxu3 %v3351_v19 }
 0x43e   : > { %v4273_v31 = vpop.f32.mrf.mxu1 }
 0x43f   : > { %v4275_v4 = vpop.f32.mrf.mxu3  ;;  %2337 = vmatpush.msra.mxu3 %v3353_v57 }
 0x440   : > { %4801 = vst [vmem:[#allocation36_spill] sm:$0xff] %v4275_v4  ;;  %v4816_v4 = vld [vmem:[#allocation14_spill] sm:$0xff] }
 0x441   : > { %2338 = vmatpush.msra.mxu3 %v3355_v52  ;;  %v1804_v52 = vld [vmem:[#allocation7 + $0x1cb0] sm:$0xff] }
 0x443   : > { %v4278_v42 = vpop.f32.mrf.mxu2  ;;  %2339 = vmatpush.msra.mxu3 %v3357_v14  ;;  %v1871_v14 = vld [vmem:[#allocation7 + $0x1ec8] sm:$0xff] }
 0x444   : > { %2211 = vmatmul.f32.gmra.mxu3 %v1906_v29  ;;  %2276 = vmatmul.f32.gmra.mxu0 %v1843_v0 }
 0x445   : > { %2340 = vmatpush.msra.mxu3 %v3359_v49  ;;  %v1808_v49 = vld [vmem:[#allocation7 + $0x1cd0] sm:$0xff] }
 0x446   : > { %v4280_v13 = vpop.f32.mrf.mxu1 }
 0x447   : > { %v4282_v10 = vpop.f32.mrf.mxu3  ;;  %2341 = vmatpush.msra.mxu3 %v3361_v60 }
 0x448   : > { %4802 = vst [vmem:[#allocation37_spill] sm:$0xff] %v4282_v10 }
 0x449   : > { %v4284_v43 = vpop.f32.mrf.mxu0  ;;  %2342 = vmatpush.msra.mxu3 %v3363_v26 }
 0x44b   : > { %v4286_v30 = vpop.f32.mrf.mxu2  ;;  %2343 = vmatpush.msra.mxu3 %v3365_v45  ;;  %v1875_v45 = vld [vmem:[#allocation7 + $0x1ee8] sm:$0xff] }
 0x44c   : > { %2279 = vmatmul.f32.gmra.mxu0 %v1847_v28  ;;  %2344 = vmatmul.f32.vlgmr.msra.gmra.mxu3 %v1784_v41 }
 0x44e   : > { %v4288_v51 = vpop.f32.mrf.mxu1 }
 0x44f   : > { %v4290_v34 = vpop.f32.mrf.mxu3 }
 0x451   : > { %v4292_v22 = vpop.f32.mrf.mxu0 }
 0x453   : > { %v4294_v25 = vpop.f32.mrf.mxu2 }
 0x454   : > { %2282 = vmatmul.f32.gmra.mxu0 %v1851_v18  ;;  %2347 = vmatmul.f32.gmra.mxu3 %v1788_v9  ;;  %v1812_v18 = vld [vmem:[#allocation7 + $0x1cf0] sm:$0xff] }
 0x456   : > { %v4296_v53 = vpop.f32.mrf.mxu1 }
 0x457   : > { %v4298_v1 = vpop.f32.mrf.mxu3 }
 0x458   : > { %4803 = vst [vmem:[#allocation38_spill] sm:$0xff] %v4298_v1 }
 0x459   : > { %v4300_v56 = vpop.f32.mrf.mxu0 }
 0x45b   : > { %v4302_v7 = vpop.f32.mrf.mxu2 }
 0x45c   : > { %2285 = vmatmul.f32.gmra.mxu0 %v1855_v62  ;;  %2350 = vmatmul.f32.gmra.mxu3 %v1792_v37 }
 0x45e   : > { %v1485_v44 = vpop.f32.mrf.mxu1 }
 0x45f   : > { %v4304_v12 = vpop.f32.mrf.mxu3  ;;  %v1486_v63 = vadd.f32 %v1485_v44, %v4096_v47  ;;  %v1879_v44 = vld [vmem:[#allocation7 + $0x1f08] sm:$0xff] }
 0x460   : > { %4804 = vst [vmem:[#allocation39_spill] sm:$0xff] %v4304_v12 }
 0x461   : > { %v4306_v24 = vpop.f32.mrf.mxu0 }
 0x463   : > { %v4308_v36 = vpop.f32.mrf.mxu2 }
 0x464   : > { %2288 = vmatmul.f32.gmra.mxu0 %v1859_v40  ;;  %2353 = vmatmul.f32.gmra.mxu3 %v1796_v5  ;;  %v1816_v40 = vld [vmem:[#allocation7 + $0x1d10] sm:$0xff] }
 0x466   : > { %v4310_v48 = vpop.f32.mrf.mxu1 }
 0x467   : > { %v4312_v58 = vpop.f32.mrf.mxu3 }
 0x468   : > { %4805 = vst [vmem:[#allocation40_spill] sm:$0xff] %v4312_v58 }
 0x469   : > { %v4314_v20 = vpop.f32.mrf.mxu0 }
 0x46b   : > { %v1694_v19 = vpop.f32.mrf.mxu2 }
 0x46c   : > { %v4317_v21 = vadd.f32 %v1694_v19, %v1486_v63  ;;  %2291 = vmatmul.f32.gmra.mxu0 %v1863_v15  ;;  %2356 = vmatmul.f32.gmra.mxu3 %v1800_v8  ;;  %v1883_v19 = vld [vmem:[#allocation7 + $0x1f28] sm:$0xff] }
 0x46e   : > { %v4319_v17 = vpop.f32.mrf.mxu1 }
 0x46f   : > { %v4321_v57 = vpop.f32.mrf.mxu3 }
 0x470   : > { %4806 = vst [vmem:[#allocation41_spill] sm:$0xff] %v4321_v57 }
 0x471   : > { %v4323_v23 = vpop.f32.mrf.mxu0 }
 0x473   : > { %v4325_v38 = vpop.f32.mrf.mxu2 }
 0x474   : > { %2294 = vmatmul.f32.gmra.mxu0 %v1867_v61  ;;  %2359 = vmatmul.f32.gmra.mxu3 %v1804_v52  ;;  %v1820_v61 = vld [vmem:[#allocation7 + $0x1d30] sm:$0xff] }
 0x476   : > { %v1494_v29 = vpop.f32.mrf.mxu1 }
 0x477   : > { %v4327_v0 = vpop.f32.mrf.mxu3 }
 0x478   : > { %4807 = vst [vmem:[#allocation42_spill] sm:$0xff] %v4327_v0 }
 0x479   : > { %v4329_v47 = vpop.f32.mrf.mxu0 }
 0x47b   : > { %v4331_v60 = vpop.f32.mrf.mxu2 }
 0x47c   : > { %2297 = vmatmul.f32.gmra.mxu0 %v1871_v14  ;;  %2362 = vmatmul.f32.gmra.mxu3 %v1808_v49  ;;  %v4345_v49 = vpop.permute.xlu0 %1242 }
 0x47e   : > { %v1497_v28 = vpop.f32.mrf.mxu1 }
 0x47f   : > { %v4333_v26 = vpop.f32.mrf.mxu3 }
 0x480   : > { %4808 = vst [vmem:[#allocation43_spill] sm:$0xff] %v4333_v26 }
 0x481   : > { %v4335_v41 = vpop.f32.mrf.mxu0 }
 0x483   : > { %v1703_v9 = vpop.f32.mrf.mxu2 }
 0x484   : > { %2300 = vmatmul.f32.gmra.mxu0 %v1875_v45  ;;  %2365 = vmatmul.f32.gmra.mxu3 %v1812_v18 }
 0x486   : > { %v1500_v5 = vpop.f32.mrf.mxu1 }
 0x487   : > { %v4337_v62 = vpop.f32.mrf.mxu3 }
 0x488   : > { %4809 = vst [vmem:[#allocation44_spill] sm:$0xff] %v4337_v62  ;;  %v4817_v62 = vld [vmem:[#allocation13_spill] sm:$0xff] }
 0x489   : > { %v4339_v37 = vpop.f32.mrf.mxu0 }
 0x48b   : > { %v1706_v15 = vpop.f32.mrf.mxu2 }
 0x48c   : > { %2303 = vmatmul.f32.gmra.mxu0 %v1879_v44  ;;  %2368 = vmatmul.f32.gmra.mxu3 %v1816_v40 }
 0x48e   : > { %v1503_v14 = vpop.f32.mrf.mxu1 }
 0x48f   : > { %v4341_v8 = vpop.f32.mrf.mxu3 }
 0x490   : > { %4810 = vst [vmem:[#allocation45_spill] sm:$0xff] %v4341_v8  ;;  %v1504_v8 = vadd.f32 %v1503_v14, %v4816_v4  ;;  %v1832_v14 = vld [vmem:[#allocation7 + $0x1d90] sm:$0xff] }
 0x491   : > { %v4343_v63 = vpop.f32.mrf.mxu0 }
 0x492   : > { %4811 = vst [vmem:[#allocation46_spill] sm:$0xff] %v4343_v63  ;;  %v4353_v63 = vpop.permute.xlu0 %1227 }
 0x493   : > { %v1709_v52 = vpop.f32.mrf.mxu2 }
 0x494   : > { %2306 = vmatmul.f32.gmra.mxu0 %v1883_v19  ;;  %2371 = vmatmul.f32.gmra.mxu3 %v1820_v61  ;;  %v1891_v19 = vld [vmem:[#allocation7 + $0x1f68] sm:$0xff]  ;;  %v1828_v61 = vld [vmem:[#allocation7 + $0x1d70] sm:$0xff] }
 0x496   : > { %v1506_v40 = vpop.f32.mrf.mxu1 }
 0x497   : > { %v4347_v45 = vpop.f32.mrf.mxu3 }
 0x498   : > { %4812 = vst [vmem:[#allocation47_spill] sm:$0xff] %v4347_v45  ;;  %v1507_v45 = vadd.f32 %v1506_v40, %v4817_v62  ;;  %v1895_v62 = vld [vmem:[#allocation7 + $0x1f88] sm:$0xff] }
 0x499   : > { %v4349_v18 = vpop.f32.mrf.mxu0 }
 0x49a   : > { %4813 = vst [vmem:[#allocation48_spill] sm:$0xff] %v4349_v18  ;;  %v1501_v18 = vadd.f32 %v1500_v5, %v4205_v54  ;;  %v1492_v54 = vadd.f32 %v4319_v17, %v4211_v50  ;;  %v4368_v5 = vpop.permute.xlu0 %1949 }
 0x49b   : > { %v1712_v44 = vpop.f32.mrf.mxu2 }
 0x49c   : > { %2309 = vmatmul.f32.gmra.mxu0 %v1887_v46  ;;  %2374 = vmatmul.f32.gmra.mxu3 %v1824_v3  ;;  %v1713_v0 = vadd.f32 %v1712_v44, %v1504_v8  ;;  %v4818_v46 = vld [vmem:[#allocation15_spill] sm:$0xff]  ;;  %v1701_v8 = vadd.f32 %v4331_v60, %v1492_v54  ;;  %v1480_v60 = vadd.f32 %v4288_v51, %v4136_v35  ;;  %v1903_v44 = vld [vmem:[#allocation7 + $0x1fc8] sm:$0xff] }
 0x49d   : > { %v1498_v3 = vadd.f32 %v1497_v28, %v4818_v46  ;;  %v1474_v35 = vadd.f32 %v4273_v31, %v4345_v49  ;;  %v1840_v31 = vld [vmem:[#allocation7 + $0x1dd0] sm:$0xff] }
 0x49f   : > { %v4351_v27 = vpop.f32.mrf.mxu3  ;;  %v1707_v1 = vadd.f32 %v1706_v15, %v1498_v3  ;;  %v1477_v15 = vadd.f32 %v4280_v13, %v4139_v55  ;;  %v4823_v13 = vld [vmem:[#allocation17_spill] sm:$0xff]  ;;  %v4825_v3 = vld [vmem:[#allocation20_spill] sm:$0xff] }
 0x4a0   : > { %4814 = vst [vmem:[#allocation49_spill] sm:$0xff] %v4351_v27  ;;  %v1710_v27 = vadd.f32 %v1709_v52, %v1501_v18 }
 0x4a1   : > { %v4355_v10 = vpop.f32.mrf.mxu0  ;;  %v1686_v51 = vadd.f32 %v4294_v25, %v1477_v15  ;;  %v4824_v25 = vld [vmem:[#allocation19_spill] sm:$0xff]  ;;  %v4833_v15 = vld [vmem:[#allocation18_spill] sm:$0xff] }
 0x4a2   : > { %4815 = vst [vmem:[#allocation50_spill] sm:$0xff] %v4355_v10  ;;  %v4820_v10 = vld [vmem:[#allocation16_spill] sm:$0xff]  ;;  %v1468_v40 = vadd.f32 %v4238_v11, %v4824_v25 }
 0x4a3   : > { %v1715_v26 = vpop.f32.mrf.mxu2  ;;  %v1495_v12 = vadd.f32 %v1494_v29, %v4820_v10  ;;  %v4373_v10 = vpop.permute.xlu2 %2094 }
 0x4a4   : > { %v1716_v57 = vadd.f32 %v1715_v26, %v1507_v45  ;;  %2312 = vmatmul.f32.gmra.mxu0 %v1891_v19  ;;  %2377 = vmatmul.f32.gmra.mxu3 %v1828_v61 }
 0x4a5   : > { %v1704_v26 = vadd.f32 %v1703_v9, %v1495_v12  ;;  %v1483_v12 = vadd.f32 %v4296_v53, %v4244_v32  ;;  %v1689_v32 = vadd.f32 %v4302_v7, %v1480_v60  ;;  %v4389_v53 = vpop.permute.xlu0 %1964  ;;  %v1471_v7 = vadd.f32 %v4256_v2, %v4823_v13 }
 0x4a6   : > { %3366 = vtanh.f32 %v1716_v57  ;;  %v1489_v57 = vadd.f32 %v4310_v48, %v4089_v39  ;;  %v1836_v48 = vld [vmem:[#allocation7 + $0x1db0] sm:$0xff]  ;;  %v1465_v2 = vadd.f32 %v4221_v16, %v4353_v63 }
 0x4a7   : > { %v4361_v58 = vpop.f32.mrf.mxu3  ;;  %3368 = vtanh.f32 %v1713_v0  ;;  %v1680_v19 = vadd.f32 %v4278_v42, %v1471_v7  ;;  %v1852_v7 = vld [vmem:[#allocation7 + $0x1e30] sm:$0xff] }
 0x4a8   : > { %4819 = vst [vmem:[#allocation14_spill] sm:$0xff] %v4361_v58  ;;  %3370 = vtanh.f32 %v1710_v27  ;;  %v1698_v0 = vadd.f32 %v4325_v38, %v1489_v57  ;;  %v1692_v38 = vadd.f32 %v4308_v36, %v1483_v12  ;;  %v1674_v11 = vadd.f32 %v4249_v59, %v1465_v2  ;;  %v1844_v57 = vld [vmem:[#allocation7 + $0x1df0] sm:$0xff] }
 0x4a9   : > { %v4364_v4 = vpop.f32.mrf.mxu0  ;;  %3372 = vtanh.f32 %v1707_v1  ;;  %v1899_v1 = vld [vmem:[#allocation7 + $0x1fa8] sm:$0xff]  ;;  %v1856_v2 = vld [vmem:[#allocation7 + $0x1e50] sm:$0xff] }
 0x4aa   : > { %3374 = vtanh.f32 %v1704_v26 }
 0x4ab   : > { %3376 = vtanh.f32 %v1701_v8  ;;  %v4394_v36 = vpop.permute.xlu2 %2014 }
 0x4ac   : > { %v3367_v28 = vpop.eup %3366  ;;  %2315 = vmatmul.f32.gmra.mxu0 %v1895_v62  ;;  %2380 = vmatmul.f32.gmra.mxu3 %v1832_v14  ;;  %3378 = vtanh.f32 %v1698_v0  ;;  %v4826_v62 = vld [vmem:[#allocation31_spill] sm:$0xff]  ;;  %v4421_v0 = vpop.permute.xlu1 %2099 }
 0x4ad   : > { %2441 = vmatpush.msra.mxu0 %v3367_v28  ;;  %v3369_v29 = vpop.eup %3368  ;;  %3380 = vtanh.f32 %v4317_v21  ;;  %v1683_v21 = vadd.f32 %v4286_v30, %v1474_v35  ;;  %v1677_v30 = vadd.f32 %v4266_v6, %v1468_v40  ;;  %v1462_v14 = vadd.f32 %v4826_v62, %v4825_v3  ;;  %v4412_v42 = vpop.permute.xlu0 %2019  ;;  %v1907_v28 = vld [vmem:[#allocation7 + $0x1fe8] sm:$0xff]  ;;  %4829 = vst [vmem:[#allocation19_spill] sm:$0xff] %v4421_v0 }
 0x4ae   : > { %v3371_v27 = vpop.eup %3370  ;;  %3382 = vtanh.f32 %v1692_v38 }
 0x4af   : > { %v4376_v50 = vpop.f32.mrf.mxu3  ;;  %2442 = vmatpush.msra.mxu0 %v3369_v29  ;;  %v3373_v17 = vpop.eup %3372  ;;  %3384 = vtanh.f32 %v1689_v32  ;;  %v1671_v16 = vadd.f32 %v4230_v33, %v1462_v14 }
 0x4b0   : > { %4821 = vst [vmem:[#allocation13_spill] sm:$0xff] %v4376_v50  ;;  %v3375_v9 = vpop.eup %3374  ;;  %3386 = vtanh.f32 %v1686_v51 }
 0x4b1   : > { %v4380_v39 = vpop.f32.mrf.mxu0  ;;  %2443 = vmatpush.msra.mxu0 %v3371_v27  ;;  %v3377_v52 = vpop.eup %3376  ;;  %3388 = vtanh.f32 %v1683_v21  ;;  %v1789_v21 = vld [vmem:[#allocation7 + $0x1c38] sm:$0xff] }
 0x4b2   : > { %v3379_v55 = vpop.eup %3378  ;;  %3390 = vtanh.f32 %v1680_v19 }
 0x4b3   : > { %2444 = vmatpush.msra.mxu0 %v3373_v17  ;;  %v3381_v49 = vpop.eup %3380  ;;  %3392 = vtanh.f32 %v1677_v30  ;;  %v4417_v6 = vpop.permute.xlu2 %2079  ;;  %v1785_v17 = vld [vmem:[#allocation7 + $0x1c18] sm:$0xff] }
 0x4b4   : > { %2318 = vmatmul.f32.gmra.mxu0 %v1899_v1  ;;  %2383 = vmatmul.f32.gmra.mxu3 %v1836_v48  ;;  %v3383_v61 = vpop.eup %3382  ;;  %4828 = vst [vmem:[#allocation17_spill] sm:$0xff] %v4417_v6  ;;  %3394 = vtanh.f32 %v1674_v11  ;;  %v1848_v48 = vld [vmem:[#allocation7 + $0x1e10] sm:$0xff]  ;;  %v1793_v30 = vld [vmem:[#allocation7 + $0x1c58] sm:$0xff] }
 0x4b5   : > { %2445 = vmatpush.msra.mxu0 %v3375_v9  ;;  %v3385_v46 = vpop.eup %3384  ;;  %3396 = vtanh.f32 %v1671_v16  ;;  %v4425_v12 = vpop.permute.xlu0 %2084  ;;  %v4832_v9 = vld [vmem:[#allocation22_spill] sm:$0xff] }
 0x4b6   : > { %v3387_v26 = vpop.eup %3386  ;;  %4831 = vst [vmem:[#allocation31_spill] sm:$0xff] %v4425_v12  ;;  %v2120_v32 = vadd.f32 %v4833_v15, %v4832_v9  ;;  %v1860_v16 = vld [vmem:[#allocation7 + $0x1e70] sm:$0xff]  ;;  %v1801_v9 = vld [vmem:[#allocation7 + $0x1c98] sm:$0xff]  ;;  %v4840_v15 = vld [vmem:[#allocation25_spill] sm:$0xff] }
 0x4b7   : > { %v4396_v45 = vpop.f32.mrf.mxu3  ;;  %2446 = vmatpush.msra.mxu0 %v3377_v52  ;;  %v3389_v8 = vpop.eup %3388 }
 0x4b8   : > { %4822 = vst [vmem:[#allocation15_spill] sm:$0xff] %v4396_v45  ;;  %v3391_v59 = vpop.eup %3390  ;;  %v2233_v52 = vadd.f32 %v4284_v43, %v2120_v32  ;;  %v2132_v32 = vadd.f32 %v4840_v15, %v4389_v53 }
 0x4b9   : > { %v4401_v18 = vpop.f32.mrf.mxu0  ;;  %2447 = vmatpush.msra.mxu0 %v3379_v55  ;;  %v3393_v29 = vpop.eup %3392 }
 0x4ba   : > { %v3395_v27 = vpop.eup %3394  ;;  %v4436_v55 = vpop.permute.xlu1 %2089 }
 0x4bb   : > { %2448 = vmatpush.msra.mxu0 %v3381_v49  ;;  %v3397_v60 = vpop.eup %3396  ;;  %v4429_v38 = vpop.permute.xlu2 %1999  ;;  %4834 = vst [vmem:[#allocation22_spill] sm:$0xff] %v4436_v55 }
 0x4bc   : > { %2321 = vmatmul.f32.gmra.mxu0 %v1903_v44  ;;  %2386 = vmatmul.f32.gmra.mxu3 %v1840_v31  ;;  %v4835_v31 = vld [vmem:[#allocation21_spill] sm:$0xff] }
 0x4bd   : > { %2449 = vmatpush.msra.mxu0 %v3383_v61  ;;  %v4440_v44 = vpop.permute.xlu0 %2004  ;;  %v2123_v49 = vadd.f32 %v4835_v31, %v4368_v5  ;;  %v4837_v5 = vld [vmem:[#allocation23_spill] sm:$0xff] }
 0x4be   : > { %v2239_v62 = vadd.f32 %v4300_v56, %v4837_v5 }
 0x4bf   : > { %v4414_v54 = vpop.f32.mrf.mxu3  ;;  %2450 = vmatpush.msra.mxu0 %v3385_v46  ;;  %v2236_v43 = vadd.f32 %v4292_v22, %v2123_v49  ;;  %v1868_v49 = vld [vmem:[#allocation7 + $0x1eb0] sm:$0xff] }
 0x4c0   : > { %4827 = vst [vmem:[#allocation16_spill] sm:$0xff] %v4414_v54 }
 0x4c1   : > { %v4419_v63 = vpop.f32.mrf.mxu0  ;;  %2451 = vmatpush.msra.mxu0 %v3387_v26 }
 0x4c2   : > { %v4451_v46 = vpop.permute.xlu1 %2009 }
 0x4c3   : > { %2452 = vmatpush.msra.mxu0 %v3389_v8  ;;  %v4444_v25 = vpop.permute.xlu2 %2064  ;;  %v4839_v8 = vld [vmem:[#allocation24_spill] sm:$0xff] }
 0x4c4   : > { %2324 = vmatmul.f32.gmra.mxu0 %v1907_v28  ;;  %2389 = vmatmul.f32.gmra.mxu3 %v1844_v57  ;;  %v1797_v28 = vld [vmem:[#allocation7 + $0x1c78] sm:$0xff] }
 0x4c5   : > { %2453 = vmatpush.msra.mxu0 %v3391_v59  ;;  %v4453_v3 = vpop.permute.xlu0 %2069  ;;  %v2242_v59 = vadd.f32 %v4306_v24, %v4839_v8 }
 0x4c6   : > { %4836 = vst [vmem:[#allocation18_spill] sm:$0xff] %v4453_v3 }
 0x4c7   : > { %v4423_v33 = vpop.f32.mrf.mxu3  ;;  %2454 = vmatpush.msra.mxu0 %v3393_v29 }
 0x4c8   : > { %4830 = vst [vmem:[#allocation20_spill] sm:$0xff] %v4423_v33 }
 0x4c9   : > { %v4427_v1 = vpop.f32.mrf.mxu0  ;;  %2455 = vmatpush.msra.mxu0 %v3395_v27 }
 0x4ca   : > { %v4461_v57 = vpop.permute.xlu1 %2074 }
 0x4cb   : > { %2456 = vmatpush.msra.mxu0 %v3397_v60  ;;  %v1985_v14 = vpop.permute.xlu2 %1984  ;;  %4838 = vst [vmem:[#allocation21_spill] sm:$0xff] %v4461_v57  ;;  %v1864_v60 = vld [vmem:[#allocation7 + $0x1e90] sm:$0xff] }
 0x4cc   : > { %2392 = vmatmul.f32.gmra.mxu3 %v1848_v48  ;;  %2457 = vmatmul.f32.vlgmr.msra.gmra.mxu0 %v1785_v17 }
 0x4cd   : > { %v4465_v29 = vpop.permute.xlu0 %1989 }
 0x4cf   : > { %v2345_v35 = vpop.f32.mrf.mxu3 }
 0x4d0   : > { %v4434_v51 = vadd.f32 %v2345_v35, %v2233_v52  ;;  %v2245_v52 = vadd.f32 %v4314_v20, %v2132_v32  ;;  %v1876_v32 = vld [vmem:[#allocation7 + $0x1ef0] sm:$0xff] }
 0x4d1   : > { %v4438_v13 = vpop.f32.mrf.mxu0 }
 0x4d2   : > { %v4476_v35 = vpop.permute.xlu1 %1994 }
 0x4d3   : > { %v4469_v56 = vpop.permute.xlu2 %2049 }
 0x4d4   : > { %2395 = vmatmul.f32.gmra.mxu3 %v1852_v7  ;;  %2460 = vmatmul.f32.gmra.mxu0 %v1789_v21 }
 0x4d5   : > { %v4480_v21 = vpop.permute.xlu0 %2054 }
 0x4d7   : > { %v2348_v40 = vpop.f32.mrf.mxu3 }
 0x4d8   : > { %v4447_v19 = vadd.f32 %v2348_v40, %v2236_v43  ;;  %v1805_v43 = vld [vmem:[#allocation7 + $0x1cb8] sm:$0xff] }
 0x4d9   : > { %v4449_v61 = vpop.f32.mrf.mxu0 }
 0x4db   : > { %v1970_v40 = vpop.permute.xlu2 %1969 }
 0x4dc   : > { %2398 = vmatmul.f32.gmra.mxu3 %v1856_v2  ;;  %2463 = vmatmul.f32.gmra.mxu0 %v1793_v30  ;;  %v4841_v2 = vld [vmem:[#allocation26_spill] sm:$0xff] }
 0x4dd   : > { %v2135_v30 = vadd.f32 %v4841_v2, %v1970_v40  ;;  %v1975_v8 = vpop.permute.xlu0 %1974 }
 0x4df   : > { %v2351_v11 = vpop.f32.mrf.mxu3  ;;  %v2248_v53 = vadd.f32 %v4323_v23, %v2135_v30 }
 0x4e0   : > { %v4457_v26 = vadd.f32 %v2351_v11, %v2239_v62  ;;  %v4488_v62 = vpop.permute.xlu1 %2059 }
 0x4e1   : > { %v4459_v22 = vpop.f32.mrf.mxu0 }
 0x4e4   : > { %2401 = vmatmul.f32.gmra.mxu3 %v1860_v16  ;;  %2466 = vmatmul.f32.gmra.mxu0 %v1797_v28  ;;  %v1872_v16 = vld [vmem:[#allocation7 + $0x1ed0] sm:$0xff]  ;;  %v1809_v28 = vld [vmem:[#allocation7 + $0x1cd8] sm:$0xff] }
 0x4e7   : > { %v2354_v27 = vpop.f32.mrf.mxu3 }
 0x4e8   : > { %v4467_v48 = vadd.f32 %v2354_v27, %v2242_v59  ;;  %v4842_v59 = vld [vmem:[#allocation27_spill] sm:$0xff] }
 0x4e9   : > { %v4471_v17 = vpop.f32.mrf.mxu0  ;;  %v2138_v27 = vadd.f32 %v4842_v59, %v1975_v8 }
 0x4ec   : > { %2404 = vmatmul.f32.gmra.mxu3 %v1864_v60  ;;  %2469 = vmatmul.f32.gmra.mxu0 %v1801_v9  ;;  %v2251_v60 = vadd.f32 %v4329_v47, %v2138_v27  ;;  %v1880_v47 = vld [vmem:[#allocation7 + $0x1f10] sm:$0xff] }
 0x4ef   : > { %v2357_v24 = vpop.f32.mrf.mxu3 }
 0x4f0   : > { %v4478_v7 = vadd.f32 %v2357_v24, %v2245_v52  ;;  %v1813_v52 = vld [vmem:[#allocation7 + $0x1cf8] sm:$0xff]  ;;  %v1980_v24 = vpop.permute.xlu1 %1979 }
 0x4f1   : > { %v4482_v31 = vpop.f32.mrf.mxu0 }
 0x4f4   : > { %2407 = vmatmul.f32.gmra.mxu3 %v1868_v49  ;;  %2472 = vmatmul.f32.gmra.mxu0 %v1805_v43  ;;  %v4843_v49 = vld [vmem:[#allocation28_spill] sm:$0xff] }
 0x4f5   : > { %v2141_v43 = vadd.f32 %v4843_v49, %v1980_v24  ;;  %v1888_v24 = vld [vmem:[#allocation7 + $0x1f50] sm:$0xff]  ;;  %v1825_v49 = vld [vmem:[#allocation7 + $0x1d58] sm:$0xff] }
 0x4f7   : > { %v2360_v5 = vpop.f32.mrf.mxu3  ;;  %v2254_v40 = vadd.f32 %v4335_v41, %v2141_v43  ;;  %v1821_v41 = vld [vmem:[#allocation7 + $0x1d38] sm:$0xff]  ;;  %v1892_v43 = vld [vmem:[#allocation7 + $0x1f70] sm:$0xff] }
 0x4f8   : > { %v4486_v20 = vadd.f32 %v2360_v5, %v2248_v53  ;;  %v1817_v5 = vld [vmem:[#allocation7 + $0x1d18] sm:$0xff]  ;;  %v2045_v58 = vpop.permute.xlu1 %2044 }
 0x4f9   : > { %v4490_v11 = vpop.f32.mrf.mxu0 }
 0x4fc   : > { %2410 = vmatmul.f32.gmra.mxu3 %v1872_v16  ;;  %2475 = vmatmul.f32.gmra.mxu0 %v1809_v28  ;;  %v4844_v16 = vld [vmem:[#allocation29_spill] sm:$0xff] }
 0x4fd   : > { %v2144_v28 = vadd.f32 %v4844_v16, %v1985_v14  ;;  %v1833_v16 = vld [vmem:[#allocation7 + $0x1d98] sm:$0xff] }
 0x4ff   : > { %v2363_v9 = vpop.f32.mrf.mxu3  ;;  %v2257_v8 = vadd.f32 %v4339_v37, %v2144_v28 }
 0x500   : > { %v4494_v15 = vadd.f32 %v2363_v9, %v2251_v60  ;;  %v1884_v9 = vld [vmem:[#allocation7 + $0x1f30] sm:$0xff] }
 0x501   : > { %v4496_v23 = vpop.f32.mrf.mxu0 }
 0x504   : > { %2413 = vmatmul.f32.gmra.mxu3 %v1876_v32  ;;  %2478 = vmatmul.f32.gmra.mxu0 %v1813_v52 }
 0x507   : > { %v2366_v2 = vpop.f32.mrf.mxu3 }
 0x508   : > { %v4500_v30 = vadd.f32 %v2366_v2, %v2254_v40  ;;  %v1829_v40 = vld [vmem:[#allocation7 + $0x1d78] sm:$0xff] }
 0x509   : > { %v4502_v53 = vpop.f32.mrf.mxu0 }
 0x50c   : > { %2416 = vmatmul.f32.gmra.mxu3 %v1880_v47  ;;  %2481 = vmatmul.f32.gmra.mxu0 %v1817_v5  ;;  %v1896_v5 = vld [vmem:[#allocation7 + $0x1f90] sm:$0xff] }
 0x50f   : > { %v2369_v59 = vpop.f32.mrf.mxu3 }
 0x510   : > { %v4506_v27 = vadd.f32 %v2369_v59, %v2257_v8  ;;  %v1900_v59 = vld [vmem:[#allocation7 + $0x1fb0] sm:$0xff] }
 0x511   : > { %v4508_v60 = vpop.f32.mrf.mxu0 }
 0x512   : > { %4845 = vst [vmem:[#allocation23_spill] sm:$0xff] %v4508_v60  ;;  %v1908_v60 = vld [vmem:[#allocation7 + $0x1ff0] sm:$0xff] }
 0x514   : > { %2419 = vmatmul.f32.gmra.mxu3 %v1884_v9  ;;  %2484 = vmatmul.f32.gmra.mxu0 %v1821_v41  ;;  %v1837_v9 = vld [vmem:[#allocation7 + $0x1db8] sm:$0xff] }
 0x517   : > { %v4510_v32 = vpop.f32.mrf.mxu3 }
 0x519   : > { %v4512_v52 = vpop.f32.mrf.mxu0 }
 0x51a   : > { %4846 = vst [vmem:[#allocation24_spill] sm:$0xff] %v4512_v52  ;;  %v1845_v52 = vld [vmem:[#allocation7 + $0x1df8] sm:$0xff] }
 0x51c   : > { %2422 = vmatmul.f32.gmra.mxu3 %v1888_v24  ;;  %2487 = vmatmul.f32.gmra.mxu0 %v1825_v49  ;;  %v1904_v49 = vld [vmem:[#allocation7 + $0x1fd0] sm:$0xff] }
 0x51f   : > { %v4514_v14 = vpop.f32.mrf.mxu3 }
 0x521   : > { %v4516_v37 = vpop.f32.mrf.mxu0 }
 0x522   : > { %4847 = vst [vmem:[#allocation25_spill] sm:$0xff] %v4516_v37 }
 0x524   : > { %2425 = vmatmul.f32.gmra.mxu3 %v1892_v43  ;;  %2490 = vmatmul.f32.gmra.mxu0 %v1829_v40  ;;  %v1841_v43 = vld [vmem:[#allocation7 + $0x1dd8] sm:$0xff] }
 0x527   : > { %v4518_v2 = vpop.f32.mrf.mxu3 }
 0x529   : > { %v4520_v47 = vpop.f32.mrf.mxu0 }
 0x52a   : > { %4848 = vst [vmem:[#allocation26_spill] sm:$0xff] %v4520_v47 }
 0x52c   : > { %2428 = vmatmul.f32.gmra.mxu3 %v1896_v5  ;;  %2493 = vmatmul.f32.gmra.mxu0 %v1833_v16  ;;  %v2040_v5 = vpop.permute.xlu0 %2039 }
 0x52f   : > { %v4522_v28 = vpop.f32.mrf.mxu3 }
 0x531   : > { %v4524_v8 = vpop.f32.mrf.mxu0 }
 0x532   : > { %4849 = vst [vmem:[#allocation27_spill] sm:$0xff] %v4524_v8  ;;  %v1853_v8 = vld [vmem:[#allocation7 + $0x1e38] sm:$0xff] }
 0x534   : > { %2431 = vmatmul.f32.gmra.mxu3 %v1900_v59  ;;  %2496 = vmatmul.f32.gmra.mxu0 %v1837_v9  ;;  %v1849_v9 = vld [vmem:[#allocation7 + $0x1e18] sm:$0xff]  ;;  %v2025_v37 = vpop.permute.xlu0 %2024 }
 0x535   : > { %v2168_v57 = vadd.f32 %v4290_v34, %v2025_v37  ;;  %v1857_v37 = vld [vmem:[#allocation7 + $0x1e58] sm:$0xff] }
 0x537   : > { %v4526_v41 = vpop.f32.mrf.mxu3 }
 0x539   : > { %v4528_v24 = vpop.f32.mrf.mxu0 }
 0x53a   : > { %4850 = vst [vmem:[#allocation28_spill] sm:$0xff] %v4528_v24 }
 0x53c   : > { %2434 = vmatmul.f32.gmra.mxu3 %v1904_v49  ;;  %2499 = vmatmul.f32.gmra.mxu0 %v1841_v43  ;;  %v2281_v49 = vadd.f32 %v4427_v1, %v2168_v57  ;;  %v2035_v1 = vpop.permute.xlu1 %2034  ;;  %v4853_v57 = vld [vmem:[#allocation39_spill] sm:$0xff] }
 0x53f   : > { %v4530_v40 = vpop.f32.mrf.mxu3 }
 0x541   : > { %v4532_v16 = vpop.f32.mrf.mxu0 }
 0x542   : > { %4851 = vst [vmem:[#allocation29_spill] sm:$0xff] %v4532_v16 }
 0x544   : > { %2437 = vmatmul.f32.gmra.mxu3 %v1908_v60  ;;  %2502 = vmatmul.f32.gmra.mxu0 %v1845_v52  ;;  %v2030_v60 = vpop.permute.xlu2 %2029  ;;  %v4852_v52 = vld [vmem:[#allocation38_spill] sm:$0xff] }
 0x545   : > { %v2171_v50 = vadd.f32 %v4852_v52, %v2030_v60  ;;  %v4854_v60 = vld [vmem:[#allocation40_spill] sm:$0xff] }
 0x547   : > { %v4534_v3 = vpop.f32.mrf.mxu3  ;;  %v2284_v12 = vadd.f32 %v4438_v13, %v2171_v50  ;;  %v2177_v50 = vadd.f32 %v4854_v60, %v2040_v5  ;;  %v1869_v5 = vld [vmem:[#allocation7 + $0x1eb8] sm:$0xff] }
 0x549   : > { %v4536_v59 = vpop.f32.mrf.mxu0 }
 0x54c   : > { %2505 = vmatmul.f32.gmra.mxu0 %v1849_v9  ;;  %v2174_v9 = vadd.f32 %v4853_v57, %v2035_v1  ;;  %v1865_v1 = vld [vmem:[#allocation7 + $0x1e98] sm:$0xff] }
 0x54f   : > { %v2393_v43 = vpop.f32.mrf.mxu3 }
 0x550   : > { %v4540_v47 = vadd.f32 %v2393_v43, %v2281_v49  ;;  %v2287_v49 = vadd.f32 %v4449_v61, %v2174_v9 }
 0x551   : > { %v4542_v6 = vpop.f32.mrf.mxu0 }
 0x554   : > { %2508 = vmatmul.f32.gmra.mxu0 %v1853_v8  ;;  %v1861_v8 = vld [vmem:[#allocation7 + $0x1e78] sm:$0xff] }
 0x557   : > { %v2396_v16 = vpop.f32.mrf.mxu3 }
 0x558   : > { %v4546_v24 = vadd.f32 %v2396_v16, %v2284_v12  ;;  %v2290_v12 = vadd.f32 %v4459_v22, %v2177_v50 }
 0x559   : > { %v4548_v34 = vpop.f32.mrf.mxu0 }
 0x55c   : > { %2511 = vmatmul.f32.gmra.mxu0 %v1857_v37  ;;  %v4855_v37 = vld [vmem:[#allocation41_spill] sm:$0xff] }
 0x55d   : > { %v2180_v57 = vadd.f32 %v4855_v37, %v2045_v58  ;;  %v1873_v58 = vld [vmem:[#allocation7 + $0x1ed8] sm:$0xff] }
 0x55f   : > { %v2399_v43 = vpop.f32.mrf.mxu3  ;;  %v2293_v61 = vadd.f32 %v4471_v17, %v2180_v57  ;;  %v4857_v17 = vld [vmem:[#allocation43_spill] sm:$0xff] }
 0x560   : > { %v4552_v45 = vadd.f32 %v2399_v43, %v2287_v49 }
 0x561   : > { %v4554_v55 = vpop.f32.mrf.mxu0 }
 0x564   : > { %2514 = vmatmul.f32.gmra.mxu0 %v1861_v8  ;;  %v4856_v8 = vld [vmem:[#allocation42_spill] sm:$0xff] }
 0x565   : > { %v2183_v22 = vadd.f32 %v4856_v8, %v4469_v56  ;;  %v1877_v56 = vld [vmem:[#allocation7 + $0x1ef8] sm:$0xff] }
 0x567   : > { %v2402_v13 = vpop.f32.mrf.mxu3  ;;  %v2296_v60 = vadd.f32 %v4482_v31, %v2183_v22  ;;  %v4858_v31 = vld [vmem:[#allocation44_spill] sm:$0xff] }
 0x568   : > { %v4558_v16 = vadd.f32 %v2402_v13, %v2290_v12 }
 0x569   : > { %v4560_v52 = vpop.f32.mrf.mxu0 }
 0x56c   : > { %2517 = vmatmul.f32.gmra.mxu0 %v1865_v1  ;;  %v2186_v1 = vadd.f32 %v4857_v17, %v4480_v21  ;;  %v1881_v21 = vld [vmem:[#allocation7 + $0x1f18] sm:$0xff] }
 0x56e   : > { %v2299_v37 = vadd.f32 %v4490_v11, %v2186_v1  ;;  %v4859_v11 = vld [vmem:[#allocation45_spill] sm:$0xff] }
 0x56f   : > { %v2405_v9 = vpop.f32.mrf.mxu3  ;;  %v2192_v17 = vadd.f32 %v4859_v11, %v4444_v25  ;;  %v1901_v25 = vld [vmem:[#allocation7 + $0x1fb8] sm:$0xff] }
 0x570   : > { %v4564_v49 = vadd.f32 %v2405_v9, %v2293_v61  ;;  %v4860_v11 = vld [vmem:[#allocation36_spill] sm:$0xff] }
 0x571   : > { %v4566_v43 = vpop.f32.mrf.mxu0  ;;  %v2305_v1 = vadd.f32 %v4502_v53, %v2192_v17  ;;  %v1905_v53 = vld [vmem:[#allocation7 + $0x1fd8] sm:$0xff]  ;;  %v2162_v17 = vadd.f32 %v4860_v11, %v4394_v36  ;;  %v4864_v11 = vld [vmem:[#allocation33_spill] sm:$0xff] }
 0x574   : > { %2520 = vmatmul.f32.gmra.mxu0 %v1869_v5  ;;  %v2189_v5 = vadd.f32 %v4858_v31, %v4488_v62  ;;  %v1889_v31 = vld [vmem:[#allocation7 + $0x1f58] sm:$0xff] }
 0x576   : > { %v2302_v8 = vadd.f32 %v4496_v23, %v2189_v5 }
 0x577   : > { %v2408_v50 = vpop.f32.mrf.mxu3 }
 0x578   : > { %v4571_v12 = vadd.f32 %v2408_v50, %v2296_v60 }
 0x579   : > { %v4573_v13 = vpop.f32.mrf.mxu0 }
 0x57c   : > { %2523 = vmatmul.f32.gmra.mxu0 %v1873_v58 }
 0x57f   : > { %v2411_v57 = vpop.f32.mrf.mxu3 }
 0x580   : > { %v4578_v61 = vadd.f32 %v2411_v57, %v2299_v37 }
 0x581   : > { %v4580_v9 = vpop.f32.mrf.mxu0 }
 0x584   : > { %2526 = vmatmul.f32.gmra.mxu0 %v1877_v56  ;;  %v1885_v56 = vld [vmem:[#allocation7 + $0x1f38] sm:$0xff] }
 0x587   : > { %v2414_v22 = vpop.f32.mrf.mxu3 }
 0x588   : > { %v4585_v60 = vadd.f32 %v2414_v22, %v2302_v8  ;;  %v1893_v8 = vld [vmem:[#allocation7 + $0x1f78] sm:$0xff] }
 0x589   : > { %v2482_v50 = vpop.f32.mrf.mxu0  ;;  %v1897_v22 = vld [vmem:[#allocation7 + $0x1f98] sm:$0xff] }
 0x58a   : > { %v4588_v58 = vadd.f32 %v2482_v50, %v4506_v27 }
 0x58c   : > { %2529 = vmatmul.f32.gmra.mxu0 %v1881_v21 }
 0x58f   : > { %v2417_v37 = vpop.f32.mrf.mxu3 }
 0x590   : > { %v4593_v57 = vadd.f32 %v2417_v37, %v2305_v1  ;;  %v4861_v1 = vld [vmem:[#allocation37_spill] sm:$0xff] }
 0x591   : > { %v2485_v62 = vpop.f32.mrf.mxu0  ;;  %v2165_v37 = vadd.f32 %v4861_v1, %v4412_v42  ;;  %v2153_v42 = vadd.f32 %v4864_v11, %v4429_v38  ;;  %v1909_v1 = vld [vmem:[#allocation7 + $0x1ff8] sm:$0xff] }
 0x593   : > { %v2278_v33 = vadd.f32 %v4419_v63, %v2165_v37  ;;  %v4865_v37 = vld [vmem:[#allocation32_spill] sm:$0xff] }
 0x594   : > { %2532 = vmatmul.f32.gmra.mxu0 %v1885_v56  ;;  %v4862_v56 = vld [vmem:[#allocation35_spill] sm:$0xff] }
 0x595   : > { %v2391_v36 = vadd.f32 %v4534_v3, %v2278_v33  ;;  %v4867_v33 = vld [vmem:[#allocation30_spill] sm:$0xff]  ;;  %v4868_v3 = vld [vmem:[#allocation48_spill] sm:$0xff] }
 0x596   : > { %v2147_v38 = vadd.f32 %v4867_v33, %v4465_v29 }
 0x599   : > { %v2488_v23 = vpop.f32.mrf.mxu0 }
 0x59c   : > { %2535 = vmatmul.f32.gmra.mxu0 %v1889_v31  ;;  %v2159_v31 = vadd.f32 %v4862_v56, %v4451_v46  ;;  %v4866_v56 = vld [vmem:[#allocation50_spill] sm:$0xff] }
 0x5a1   : > { %v2491_v5 = vpop.f32.mrf.mxu0 }
 0x5a4   : > { %2538 = vmatmul.f32.gmra.mxu0 %v1893_v8  ;;  %v2275_v8 = vadd.f32 %v4401_v18, %v2162_v17 }
 0x5a6   : > { %v2388_v54 = vadd.f32 %v4530_v40, %v2275_v8 }
 0x5a9   : > { %v2494_v27 = vpop.f32.mrf.mxu0 }
 0x5ac   : > { %2541 = vmatmul.f32.gmra.mxu0 %v1897_v22  ;;  %v4863_v22 = vld [vmem:[#allocation34_spill] sm:$0xff] }
 0x5ad   : > { %v2156_v0 = vadd.f32 %v4863_v22, %v4440_v44  ;;  %v2150_v44 = vadd.f32 %v4865_v37, %v4476_v35 }
 0x5af   : > { %v2269_v46 = vadd.f32 %v4364_v4, %v2156_v0  ;;  %v2263_v8 = vadd.f32 %v4868_v3, %v2150_v44  ;;  %v2596_v3 = vld [vmem:[#allocation7 + $0x24a0] sm:$0xff] }
 0x5b1   : > { %v2497_v50 = vpop.f32.mrf.mxu0  ;;  %v2382_v40 = vadd.f32 %v4522_v28, %v2269_v46  ;;  %v2376_v35 = vadd.f32 %v4514_v14, %v2263_v8 }
 0x5b3   : > { %v2495_v0 = vadd.f32 %v2494_v27, %v2382_v40 }
 0x5b4   : > { %2544 = vmatmul.f32.gmra.mxu0 %v1901_v25  ;;  %v2272_v25 = vadd.f32 %v4380_v39, %v2159_v31  ;;  %v2266_v39 = vadd.f32 %v4866_v56, %v2153_v42  ;;  %v2474_v42 = vadd.f32 %v4566_v43, %v4486_v20  ;;  %v2592_v56 = vld [vmem:[#allocation7 + $0x2460] sm:$0xff] }
 0x5b6   : > { %v2385_v18 = vadd.f32 %v4526_v41, %v2272_v25  ;;  %v2379_v4 = vadd.f32 %v4518_v2, %v2266_v39  ;;  %v2489_v25 = vadd.f32 %v2488_v23, %v2376_v35  ;;  %v4661_v39 = vpop.f32.mrf.mxu3 }
 0x5b8   : > { %v2498_v31 = vadd.f32 %v2497_v50, %v2385_v18 }
 0x5b9   : > { %v2500_v21 = vpop.f32.mrf.mxu0 }
 0x5ba   : > { %v2501_v17 = vadd.f32 %v2500_v21, %v2388_v54  ;;  %v4869_v54 = vld [vmem:[#allocation46_spill] sm:$0xff]  ;;  %v2492_v21 = vadd.f32 %v2491_v5, %v2379_v4  ;;  %v2480_v5 = vadd.f32 %v4580_v9, %v4500_v30  ;;  %v2471_v9 = vadd.f32 %v4560_v52, %v4478_v7  ;;  %v2598_v4 = vld [vmem:[#allocation7 + $0x24c0] sm:$0xff] }
 0x5bb   : > { %v2260_v41 = vadd.f32 %v4869_v54, %v2147_v38  ;;  %v2462_v7 = vadd.f32 %v4542_v6, %v4447_v19  ;;  %v2586_v19 = vld [vmem:[#allocation7 + $0x2400] sm:$0xff] }
 0x5bc   : > { %2547 = vmatmul.f32.gmra.mxu0 %v1905_v53 }
 0x5bd   : > { %v2373_v50 = vadd.f32 %v4510_v32, %v2260_v41  ;;  %v2600_v41 = vld [vmem:[#allocation7 + $0x24e0] sm:$0xff] }
 0x5be   : > { %v2423_v38 = vpop.f32.mrf.mxu3 }
 0x5bf   : > { %v2486_v2 = vadd.f32 %v2485_v62, %v2373_v50 }
 0x5c1   : > { %v2503_v53 = vpop.f32.mrf.mxu0 }
 0x5c2   : > { %v2504_v63 = vadd.f32 %v2503_v53, %v2391_v36 }
 0x5c4   : > { %3398 = vtanh.f32 %v2504_v63  ;;  %2550 = vmatmul.f32.gmra.mxu0 %v1909_v1 }
 0x5c5   : > { %3400 = vtanh.f32 %v2501_v17 }
 0x5c6   : > { %3402 = vtanh.f32 %v2498_v31  ;;  %v2594_v31 = vld [vmem:[#allocation7 + $0x2480] sm:$0xff] }
 0x5c7   : > { %3404 = vtanh.f32 %v2495_v0 }
 0x5c8   : > { %3406 = vtanh.f32 %v2492_v21 }
 0x5c9   : > { %v2506_v22 = vpop.f32.mrf.mxu0  ;;  %3408 = vtanh.f32 %v2489_v25  ;;  %v2606_v25 = vld [vmem:[#allocation7 + $0x2540] sm:$0xff] }
 0x5ca   : > { %v3399_v28 = vpop.eup %3398  ;;  %v4624_v29 = vadd.f32 %v2506_v22, %v4540_v47  ;;  %3410 = vtanh.f32 %v2486_v2  ;;  %v2477_v47 = vadd.f32 %v4573_v13, %v4494_v15  ;;  %v2468_v15 = vadd.f32 %v4554_v55, %v4467_v48  ;;  %v4870_v2 = vld [vmem:[#allocation16_spill] sm:$0xff] }
 0x5cb   : > { %2714 = vmatpush.msrb.mxu1 %v3399_v28  ;;  %v3401_v36 = vpop.eup %3400  ;;  %3412 = vtanh.f32 %v4588_v58  ;;  %v2465_v58 = vadd.f32 %v4548_v34, %v4457_v26  ;;  %v2459_v55 = vadd.f32 %v4536_v59, %v4434_v51  ;;  %v2588_v59 = vld [vmem:[#allocation7 + $0x2420] sm:$0xff] }
 0x5cc   : > { %v3403_v27 = vpop.eup %3402  ;;  %3414 = vtanh.f32 %v2480_v5  ;;  %v2604_v28 = vld [vmem:[#allocation7 + $0x2520] sm:$0xff] }
 0x5cd   : > { %2715 = vmatpush.msrb.mxu1 %v3401_v36  ;;  %v3405_v14 = vpop.eup %3404  ;;  %3416 = vtanh.f32 %v2477_v47  ;;  %v4872_v5 = vld [vmem:[#allocation20_spill] sm:$0xff]  ;;  %v4873_v47 = vld [vmem:[#allocation22_spill] sm:$0xff] }
 0x5ce   : > { %v3407_v32 = vpop.eup %3406  ;;  %3418 = vtanh.f32 %v2474_v42 }
 0x5cf   : > { %2716 = vmatpush.msrb.mxu1 %v3403_v27  ;;  %v3409_v23 = vpop.eup %3408  ;;  %3420 = vtanh.f32 %v2471_v9  ;;  %v2210_v27 = vadd.f32 %v4870_v2, %v4373_v10  ;;  %v4880_v10 = vld [vmem:[#allocation17_spill] sm:$0xff] }
 0x5d0   : > { %v3411_v30 = vpop.eup %3410  ;;  %3422 = vtanh.f32 %v2468_v15 }
 0x5d1   : > { %v2509_v11 = vpop.f32.mrf.mxu0  ;;  %2717 = vmatpush.msrb.mxu1 %v3405_v14  ;;  %v3413_v53 = vpop.eup %3412  ;;  %3424 = vtanh.f32 %v2465_v58  ;;  %v4871_v14 = vld [vmem:[#allocation19_spill] sm:$0xff]  ;;  %v4878_v58 = vld [vmem:[#allocation13_spill] sm:$0xff] }
 0x5d2   : > { %v4632_v62 = vadd.f32 %v2509_v11, %v4546_v24  ;;  %v3415_v13 = vpop.eup %3414  ;;  %3426 = vtanh.f32 %v2462_v7  ;;  %v2213_v11 = vadd.f32 %v4872_v5, %v4871_v14  ;;  %v4879_v7 = vld [vmem:[#allocation27_spill] sm:$0xff] }
 0x5d3   : > { %2718 = vmatpush.msrb.mxu1 %v3407_v32  ;;  %v3417_v43 = vpop.eup %3416  ;;  %3428 = vtanh.f32 %v2459_v55 }
 0x5d4   : > { %v3419_v52 = vpop.eup %3418 }
 0x5d5   : > { %2719 = vmatpush.msrb.mxu1 %v3409_v23  ;;  %v3421_v48 = vpop.eup %3420  ;;  %v4874_v23 = vld [vmem:[#allocation15_spill] sm:$0xff] }
 0x5d6   : > { %v3423_v34 = vpop.eup %3422  ;;  %v2207_v42 = vadd.f32 %v4874_v23, %v4873_v47 }
 0x5d7   : > { %2720 = vmatpush.msrb.mxu1 %v3411_v30  ;;  %v3425_v1 = vpop.eup %3424  ;;  %v4875_v30 = vld [vmem:[#allocation28_spill] sm:$0xff] }
 0x5d8   : > { %v3427_v6 = vpop.eup %3426  ;;  %v2323_v9 = vadd.f32 %v4875_v30, %v2210_v27 }
 0x5d9   : > { %v2512_v24 = vpop.f32.mrf.mxu0  ;;  %2721 = vmatpush.msrb.mxu1 %v3413_v53  ;;  %v3429_v46 = vpop.eup %3428  ;;  %v4876_v53 = vld [vmem:[#allocation29_spill] sm:$0xff] }
 0x5da   : > { %v4643_v20 = vadd.f32 %v2512_v24, %v4552_v45  ;;  %v2326_v15 = vadd.f32 %v4876_v53, %v2213_v11  ;;  %v2608_v24 = vld [vmem:[#allocation7 + $0x2560] sm:$0xff]  ;;  %v2591_v53 = vld [vmem:[#allocation7 + $0x2448] sm:$0xff] }
 0x5db   : > { %2722 = vmatpush.msrb.mxu1 %v3415_v13  ;;  %v4877_v13 = vld [vmem:[#allocation31_spill] sm:$0xff] }
 0x5dd   : > { %2723 = vmatpush.msrb.mxu1 %v3417_v43  ;;  %v2204_v43 = vadd.f32 %v4878_v58, %v4877_v13  ;;  %v2601_v13 = vld [vmem:[#allocation7 + $0x24e8] sm:$0xff] }
 0x5de   : > { %v2603_v58 = vld [vmem:[#allocation7 + $0x2508] sm:$0xff] }
 0x5df   : > { %2724 = vmatpush.msrb.mxu1 %v3419_v52  ;;  %v2320_v52 = vadd.f32 %v4879_v7, %v2207_v42  ;;  %v2607_v7 = vld [vmem:[#allocation7 + $0x2548] sm:$0xff] }
 0x5e1   : > { %v2515_v26 = vpop.f32.mrf.mxu0  ;;  %2725 = vmatpush.msrb.mxu1 %v3421_v48 }
 0x5e2   : > { %v4650_v45 = vadd.f32 %v2515_v26, %v4558_v16  ;;  %v2590_v16 = vld [vmem:[#allocation7 + $0x2440] sm:$0xff]  ;;  %v4881_v26 = vld [vmem:[#allocation14_spill] sm:$0xff] }
 0x5e3   : > { %2726 = vmatpush.msrb.mxu1 %v3423_v34  ;;  %v2201_v34 = vadd.f32 %v4881_v26, %v4880_v10  ;;  %v2642_v26 = vpop.permute.xlu2 %2641 }
 0x5e5   : > { %2727 = vmatpush.msrb.mxu1 %v3425_v1 }
 0x5e7   : > { %2728 = vmatpush.msrb.mxu1 %v3427_v6  ;;  %v4882_v6 = vld [vmem:[#allocation26_spill] sm:$0xff] }
 0x5e9   : > { %v2518_v18 = vpop.f32.mrf.mxu0  ;;  %2729 = vmatpush.msrb.mxu1 %v3429_v46 }
 0x5ea   : > { %v4653_v51 = vadd.f32 %v2518_v18, %v4564_v49  ;;  %2730 = vmatmul.f32.vlgmr.msrb.gmra.mxu1 %v2586_v19  ;;  %v2317_v19 = vadd.f32 %v4882_v6, %v2204_v43  ;;  %v2605_v43 = vld [vmem:[#allocation7 + $0x2528] sm:$0xff] }
 0x5f1   : > { %v2521_v17 = vpop.f32.mrf.mxu0 }
 0x5f2   : > { %v4656_v63 = vadd.f32 %v2521_v17, %v4571_v12  ;;  %2733 = vmatmul.f32.gmra.mxu1 %v2588_v59  ;;  %v4883_v17 = vld [vmem:[#allocation21_spill] sm:$0xff] }
 0x5f9   : > { %v2524_v37 = vpop.f32.mrf.mxu0 }
 0x5fa   : > { %v4659_v44 = vadd.f32 %v2524_v37, %v4578_v61  ;;  %2736 = vmatmul.f32.gmra.mxu1 %v2590_v16  ;;  %v2426_v61 = vpop.f32.mrf.mxu3  ;;  %v4884_v16 = vld [vmem:[#allocation49_spill] sm:$0xff] }
 0x5fb   : > { %v2198_v37 = vadd.f32 %v4884_v16, %v4883_v17 }
 0x601   : > { %v2527_v40 = vpop.f32.mrf.mxu0 }
 0x602   : > { %v4664_v49 = vadd.f32 %v2527_v40, %v4585_v60  ;;  %2739 = vmatmul.f32.gmra.mxu1 %v2592_v56  ;;  %v2429_v54 = vpop.f32.mrf.mxu3  ;;  %v2602_v60 = vld [vmem:[#allocation7 + $0x2500] sm:$0xff] }
 0x603   : > { %v4885_v56 = vld [vmem:[#allocation25_spill] sm:$0xff] }
 0x604   : > { %v2314_v40 = vadd.f32 %v4885_v56, %v2201_v34  ;;  %v2647_v34 = vpop.permute.xlu0 %2646 }
 0x609   : > { %v2530_v33 = vpop.f32.mrf.mxu0 }
 0x60a   : > { %v4667_v12 = vadd.f32 %v2530_v33, %v4593_v57  ;;  %2742 = vmatmul.f32.gmra.mxu1 %v2594_v31  ;;  %v2432_v21 = vpop.f32.mrf.mxu3  ;;  %v2430_v31 = vadd.f32 %v2429_v54, %v2317_v19 }
 0x60b   : > { %v2433_v46 = vadd.f32 %v2432_v21, %v2320_v52  ;;  %v2610_v21 = vld [vmem:[#allocation7 + $0x2580] sm:$0xff]  ;;  %v2609_v52 = vld [vmem:[#allocation7 + $0x2568] sm:$0xff] }
 0x611   : > { %v2533_v8 = vpop.f32.mrf.mxu0 }
 0x612   : > { %2745 = vmatmul.f32.gmra.mxu1 %v2596_v3  ;;  %v2435_v50 = vpop.f32.mrf.mxu3  ;;  %v4886_v3 = vld [vmem:[#allocation18_spill] sm:$0xff] }
 0x613   : > { %v2436_v55 = vadd.f32 %v2435_v50, %v2323_v9  ;;  %v2427_v50 = vadd.f32 %v2426_v61, %v2314_v40 }
 0x619   : > { %v2536_v0 = vpop.f32.mrf.mxu0 }
 0x61a   : > { %2748 = vmatmul.f32.gmra.mxu1 %v2598_v4  ;;  %v2438_v32 = vpop.f32.mrf.mxu3  ;;  %v4887_v4 = vld [vmem:[#allocation47_spill] sm:$0xff] }
 0x61b   : > { %v2439_v48 = vadd.f32 %v2438_v32, %v2326_v15  ;;  %v2593_v15 = vld [vmem:[#allocation7 + $0x2468] sm:$0xff] }
 0x621   : > { %v2539_v35 = vpop.f32.mrf.mxu0 }
 0x622   : > { %2751 = vmatmul.f32.gmra.mxu1 %v2600_v41  ;;  %v2195_v41 = vadd.f32 %v4887_v4, %v4886_v3  ;;  %v2540_v14 = vadd.f32 %v2539_v35, %v2427_v50 }
 0x629   : > { %v2542_v22 = vpop.f32.mrf.mxu0 }
 0x62a   : > { %2754 = vmatmul.f32.gmra.mxu1 %v2602_v60  ;;  %v4888_v60 = vld [vmem:[#allocation24_spill] sm:$0xff] }
 0x631   : > { %v2545_v57 = vpop.f32.mrf.mxu0 }
 0x632   : > { %2757 = vmatmul.f32.gmra.mxu1 %v2604_v28  ;;  %v2546_v33 = vadd.f32 %v2545_v57, %v2433_v46  ;;  %v2311_v28 = vadd.f32 %v4888_v60, %v2198_v37  ;;  %v2657_v46 = vpop.permute.xlu2 %2656  ;;  %v2617_v37 = vld [vmem:[#allocation7 + $0x25e8] sm:$0xff] }
 0x634   : > { %v2424_v27 = vadd.f32 %v2423_v38, %v2311_v28 }
 0x636   : > { %v2537_v54 = vadd.f32 %v2536_v0, %v2424_v27 }
 0x639   : > { %v2548_v36 = vpop.f32.mrf.mxu0 }
 0x63a   : > { %2760 = vmatmul.f32.gmra.mxu1 %v2606_v25  ;;  %v2549_v18 = vadd.f32 %v2548_v36, %v2436_v55  ;;  %v2543_v25 = vadd.f32 %v2542_v22, %v2430_v31  ;;  %v4889_v36 = vld [vmem:[#allocation23_spill] sm:$0xff]  ;;  %v2612_v22 = vld [vmem:[#allocation7 + $0x25a0] sm:$0xff]  ;;  %v2611_v55 = vld [vmem:[#allocation7 + $0x2588] sm:$0xff]  ;;  %v4704_v56 = vpop.permute.xlu2 %2671 }
 0x63b   : > { %v2308_v2 = vadd.f32 %v4889_v36, %v2195_v41 }
 0x63d   : > { %v2421_v11 = vadd.f32 %v4661_v39, %v2308_v2 }
 0x63f   : > { %v2534_v32 = vadd.f32 %v2533_v8, %v2421_v11  ;;  %v2614_v8 = vld [vmem:[#allocation7 + $0x25c0] sm:$0xff] }
 0x641   : > { %v2551_v1 = vpop.f32.mrf.mxu0 }
 0x642   : > { %v2552_v59 = vadd.f32 %v2551_v1, %v2439_v48  ;;  %2763 = vmatmul.f32.gmra.mxu1 %v2608_v24  ;;  %v2597_v24 = vld [vmem:[#allocation7 + $0x24a8] sm:$0xff]  ;;  %v2637_v48 = vpop.permute.xlu1 %2636  ;;  %v4710_v3 = vpop.permute.xlu2 %2686 }
 0x643   : > { %v2613_v1 = vld [vmem:[#allocation7 + $0x25a8] sm:$0xff] }
 0x644   : > { %3430 = vtanh.f32 %v2552_v59  ;;  %v2615_v59 = vld [vmem:[#allocation7 + $0x25c8] sm:$0xff] }
 0x645   : > { %3432 = vtanh.f32 %v2549_v18  ;;  %v4700_v18 = vpop.permute.xlu0 %2661 }
 0x646   : > { %3434 = vtanh.f32 %v2546_v33 }
 0x647   : > { %3436 = vtanh.f32 %v2543_v25 }
 0x648   : > { %3438 = vtanh.f32 %v2540_v14 }
 0x649   : > { %3440 = vtanh.f32 %v2537_v54 }
 0x64a   : > { %v3431_v5 = vpop.eup %3430  ;;  %2766 = vmatmul.f32.gmra.mxu1 %v2610_v21  ;;  %3442 = vtanh.f32 %v2534_v32  ;;  %v2652_v6 = vpop.permute.xlu1 %2651 }
 0x64b   : > { %2779 = vmatpush.msrb.mxu2 %v3431_v5  ;;  %v3433_v57 = vpop.eup %3432  ;;  %3444 = vtanh.f32 %v4667_v12  ;;  %v4716_v21 = vpop.permute.xlu2 %2701 }
 0x64c   : > { %v3435_v61 = vpop.eup %3434  ;;  %3446 = vtanh.f32 %v4664_v49 }
 0x64d   : > { %2780 = vmatpush.msrb.mxu2 %v3433_v57  ;;  %v3437_v47 = vpop.eup %3436  ;;  %3448 = vtanh.f32 %v4659_v44  ;;  %v2616_v44 = vld [vmem:[#allocation7 + $0x25e0] sm:$0xff]  ;;  %v4706_v40 = vpop.permute.xlu0 %2676 }
 0x64e   : > { %v3439_v38 = vpop.eup %3438  ;;  %3450 = vtanh.f32 %v4656_v63 }
 0x64f   : > { %2781 = vmatpush.msrb.mxu2 %v3435_v61  ;;  %v3441_v39 = vpop.eup %3440  ;;  %3452 = vtanh.f32 %v4653_v51 }
 0x650   : > { %v3443_v0 = vpop.eup %3442  ;;  %3454 = vtanh.f32 %v4650_v45  ;;  %v2587_v45 = vld [vmem:[#allocation7 + $0x2408] sm:$0xff] }
 0x651   : > { %2782 = vmatpush.msrb.mxu2 %v3437_v47  ;;  %v3445_v35 = vpop.eup %3444  ;;  %3456 = vtanh.f32 %v4643_v20  ;;  %v2589_v20 = vld [vmem:[#allocation7 + $0x2428] sm:$0xff] }
 0x652   : > { %2769 = vmatmul.f32.gmra.mxu1 %v2612_v22  ;;  %v3447_v23 = vpop.eup %3446  ;;  %3458 = vtanh.f32 %v4632_v62  ;;  %v2595_v62 = vld [vmem:[#allocation7 + $0x2488] sm:$0xff]  ;;  %v4702_v17 = vpop.permute.xlu1 %2666 }
 0x653   : > { %2783 = vmatpush.msrb.mxu2 %v3439_v38  ;;  %v3449_v12 = vpop.eup %3448  ;;  %3460 = vtanh.f32 %v4624_v29  ;;  %v2599_v29 = vld [vmem:[#allocation7 + $0x24c8] sm:$0xff]  ;;  %v2879_v22 = vpop.permute.xlu2 %2878 }
 0x654   : > { %v3451_v49 = vpop.eup %3450 }
 0x655   : > { %2784 = vmatpush.msrb.mxu2 %v3441_v39  ;;  %v3453_v42 = vpop.eup %3452  ;;  %v4712_v4 = vpop.permute.xlu0 %2691 }
 0x656   : > { %v3455_v63 = vpop.eup %3454 }
 0x657   : > { %2785 = vmatpush.msrb.mxu2 %v3443_v0  ;;  %v3457_v51 = vpop.eup %3456 }
 0x658   : > { %v3459_v30 = vpop.eup %3458 }
 0x659   : > { %2786 = vmatpush.msrb.mxu2 %v3445_v35  ;;  %v3461_v9 = vpop.eup %3460 }
 0x65a   : > { %2772 = vmatmul.f32.gmra.mxu1 %v2614_v8  ;;  %v4708_v31 = vpop.permute.xlu1 %2681 }
 0x65b   : > { %2787 = vmatpush.msrb.mxu2 %v3447_v23 }
 0x65d   : > { %2788 = vmatpush.msrb.mxu2 %v3449_v12  ;;  %v4718_v36 = vpop.permute.xlu0 %2706 }
 0x65f   : > { %2789 = vmatpush.msrb.mxu2 %v3451_v49 }
 0x661   : > { %2790 = vmatpush.msrb.mxu2 %v3453_v42 }
 0x662   : > { %2775 = vmatmul.f32.gmra.mxu1 %v2616_v44  ;;  %v4714_v50 = vpop.permute.xlu1 %2696 }
 0x663   : > { %2791 = vmatpush.msrb.mxu2 %v3455_v63 }
 0x665   : > { %2792 = vmatpush.msrb.mxu2 %v3457_v51  ;;  %v2884_v47 = vpop.permute.xlu0 %2883 }
 0x667   : > { %2793 = vmatpush.msrb.mxu2 %v3459_v30  ;;  %v2731_v10 = vpop.f32.mrf.mxu1 }
 0x668   : > { %v2732_v41 = vadd.f32 %v2731_v10, %v2637_v48 }
 0x669   : > { %2794 = vmatpush.msrb.mxu2 %v3461_v9 }
 0x66a   : > { %2795 = vmatmul.f32.vlgmr.msrb.gmra.mxu2 %v2587_v45  ;;  %v4720_v11 = vpop.permute.xlu1 %2711 }
 0x66f   : > { %v2734_v19 = vpop.f32.mrf.mxu1 }
 0x670   : > { %v2735_v2 = vadd.f32 %v2734_v19, %v2642_v26 }
 0x672   : > { %2798 = vmatmul.f32.gmra.mxu2 %v2589_v20  ;;  %v2889_v49 = vpop.permute.xlu1 %2888  ;;  %v2894_v20 = vpop.permute.xlu2 %2893 }
 0x677   : > { %v2737_v16 = vpop.f32.mrf.mxu1 }
 0x678   : > { %v2738_v54 = vadd.f32 %v2737_v16, %v2647_v34 }
 0x67a   : > { %2801 = vmatmul.f32.gmra.mxu2 %v2591_v53 }
 0x67f   : > { %v2740_v33 = vpop.f32.mrf.mxu1 }
 0x680   : > { %v2741_v35 = vadd.f32 %v2740_v33, %v2652_v6 }
 0x682   : > { %2804 = vmatmul.f32.gmra.mxu2 %v2593_v15 }
 0x687   : > { %v2743_v25 = vpop.f32.mrf.mxu1 }
 0x688   : > { %v2744_v30 = vadd.f32 %v2743_v25, %v2657_v46 }
 0x68a   : > { %2807 = vmatmul.f32.gmra.mxu2 %v2595_v62 }
 0x68f   : > { %v2746_v57 = vpop.f32.mrf.mxu1 }
 0x690   : > { %v2747_v16 = vadd.f32 %v2746_v57, %v4700_v18 }
 0x692   : > { %2810 = vmatmul.f32.gmra.mxu2 %v2597_v24 }
 0x697   : > { %v2749_v42 = vpop.f32.mrf.mxu1 }
 0x698   : > { %v2750_v33 = vadd.f32 %v2749_v42, %v4702_v17 }
 0x69a   : > { %2813 = vmatmul.f32.gmra.mxu2 %v2599_v29 }
 0x69f   : > { %v2752_v62 = vpop.f32.mrf.mxu1 }
 0x6a0   : > { %v2753_v25 = vadd.f32 %v2752_v62, %v4704_v56 }
 0x6a2   : > { %2816 = vmatmul.f32.gmra.mxu2 %v2601_v13 }
 0x6aa   : > { %2819 = vmatmul.f32.gmra.mxu2 %v2603_v58  ;;  %v2899_v58 = vpop.permute.xlu0 %2898 }
 0x6b2   : > { %2822 = vmatmul.f32.gmra.mxu2 %v2605_v43 }
 0x6ba   : > { %2825 = vmatmul.f32.gmra.mxu2 %v2607_v7 }
 0x6c2   : > { %2828 = vmatmul.f32.gmra.mxu2 %v2609_v52  ;;  %v2755_v52 = vpop.f32.mrf.mxu1 }
 0x6ca   : > { %2831 = vmatmul.f32.gmra.mxu2 %v2611_v55  ;;  %v2758_v48 = vpop.f32.mrf.mxu1 }
 0x6d2   : > { %2834 = vmatmul.f32.gmra.mxu2 %v2613_v1  ;;  %v2761_v34 = vpop.f32.mrf.mxu1 }
 0x6d3   : > { %v2762_v18 = vadd.f32 %v2761_v34, %v4710_v3 }
 0x6da   : > { %2837 = vmatmul.f32.gmra.mxu2 %v2615_v59  ;;  %v2764_v6 = vpop.f32.mrf.mxu1 }
 0x6db   : > { %v2765_v56 = vadd.f32 %v2764_v6, %v4712_v4 }
 0x6e2   : > { %2840 = vmatmul.f32.gmra.mxu2 %v2617_v37  ;;  %v2767_v46 = vpop.f32.mrf.mxu1  ;;  %v2904_v37 = vpop.permute.xlu1 %2903 }
 0x6ed   : > { %v2796_v60 = vpop.f32.mrf.mxu2 }
 0x6ee   : > { %v2797_v28 = vadd.f32 %v2796_v60, %v2732_v41  ;;  %v2770_v60 = vpop.f32.mrf.mxu1 }
 0x6ef   : > { %v2771_v3 = vadd.f32 %v2770_v60, %v4716_v21 }
 0x6f0   : > { %3462 = vtanh.f32 %v2797_v28 }
 0x6f5   : > { %v2799_v27 = vpop.f32.mrf.mxu2 }
 0x6f6   : > { %v2800_v14 = vadd.f32 %v2799_v27, %v2735_v2  ;;  %v3463_v5 = vpop.eup %3462  ;;  %v2909_v27 = vpop.permute.xlu2 %2908 }
 0x6f7   : > { %v2956_v39 = vmul.f32 %v3463_v5, %v2879_v22 }
 0x6f8   : > { %3464 = vtanh.f32 %v2800_v14  ;;  %v2756_v14 = vadd.f32 %v2755_v52, %v4706_v40 }
 0x6fd   : > { %v2802_v32 = vpop.f32.mrf.mxu2 }
 0x6fe   : > { %v3465_v61 = vpop.eup %3464  ;;  %v2803_v38 = vadd.f32 %v2802_v32, %v2738_v54  ;;  %v2759_v54 = vadd.f32 %v2758_v48, %v4708_v31 }
 0x6ff   : > { %v2957_v0 = vmul.f32 %v3465_v61, %v2884_v47  ;;  %v2914_v61 = vpop.permute.xlu0 %2913  ;;  %v2919_v47 = vpop.permute.xlu1 %2918 }
 0x700   : > { %3466 = vtanh.f32 %v2803_v38 }
 0x701   : > { %v2972_v8 = vadd.f32 %v2957_v0, %v2956_v39  ;;  %v2773_v39 = vpop.f32.mrf.mxu1  ;;  %v2768_v0 = vadd.f32 %v2767_v46, %v4714_v50 }
 0x702   : > { %v2774_v42 = vadd.f32 %v2773_v39, %v4718_v36 }
 0x705   : > { %v2805_v23 = vpop.f32.mrf.mxu2 }
 0x706   : > { %v3467_v12 = vpop.eup %3466  ;;  %v2806_v44 = vadd.f32 %v2805_v23, %v2741_v35  ;;  %v2924_v23 = vpop.permute.xlu2 %2923 }
 0x707   : > { %v2958_v63 = vmul.f32 %v3467_v12, %v2889_v49  ;;  %v2929_v50 = vpop.permute.xlu0 %2928  ;;  %v2934_v62 = vpop.permute.xlu1 %2933 }
 0x708   : > { %3468 = vtanh.f32 %v2806_v44 }
 0x709   : > { %v2973_v51 = vadd.f32 %v2972_v8, %v2958_v63  ;;  %v2776_v21 = vpop.f32.mrf.mxu1 }
 0x70a   : > { %v2777_v52 = vadd.f32 %v2776_v21, %v4720_v11 }
 0x70d   : > { %v2808_v45 = vpop.f32.mrf.mxu2 }
 0x70e   : > { %v3469_v9 = vpop.eup %3468  ;;  %v2809_v53 = vadd.f32 %v2808_v45, %v2744_v30 }
 0x70f   : > { %v2959_v15 = vmul.f32 %v3469_v9, %v2894_v20  ;;  %v2944_v46 = vpop.permute.xlu0 %2943 }
 0x710   : > { %3470 = vtanh.f32 %v2809_v53 }
 0x711   : > { %v2974_v24 = vadd.f32 %v2973_v51, %v2959_v15 }
 0x715   : > { %v2811_v29 = vpop.f32.mrf.mxu2 }
 0x716   : > { %v3471_v13 = vpop.eup %3470  ;;  %v2812_v41 = vadd.f32 %v2811_v29, %v2747_v16 }
 0x717   : > { %v2960_v43 = vmul.f32 %v3471_v13, %v2899_v58 }
 0x718   : > { %3472 = vtanh.f32 %v2812_v41 }
 0x719   : > { %v2975_v7 = vadd.f32 %v2974_v24, %v2960_v43 }
 0x71d   : > { %v2814_v55 = vpop.f32.mrf.mxu2 }
 0x71e   : > { %v2815_v2 = vadd.f32 %v2814_v55, %v2750_v33  ;;  %v3473_v22 = vpop.eup %3472 }
 0x71f   : > { %v2961_v8 = vmul.f32 %v3473_v22, %v2904_v37  ;;  %v2949_v37 = vpop.permute.xlu1 %2948 }
 0x720   : > { %3474 = vtanh.f32 %v2815_v2 }
 0x721   : > { %v2976_v63 = vadd.f32 %v2975_v7, %v2961_v8  ;;  %v2939_v7 = vpop.permute.xlu2 %2938 }
 0x725   : > { %v2817_v10 = vpop.f32.mrf.mxu2 }
 0x726   : > { %v2818_v5 = vadd.f32 %v2817_v10, %v2753_v25  ;;  %v3475_v40 = vpop.eup %3474 }
 0x727   : > { %v2962_v49 = vmul.f32 %v3475_v40, %v2909_v27 }
 0x728   : > { %3476 = vtanh.f32 %v2818_v5 }
 0x729   : > { %v2977_v20 = vadd.f32 %v2976_v63, %v2962_v49  ;;  %v2954_v11 = vpop.permute.xlu2 %2953 }
 0x72d   : > { %v2820_v26 = vpop.f32.mrf.mxu2 }
 0x72e   : > { %v2821_v32 = vadd.f32 %v2820_v26, %v2756_v14  ;;  %v3477_v35 = vpop.eup %3476 }
 0x72f   : > { %v2963_v51 = vmul.f32 %v3477_v35, %v2914_v61 }
 0x730   : > { %3478 = vtanh.f32 %v2821_v32 }
 0x731   : > { %v2978_v24 = vadd.f32 %v2977_v20, %v2963_v51 }
 0x735   : > { %v2823_v1 = vpop.f32.mrf.mxu2 }
 0x736   : > { %v2824_v17 = vadd.f32 %v2823_v1, %v2759_v54  ;;  %v3479_v44 = vpop.eup %3478 }
 0x737   : > { %v2964_v53 = vmul.f32 %v3479_v44, %v2919_v47 }
 0x738   : > { %3480 = vtanh.f32 %v2824_v17  ;;  %v2997_v17 = vpop.permute.xlu0 %2996 }
 0x739   : > { %v2979_v36 = vadd.f32 %v2978_v24, %v2964_v53 }
 0x73d   : > { %v2826_v19 = vpop.f32.mrf.mxu2 }
 0x73e   : > { %v2827_v38 = vadd.f32 %v2826_v19, %v2762_v18  ;;  %v3481_v45 = vpop.eup %3480 }
 0x73f   : > { %v2965_v29 = vmul.f32 %v3481_v45, %v2924_v23 }
 0x740   : > { %3482 = vtanh.f32 %v2827_v38 }
 0x741   : > { %v2980_v55 = vadd.f32 %v2979_v36, %v2965_v29 }
 0x745   : > { %v2829_v59 = vpop.f32.mrf.mxu2 }
 0x746   : > { %v2830_v31 = vadd.f32 %v2829_v59, %v2765_v56  ;;  %v3483_v15 = vpop.eup %3482 }
 0x747   : > { %v2966_v58 = vmul.f32 %v3483_v15, %v2929_v50 }
 0x748   : > { %3484 = vtanh.f32 %v2830_v31 }
 0x749   : > { %v2981_v1 = vadd.f32 %v2980_v55, %v2966_v58 }
 0x74d   : > { %v2832_v28 = vpop.f32.mrf.mxu2 }
 0x74e   : > { %v2833_v12 = vadd.f32 %v2832_v28, %v2768_v0  ;;  %v3485_v13 = vpop.eup %3484 }
 0x74f   : > { %v2967_v48 = vmul.f32 %v3485_v13, %v2934_v62 }
 0x750   : > { %3486 = vtanh.f32 %v2833_v12 }
 0x751   : > { %v2982_v59 = vadd.f32 %v2981_v1, %v2967_v48 }
 0x755   : > { %v2835_v57 = vpop.f32.mrf.mxu2 }
 0x756   : > { %v2836_v4 = vadd.f32 %v2835_v57, %v2771_v3  ;;  %v3487_v43 = vpop.eup %3486 }
 0x757   : > { %v2968_v6 = vmul.f32 %v3487_v43, %v2939_v7 }
 0x758   : > { %3488 = vtanh.f32 %v2836_v4 }
 0x759   : > { %v2983_v33 = vadd.f32 %v2982_v59, %v2968_v6 }
 0x75d   : > { %v2838_v30 = vpop.f32.mrf.mxu2 }
 0x75e   : > { %v2839_v9 = vadd.f32 %v2838_v30, %v2774_v42  ;;  %v3489_v26 = vpop.eup %3488 }
 0x75f   : > { %v2969_v16 = vmul.f32 %v3489_v26, %v2944_v46 }
 0x760   : > { %3490 = vtanh.f32 %v2839_v9 }
 0x761   : > { %v2984_v60 = vadd.f32 %v2983_v33, %v2969_v16 }
 0x765   : > { %v2841_v10 = vpop.f32.mrf.mxu2 }
 0x766   : > { %v2842_v34 = vadd.f32 %v2841_v10, %v2777_v52  ;;  %v3491_v19 = vpop.eup %3490 }
 0x767   : > { %v2970_v41 = vmul.f32 %v3491_v19, %v2949_v37 }
 0x768   : > { %3492 = vtanh.f32 %v2842_v34 }
 0x769   : > { %v2985_v25 = vadd.f32 %v2984_v60, %v2970_v41 }
 0x76e   : > { %v3493_v28 = vpop.eup %3492 }
 0x76f   : > { %v2971_v2 = vmul.f32 %v3493_v28, %v2954_v11 }
 0x771   : > { %v2986_v27 = vadd.f32 %v2985_v25, %v2971_v2 }
 0x773   : > { %v2987_v14 = vrot.slane %v2986_v27, 4 }
 0x775   : > { %v2988_v5 = vadd.f32 %v2987_v14, %v2986_v27 }
 0x777   : > { %v2989_v54 = vrot.slane %v2988_v5, 2 }
 0x779   : > { %v2990_v32 = vadd.f32 %v2989_v54, %v2988_v5 }
 0x77b   : > { %v2991_v61 = vrot.slane %v2990_v32, 1 }
 0x77d   : > { %v2992_v18 = vadd.f32 %v2991_v61, %v2990_v32 }
 0x77f   : > { %v2999_v57 = vadd.f32 %v2997_v17, %v2992_v18 }
 0x781   : > { %3000 = vst [vmem:[%s174_s8] sm:$0x1] %v2999_v57 }
 0x782   : > { %3581 = shalt.err (!%p3578_p9)
}
 0x783   : > { %3116 = dma.vmem_to_hbm [thread:$0]  (%p3710_p13), %s3013_s9, 16, %s3015_s10, %s3002_s11  }
 0x784 PF: > { %s3026_s23 = sand.u32 1, %s3612_s12   ;;  %p4890_p10 = scmp.ge.s32.totalorder %s3624_s0, 2 }
 0x785   : > { %s3027_s24 = scalar_lea.sflag [#allocation6], %s3026_s23 }
 0x786   : > { %p3127_p11 = pnand %p4890_p10, %p3715_p4 }
 0x788   : > { %p3128_p0 = pneg %p3127_p11 }
 0x78a   : > { %3607 = dma.done.wait (%p3128_p0), %s3027_s24, 16  }
 0x78b   : > { %3609 = vsyncadd (%p3128_p0), %s3027_s24, 4294967280  ;;  %p18_p2 = scmp.ge.s32.totalorder %s3690_s25, 4   ;;  %s4891_s12 = smov %s3616_s13 }
 0x78c   : > { %s4892_s13 = smov %s3620_s14  ;;  %s4893_s14 = smov %s3702_s28 }
 0x78d   : > { %s4894_s0 = smov %s3690_s25  ;;  %20 = sbr.rel (!%p18_p2) target bundleno = 6 (0x6), region = 77 }
 0x792   :  { %3032 = vsyncpa [#allocation5], 1 }
 0x793   :  { %3034 = vsyncpa [#allocation5 + $0x1], 1 }
 0x794   :  { %3035 = vsyncpa [#allocation8], 1 }
 0x795   :  { %3036 = vsyncpa [#allocation6], 1 }
 0x796   :  { %3038 = vsyncpa [#allocation6 + $0x1], 1 }

</bundles_post_ra>
